<compile_context>
chip_gen: v6e
topology: v6e:2x2x1
jax: 0.10.0
libtpu: 0.0.40
codegen_flags: <defaults>
</compile_context>

<pallas_src>
import functools

import jax
import jax.numpy as jnp
from jax import lax
from jax.experimental import pallas as pl
from jax.experimental.pallas import tpu as pltpu


# Set to jnp.bfloat16 on v6e/v7x to feed the MXU at bf16 peak (also shrinks the
# band/LHS scratch); the self-test tolerance must then be loosened to ~2e-2.
_COMPUTE_DTYPE = jnp.float32


def _round_up(x, m):
    return ((x + m - 1) // m) * m


def _vmem_capacity_bytes():
    # Per-generation VMEM: 128 MiB on v5e/v6e, 64 MiB per TensorCore on v7x.
    try:
        return int(pltpu.get_tpu_info().vmem_capacity_bytes)
    except Exception:
        return 64 * 2**20          # conservative fallback (v7x per-core VMEM)


def _conv3x3_bn_relu_kernel(body_ref, top_ref, bot_ref, w_ref, b_ref, o_ref,
                            band_ref, lhs_ref, *, kh, kw):
    # body_ref: (1, TH, W, Cin)    current band of input rows  (auto double-buffered)
    # top_ref : (1, 1, W, Cin)     row above the band (clamped; zeroed when t == 0)
    # bot_ref : (1, 1, W, Cin)     row below the band (clamped; zeroed when last band)
    # w_ref   : (KH*KW*Cin, OCp)   BN-scale-folded weights in im2col layout
    # b_ref   : (1, OCp)           folded conv-bias + BN bias (f32)
    # o_ref   : (1, TH, W, OCp)    output block
    # band_ref: (TH+2, W+2, Cin)   zero-padded band scratch
    # lhs_ref : (TH*W, KH*KW*Cin)  fused-im2col LHS scratch
    t = pl.program_id(1)
    nb = pl.num_programs(1)
    thp, wp, cin = band_ref.shape
    th = thp - (kh - 1)
    w = wp - (kw - 1)
    cdt = band_ref.dtype

    # ---- assemble the spatially padded input band in VMEM ------------------------
    band_ref[1:1 + th, 1:1 + w, :] = body_ref[0].astype(cdt)

    zcol = jnp.zeros((thp, 1, cin), cdt)
    band_ref[:, 0:1, :] = zcol                        # left padding column
    band_ref[:, 1 + w:2 + w, :] = zcol                # right padding column

    zrow = jnp.zeros((1, w, cin), cdt)

    @pl.when(t == 0)
    def _top_pad():                                   # top image border -> zeros
        band_ref[0:1, 1:1 + w, :] = zrow

    @pl.when(t > 0)
    def _top_halo():                                  # halo row from the band above
        band_ref[0:1, 1:1 + w, :] = top_ref[0].astype(cdt)

    @pl.when(t == nb - 1)
    def _bot_pad():                                   # bottom image border -> zeros
        band_ref[1 + th:2 + th, 1:1 + w, :] = zrow

    @pl.when(t < nb - 1)
    def _bot_halo():                                  # halo row from the band below
        band_ref[1 + th:2 + th, 1:1 + w, :] = bot_ref[0].astype(cdt)

    # ---- fused im2col: build a single big-K LHS, one MXU matmul per band ---------
    for ki in range(kh):
        for kj in range(kw):
            c0 = (ki * kw + kj) * cin
            lhs_ref[:, c0:c0 + cin] = (
                band_ref[ki:ki + th, kj:kj + w, :].reshape(th * w, cin))

    y = jnp.dot(lhs_ref[...], w_ref[...], preferred_element_type=jnp.float32)
    y = jnp.maximum(y + b_ref[...], 0.0)              # folded bias + BN, then ReLU
    o_ref[...] = y.reshape(o_ref.shape).astype(o_ref.dtype)


def _fused_conv3x3_bn_relu(x_nhwc, weight, conv_bias, gamma, beta, mean, var, *,
                           eps, tile_m, lane_pad=128):
    """One fused Conv3x3(s=1, p=1, bias) + BatchNorm(eval) + ReLU layer (NHWC).

    Returns (N, H, W, OCp) with OCp = round_up(OC, lane_pad); channels [OC:] are 0.
    """
    n, h, w, cin = x_nhwc.shape
    oc, cw, kh, kw = weight.shape
    ocp = _round_up(oc, lane_pad)
    kk = kh * kw * cin
    cdt = _COMPUTE_DTYPE

    # Fold conv bias + BatchNorm (eval, running stats) into the weights (per-channel
    # scale) and a single per-channel bias; ReLU is the kernel epilogue.
    scale = gamma / jnp.sqrt(var + eps)
    wk = jnp.transpose(weight, (2, 3, 1, 0)) * scale            # (KH, KW, Cw, OC)
    bias = (conv_bias - mean) * scale + beta                    # (OC,)
    if cw < cin:        # previous layer left zero-padded channels -> zero weight rows
        wk = jnp.pad(wk, ((0, 0), (0, 0), (0, cin - cw), (0, 0)))
    wk = jnp.pad(wk, ((0, 0), (0, 0), (0, 0), (0, ocp - oc)))
    wk = wk.reshape(kk, ocp).astype(cdt)                        # im2col weight layout
    bias = jnp.pad(bias, (0, ocp - oc)).reshape(1, ocp).astype(jnp.float32)

    csz = jnp.dtype(cdt).itemsize

    def vmem_est(th_):
        body = 2 * th_ * w * cin * csz                # double-buffered input band
        halo = 4 * w * cin * csz                      # top/bottom halo rows (x2 buf)
        wgt = 2 * kk * ocp * csz + 2 * ocp * 4        # weights + bias
        outb = 2 * th_ * w * ocp * 4                  # double-buffered output block
        band = (th_ + kh - 1) * (w + kw - 1) * cin * csz
        lhs = th_ * w * kk * csz
        mm = th_ * w * ocp * 4                        # matmul/epilogue temporaries
        return body + halo + wgt + outb + band + lhs + mm

    cap = _vmem_capacity_bytes()
    budget = cap // 2

    # TH = output rows per grid step.  A divisor of H (every block is full, no
    # partial-block writes), as large as the per-generation VMEM budget allows.
    th_cap = max(1, min(h, tile_m // max(1, w)))
    fitting = [d for d in range(1, h + 1)
               if h % d == 0 and d <= th_cap and vmem_est(d) <= budget]
    th = max(fitting) if fitting else 1
    nb = h // th

    # Leave headroom under physical VMEM (48 MiB cap on v7x, 96 MiB on v5e/v6e).
    vmem_limit = int(min(3 * cap // 4, max(32 * 2**20, int(1.25 * vmem_est(th)))))

    out = pl.pallas_call(
        functools.partial(_conv3x3_bn_relu_kernel, kh=kh, kw=kw),
        out_shape=jax.ShapeDtypeStruct((n, h, w, ocp), jnp.float32),
        grid_spec=pltpu.PrefetchScalarGridSpec(
            num_scalar_prefetch=0,
            grid=(n, nb),
            in_specs=[
                # Band body + two clamped halo rows: all auto-pipelined (double-
                # buffered) by Pallas, so HBM fetch overlaps the matmul.
                pl.BlockSpec((1, th, w, cin), lambda i, t: (i, t, 0, 0)),
                pl.BlockSpec((1, 1, w, cin),
                             lambda i, t: (i, jnp.maximum(t * th - 1, 0), 0, 0)),
                pl.BlockSpec((1, 1, w, cin),
                             lambda i, t: (i, jnp.minimum(t * th + th, h - 1), 0, 0)),
                pl.BlockSpec((kk, ocp), lambda i, t: (0, 0)),
                pl.BlockSpec((1, ocp), lambda i, t: (0, 0)),
            ],
            out_specs=pl.BlockSpec((1, th, w, ocp), lambda i, t: (i, t, 0, 0)),
            scratch_shapes=[
                pltpu.VMEM((th + kh - 1, w + kw - 1, cin), cdt),   # padded band
                pltpu.VMEM((th * w, kk), cdt),                     # fused-im2col LHS
            ],
        ),
        compiler_params=pltpu.CompilerParams(
            dimension_semantics=("parallel", "parallel"),
            vmem_limit_bytes=vmem_limit,
        ),
    )(x_nhwc, x_nhwc, x_nhwc, wk, bias)
    return out


@functools.partial(jax.jit, static_argnames=("eps", "tile_m"))
def conv_block_forward(x_nchw,
                       w1, b1, g1, be1, m1, v1,
                       w2, b2, g2, be2, m2, v2,
                       *, eps=1e-5, tile_m=2048):
    """PyTorch conv_block forward: (Conv3x3 -> BN(eval) -> ReLU) x 2, NCHW in/out."""
    oc = w2.shape[0]
    x = jnp.transpose(x_nchw, (0, 2, 3, 1))                   # NCHW -> NHWC (once)
    y = _fused_conv3x3_bn_relu(x, w1, b1, g1, be1, m1, v1, eps=eps, tile_m=tile_m)
    y = _fused_conv3x3_bn_relu(y, w2, b2, g2, be2, m2, v2, eps=eps, tile_m=tile_m)
    # Drop padded channels, back to NCHW (fuses with the channel slice).
    return jnp.transpose(y[..., :oc], (0, 3, 1, 2)).astype(x_nchw.dtype)


# ----------------------------- pure-JAX reference ------------------------------------
def _ref_layer(x, w, b, g, beta, m, v, eps):
    y = lax.conv_general_dilated(x, w, window_strides=(1, 1),
                                 padding=((1, 1), (1, 1)),
                                 dimension_numbers=("NCHW", "OIHW", "NCHW"))
    y = y + b[None, :, None, None]
    s = g / jnp.sqrt(v + eps)
    y = (y - m[None, :, None, None]) * s[None, :, None, None] + beta[None, :, None, None]
    return jnp.maximum(y, 0.0)


def _reference(x, p1, p2, eps=1e-5):
    y = _ref_layer(x, *p1, eps)
    return _ref_layer(y, *p2, eps)


if __name__ == "__main__":
    N, IN_CH, OUT_CH, H, W = 2, 4, 8, 16, 16

    key = jax.random.PRNGKey(0)
    ks = jax.random.split(key, 13)

    x = jax.random.normal(ks[0], (N, IN_CH, H, W), dtype=jnp.float32)

    w1 = jax.random.normal(ks[1], (OUT_CH, IN_CH, 3, 3), dtype=jnp.float32) * 0.1
    b1 = 0.1 * jax.random.normal(ks[2], (OUT_CH,), dtype=jnp.float32)
    g1 = 1.0 + 0.1 * jax.random.normal(ks[3], (OUT_CH,), dtype=jnp.float32)
    be1 = 0.1 * jax.random.normal(ks[4], (OUT_CH,), dtype=jnp.float32)
    m1 = 0.1 * jax.random.normal(ks[5], (OUT_CH,), dtype=jnp.float32)
    v1 = 1.0 + 0.1 * jax.random.uniform(ks[6], (OUT_CH,), dtype=jnp.float32)

    w2 = jax.random.normal(ks[7], (OUT_CH, OUT_CH, 3, 3), dtype=jnp.float32) * 0.1
    b2 = 0.1 * jax.random.normal(ks[8], (OUT_CH,), dtype=jnp.float32)
    g2 = 1.0 + 0.1 * jax.random.normal(ks[9], (OUT_CH,), dtype=jnp.float32)
    be2 = 0.1 * jax.random.normal(ks[10], (OUT_CH,), dtype=jnp.float32)
    m2 = 0.1 * jax.random.normal(ks[11], (OUT_CH,), dtype=jnp.float32)
    v2 = 1.0 + 0.1 * jax.random.uniform(ks[12], (OUT_CH,), dtype=jnp.float32)

    out = conv_block_forward(x, w1, b1, g1, be1, m1, v1, w2, b2, g2, be2, m2, v2)
    out = jax.block_until_ready(out)

    ref = _reference(x, (w1, b1, g1, be1, m1, v1), (w2, b2, g2, be2, m2, v2))
    assert out.shape == (N, OUT_CH, H, W), out.shape
    max_err = float(jnp.max(jnp.abs(out - ref)))
    assert jnp.allclose(out, ref, atol=1e-4, rtol=1e-4), max_err

    print("KERNEL_OK")
</pallas_src>

<mosaic_0001>
module attributes {stable_mosaic.version = 11 : i64} {
  func.func @_conv3x3_bn_relu_kernel(%arg0: i32, %arg1: i32, %arg2: memref<1x16x16x4xf32, #tpu.memory_space<vmem>>, %arg3: memref<1x1x16x4xf32, #tpu.memory_space<vmem>>, %arg4: memref<1x1x16x4xf32, #tpu.memory_space<vmem>>, %arg5: memref<36x128xf32, #tpu.memory_space<vmem>>, %arg6: memref<1x128xf32, #tpu.memory_space<vmem>>, %arg7: memref<1x16x16x128xf32, #tpu.memory_space<vmem>>, %arg8: memref<18x18x4xf32, #tpu.memory_space<vmem>>, %arg9: memref<256x36xf32, #tpu.memory_space<vmem>>) attributes {dimension_semantics = [#tpu.dimension_semantics<parallel>, #tpu.dimension_semantics<parallel>], iteration_bounds = array<i64: 2, 1>, scalar_prefetch = 0 : i64, scratch_operands = 2 : i64, tpu.core_type = #tpu.core_type<tc>, window_params = [{transform_indices = @transform_0, window_bounds = array<i64: 1, 16, 16, 4>}, {transform_indices = @transform_1, window_bounds = array<i64: 1, 1, 16, 4>}, {transform_indices = @transform_2, window_bounds = array<i64: 1, 1, 16, 4>}, {pipeline_mode = #tpu.pipeline_mode<synchronous>, transform_indices = @transform_3, window_bounds = array<i64: 36, 128>}, {pipeline_mode = #tpu.pipeline_mode<synchronous>, transform_indices = @transform_4, window_bounds = array<i64: 1, 128>}, {transform_indices = @transform_5, window_bounds = array<i64: 1, 16, 16, 128>}]} {
    %c0 = arith.constant 0 : index
    %c0_0 = arith.constant 0 : index
    %c0_1 = arith.constant 0 : index
    %c0_2 = arith.constant 0 : index
    %0 = vector.load %arg2[%c0, %c0_0, %c0_1, %c0_2] : memref<1x16x16x4xf32, #tpu.memory_space<vmem>>, vector<1x16x16x4xf32>
    %1 = vector.shape_cast %0 : vector<1x16x16x4xf32> to vector<16x16x4xf32>
    %c1 = arith.constant 1 : index
    %c1_3 = arith.constant 1 : index
    %c0_4 = arith.constant 0 : index
    %2 = vector.load %arg8[%c1, %c1_3, %c0_4] : memref<18x18x4xf32, #tpu.memory_space<vmem>>, vector<16x16x4xf32>
    tpu.vector_store %arg8[%c1, %c1_3, %c0_4], %1 {strides = array<i32>} : memref<18x18x4xf32, #tpu.memory_space<vmem>>, vector<16x16x4xf32>,
    %cst = arith.constant 0.000000e+00 : f32
    %3 = vector.broadcast %cst : f32 to vector<18x1x4xf32>
    %c0_5 = arith.constant 0 : index
    %c0_6 = arith.constant 0 : index
    %c0_7 = arith.constant 0 : index
    %4 = vector.load %arg8[%c0_5, %c0_6, %c0_7] : memref<18x18x4xf32, #tpu.memory_space<vmem>>, vector<18x1x4xf32>
    tpu.vector_store %arg8[%c0_5, %c0_6, %c0_7], %3 {strides = array<i32>} : memref<18x18x4xf32, #tpu.memory_space<vmem>>, vector<18x1x4xf32>,
    %c0_8 = arith.constant 0 : index
    %c17 = arith.constant 17 : index
    %c0_9 = arith.constant 0 : index
    %5 = vector.load %arg8[%c0_8, %c17, %c0_9] : memref<18x18x4xf32, #tpu.memory_space<vmem>>, vector<18x1x4xf32>
    tpu.vector_store %arg8[%c0_8, %c17, %c0_9], %3 {strides = array<i32>} : memref<18x18x4xf32, #tpu.memory_space<vmem>>, vector<18x1x4xf32>,
    %cst_10 = arith.constant 0.000000e+00 : f32
    %6 = vector.broadcast %cst_10 : f32 to vector<1x16x4xf32>
    %c0_i32 = arith.constant 0 : i32
    %7 = arith.cmpi eq, %arg1, %c0_i32 : i32
    %8 = arith.extui %7 : i1 to i32
    %c0_i32_11 = arith.constant 0 : i32
    %9 = arith.cmpi ne, %8, %c0_i32_11 : i32
    scf.if %9 {
      %c0_66 = arith.constant 0 : index
      %c1_67 = arith.constant 1 : index
      %c0_68 = arith.constant 0 : index
      %56 = vector.load %arg8[%c0_66, %c1_67, %c0_68] : memref<18x18x4xf32, #tpu.memory_space<vmem>>, vector<1x16x4xf32>
      tpu.vector_store %arg8[%c0_66, %c1_67, %c0_68], %6 {strides = array<i32>} : memref<18x18x4xf32, #tpu.memory_space<vmem>>, vector<1x16x4xf32>,
    } else {
    }
    %c0_i32_12 = arith.constant 0 : i32
    %10 = arith.cmpi sgt, %arg1, %c0_i32_12 : i32
    %11 = arith.extui %10 : i1 to i32
    %c0_i32_13 = arith.constant 0 : i32
    %12 = arith.cmpi ne, %11, %c0_i32_13 : i32
    scf.if %12 {
      %c0_66 = arith.constant 0 : index
      %c0_67 = arith.constant 0 : index
      %c0_68 = arith.constant 0 : index
      %c0_69 = arith.constant 0 : index
      %56 = vector.load %arg3[%c0_66, %c0_67, %c0_68, %c0_69] : memref<1x1x16x4xf32, #tpu.memory_space<vmem>>, vector<1x1x16x4xf32>
      %57 = vector.shape_cast %56 : vector<1x1x16x4xf32> to vector<1x16x4xf32>
      %c0_70 = arith.constant 0 : index
      %c1_71 = arith.constant 1 : index
      %c0_72 = arith.constant 0 : index
      %58 = vector.load %arg8[%c0_70, %c1_71, %c0_72] : memref<18x18x4xf32, #tpu.memory_space<vmem>>, vector<1x16x4xf32>
      tpu.vector_store %arg8[%c0_70, %c1_71, %c0_72], %57 {strides = array<i32>} : memref<18x18x4xf32, #tpu.memory_space<vmem>>, vector<1x16x4xf32>,
    } else {
    }
    %c0_i32_14 = arith.constant 0 : i32
    %13 = arith.cmpi eq, %arg1, %c0_i32_14 : i32
    %14 = arith.extui %13 : i1 to i32
    %c0_i32_15 = arith.constant 0 : i32
    %15 = arith.cmpi ne, %14, %c0_i32_15 : i32
    scf.if %15 {
      %c17_66 = arith.constant 17 : index
      %c1_67 = arith.constant 1 : index
      %c0_68 = arith.constant 0 : index
      %56 = vector.load %arg8[%c17_66, %c1_67, %c0_68] : memref<18x18x4xf32, #tpu.memory_space<vmem>>, vector<1x16x4xf32>
      tpu.vector_store %arg8[%c17_66, %c1_67, %c0_68], %6 {strides = array<i32>} : memref<18x18x4xf32, #tpu.memory_space<vmem>>, vector<1x16x4xf32>,
    } else {
    }
    %c0_i32_16 = arith.constant 0 : i32
    %16 = arith.cmpi slt, %arg1, %c0_i32_16 : i32
    %17 = arith.extui %16 : i1 to i32
    %c0_i32_17 = arith.constant 0 : i32
    %18 = arith.cmpi ne, %17, %c0_i32_17 : i32
    scf.if %18 {
      %c0_66 = arith.constant 0 : index
      %c0_67 = arith.constant 0 : index
      %c0_68 = arith.constant 0 : index
      %c0_69 = arith.constant 0 : index
      %56 = vector.load %arg4[%c0_66, %c0_67, %c0_68, %c0_69] : memref<1x1x16x4xf32, #tpu.memory_space<vmem>>, vector<1x1x16x4xf32>
      %57 = vector.shape_cast %56 : vector<1x1x16x4xf32> to vector<1x16x4xf32>
      %c17_70 = arith.constant 17 : index
      %c1_71 = arith.constant 1 : index
      %c0_72 = arith.constant 0 : index
      %58 = vector.load %arg8[%c17_70, %c1_71, %c0_72] : memref<18x18x4xf32, #tpu.memory_space<vmem>>, vector<1x16x4xf32>
      tpu.vector_store %arg8[%c17_70, %c1_71, %c0_72], %57 {strides = array<i32>} : memref<18x18x4xf32, #tpu.memory_space<vmem>>, vector<1x16x4xf32>,
    } else {
    }
    %c0_18 = arith.constant 0 : index
    %c0_19 = arith.constant 0 : index
    %c0_20 = arith.constant 0 : index
    %19 = vector.load %arg8[%c0_18, %c0_19, %c0_20] : memref<18x18x4xf32, #tpu.memory_space<vmem>>, vector<16x16x4xf32>
    %20 = vector.shape_cast %19 : vector<16x16x4xf32> to vector<256x4xf32>
    %c0_21 = arith.constant 0 : index
    %c0_22 = arith.constant 0 : index
    %21 = vector.load %arg9[%c0_21, %c0_22] : memref<256x36xf32, #tpu.memory_space<vmem>>, vector<256x4xf32>
    tpu.vector_store %arg9[%c0_21, %c0_22], %20 {strides = array<i32>} : memref<256x36xf32, #tpu.memory_space<vmem>>, vector<256x4xf32>,
    %c0_23 = arith.constant 0 : index
    %c1_24 = arith.constant 1 : index
    %c0_25 = arith.constant 0 : index
    %22 = vector.load %arg8[%c0_23, %c1_24, %c0_25] : memref<18x18x4xf32, #tpu.memory_space<vmem>>, vector<16x16x4xf32>
    %23 = vector.shape_cast %22 : vector<16x16x4xf32> to vector<256x4xf32>
    %c0_26 = arith.constant 0 : index
    %c4 = arith.constant 4 : index
    %24 = vector.load %arg9[%c0_26, %c4] : memref<256x36xf32, #tpu.memory_space<vmem>>, vector<256x4xf32>
    tpu.vector_store %arg9[%c0_26, %c4], %23 {strides = array<i32>} : memref<256x36xf32, #tpu.memory_space<vmem>>, vector<256x4xf32>,
    %c0_27 = arith.constant 0 : index
    %c2 = arith.constant 2 : index
    %c0_28 = arith.constant 0 : index
    %25 = vector.load %arg8[%c0_27, %c2, %c0_28] : memref<18x18x4xf32, #tpu.memory_space<vmem>>, vector<16x16x4xf32>
    %26 = vector.shape_cast %25 : vector<16x16x4xf32> to vector<256x4xf32>
    %c0_29 = arith.constant 0 : index
    %c8 = arith.constant 8 : index
    %27 = vector.load %arg9[%c0_29, %c8] : memref<256x36xf32, #tpu.memory_space<vmem>>, vector<256x4xf32>
    tpu.vector_store %arg9[%c0_29, %c8], %26 {strides = array<i32>} : memref<256x36xf32, #tpu.memory_space<vmem>>, vector<256x4xf32>,
    %c1_30 = arith.constant 1 : index
    %c0_31 = arith.constant 0 : index
    %c0_32 = arith.constant 0 : index
    %28 = vector.load %arg8[%c1_30, %c0_31, %c0_32] : memref<18x18x4xf32, #tpu.memory_space<vmem>>, vector<16x16x4xf32>
    %29 = vector.shape_cast %28 : vector<16x16x4xf32> to vector<256x4xf32>
    %c0_33 = arith.constant 0 : index
    %c12 = arith.constant 12 : index
    %30 = vector.load %arg9[%c0_33, %c12] : memref<256x36xf32, #tpu.memory_space<vmem>>, vector<256x4xf32>
    tpu.vector_store %arg9[%c0_33, %c12], %29 {strides = array<i32>} : memref<256x36xf32, #tpu.memory_space<vmem>>, vector<256x4xf32>,
    %c1_34 = arith.constant 1 : index
    %c1_35 = arith.constant 1 : index
    %c0_36 = arith.constant 0 : index
    %31 = vector.load %arg8[%c1_34, %c1_35, %c0_36] : memref<18x18x4xf32, #tpu.memory_space<vmem>>, vector<16x16x4xf32>
    %32 = vector.shape_cast %31 : vector<16x16x4xf32> to vector<256x4xf32>
    %c0_37 = arith.constant 0 : index
    %c16 = arith.constant 16 : index
    %33 = vector.load %arg9[%c0_37, %c16] : memref<256x36xf32, #tpu.memory_space<vmem>>, vector<256x4xf32>
    tpu.vector_store %arg9[%c0_37, %c16], %32 {strides = array<i32>} : memref<256x36xf32, #tpu.memory_space<vmem>>, vector<256x4xf32>,
    %c1_38 = arith.constant 1 : index
    %c2_39 = arith.constant 2 : index
    %c0_40 = arith.constant 0 : index
    %34 = vector.load %arg8[%c1_38, %c2_39, %c0_40] : memref<18x18x4xf32, #tpu.memory_space<vmem>>, vector<16x16x4xf32>
    %35 = vector.shape_cast %34 : vector<16x16x4xf32> to vector<256x4xf32>
    %c0_41 = arith.constant 0 : index
    %c20 = arith.constant 20 : index
    %36 = vector.load %arg9[%c0_41, %c20] : memref<256x36xf32, #tpu.memory_space<vmem>>, vector<256x4xf32>
    tpu.vector_store %arg9[%c0_41, %c20], %35 {strides = array<i32>} : memref<256x36xf32, #tpu.memory_space<vmem>>, vector<256x4xf32>,
    %c2_42 = arith.constant 2 : index
    %c0_43 = arith.constant 0 : index
    %c0_44 = arith.constant 0 : index
    %37 = vector.load %arg8[%c2_42, %c0_43, %c0_44] : memref<18x18x4xf32, #tpu.memory_space<vmem>>, vector<16x16x4xf32>
    %38 = vector.shape_cast %37 : vector<16x16x4xf32> to vector<256x4xf32>
    %c0_45 = arith.constant 0 : index
    %c24 = arith.constant 24 : index
    %39 = vector.load %arg9[%c0_45, %c24] : memref<256x36xf32, #tpu.memory_space<vmem>>, vector<256x4xf32>
    tpu.vector_store %arg9[%c0_45, %c24], %38 {strides = array<i32>} : memref<256x36xf32, #tpu.memory_space<vmem>>, vector<256x4xf32>,
    %c2_46 = arith.constant 2 : index
    %c1_47 = arith.constant 1 : index
    %c0_48 = arith.constant 0 : index
    %40 = vector.load %arg8[%c2_46, %c1_47, %c0_48] : memref<18x18x4xf32, #tpu.memory_space<vmem>>, vector<16x16x4xf32>
    %41 = vector.shape_cast %40 : vector<16x16x4xf32> to vector<256x4xf32>
    %c0_49 = arith.constant 0 : index
    %c28 = arith.constant 28 : index
    %42 = vector.load %arg9[%c0_49, %c28] : memref<256x36xf32, #tpu.memory_space<vmem>>, vector<256x4xf32>
    tpu.vector_store %arg9[%c0_49, %c28], %41 {strides = array<i32>} : memref<256x36xf32, #tpu.memory_space<vmem>>, vector<256x4xf32>,
    %c2_50 = arith.constant 2 : index
    %c2_51 = arith.constant 2 : index
    %c0_52 = arith.constant 0 : index
    %43 = vector.load %arg8[%c2_50, %c2_51, %c0_52] : memref<18x18x4xf32, #tpu.memory_space<vmem>>, vector<16x16x4xf32>
    %44 = vector.shape_cast %43 : vector<16x16x4xf32> to vector<256x4xf32>
    %c0_53 = arith.constant 0 : index
    %c32 = arith.constant 32 : index
    %45 = vector.load %arg9[%c0_53, %c32] : memref<256x36xf32, #tpu.memory_space<vmem>>, vector<256x4xf32>
    tpu.vector_store %arg9[%c0_53, %c32], %44 {strides = array<i32>} : memref<256x36xf32, #tpu.memory_space<vmem>>, vector<256x4xf32>,
    %c0_54 = arith.constant 0 : index
    %c0_55 = arith.constant 0 : index
    %46 = vector.load %arg9[%c0_54, %c0_55] : memref<256x36xf32, #tpu.memory_space<vmem>>, vector<256x36xf32>
    %c0_56 = arith.constant 0 : index
    %c0_57 = arith.constant 0 : index
    %47 = vector.load %arg5[%c0_56, %c0_57] : memref<36x128xf32, #tpu.memory_space<vmem>>, vector<36x128xf32>
    %cst_58 = arith.constant dense<0.000000e+00> : vector<256x128xf32>
    %48 = tpu.matmul %46, %47, %cst_58 {dimension_numbers = #tpu.dot_dimension_numbers<[1], [0], [0], [1], [0, 0, 1, 1], [], []>} : vector<256x36xf32>, vector<36x128xf32>, vector<256x128xf32> -> vector<256x128xf32>
    %c0_59 = arith.constant 0 : index
    %c0_60 = arith.constant 0 : index
    %49 = vector.load %arg6[%c0_59, %c0_60] : memref<1x128xf32, #tpu.memory_space<vmem>>, vector<1x128xf32>
    %50 = vector.broadcast %49 : vector<1x128xf32> to vector<256x128xf32>
    %51 = arith.addf %48, %50 : vector<256x128xf32>
    %cst_61 = arith.constant 0.000000e+00 : f32
    %52 = vector.broadcast %cst_61 : f32 to vector<256x128xf32>
    %53 = arith.maximumf %51, %52 : vector<256x128xf32>
    %54 = vector.shape_cast %53 : vector<256x128xf32> to vector<1x16x16x128xf32>
    %c0_62 = arith.constant 0 : index
    %c0_63 = arith.constant 0 : index
    %c0_64 = arith.constant 0 : index
    %c0_65 = arith.constant 0 : index
    %55 = vector.load %arg7[%c0_62, %c0_63, %c0_64, %c0_65] : memref<1x16x16x128xf32, #tpu.memory_space<vmem>>, vector<1x16x16x128xf32>
    tpu.vector_store %arg7[%c0_62, %c0_63, %c0_64, %c0_65], %54 {strides = array<i32>} : memref<1x16x16x128xf32, #tpu.memory_space<vmem>>, vector<1x16x16x128xf32>,
    return
  }
  func.func @transform_0(%arg0: i32, %arg1: i32) -> (i32, i32, i32, i32) {
    %c0_i32 = arith.constant 0 : i32
    %c0_i32_0 = arith.constant 0 : i32
    %c0_i32_1 = arith.constant 0 : i32
    return %arg0, %arg1, %c0_i32, %c0_i32_0 : i32, i32, i32, i32
  }
  func.func @transform_1(%arg0: i32, %arg1: i32) -> (i32, i32, i32, i32) {
    %c16_i32 = arith.constant 16 : i32
    %0 = arith.muli %arg1, %c16_i32 : i32
    %c1_i32 = arith.constant 1 : i32
    %1 = arith.subi %0, %c1_i32 : i32
    %c0_i32 = arith.constant 0 : i32
    %2 = arith.maxsi %1, %c0_i32 : i32
    %c0_i32_0 = arith.constant 0 : i32
    %c0_i32_1 = arith.constant 0 : i32
    %c0_i32_2 = arith.constant 0 : i32
    return %arg0, %2, %c0_i32_0, %c0_i32_1 : i32, i32, i32, i32
  }
  func.func @transform_2(%arg0: i32, %arg1: i32) -> (i32, i32, i32, i32) {
    %c16_i32 = arith.constant 16 : i32
    %0 = arith.muli %arg1, %c16_i32 : i32
    %c16_i32_0 = arith.constant 16 : i32
    %1 = arith.addi %0, %c16_i32_0 : i32
    %c15_i32 = arith.constant 15 : i32
    %2 = arith.minsi %1, %c15_i32 : i32
    %c0_i32 = arith.constant 0 : i32
    %c0_i32_1 = arith.constant 0 : i32
    %c0_i32_2 = arith.constant 0 : i32
    return %arg0, %2, %c0_i32, %c0_i32_1 : i32, i32, i32, i32
  }
  func.func @transform_3(%arg0: i32, %arg1: i32) -> (i32, i32) {
    %c0_i32 = arith.constant 0 : i32
    %c0_i32_0 = arith.constant 0 : i32
    %c0_i32_1 = arith.constant 0 : i32
    return %c0_i32, %c0_i32_0 : i32, i32
  }
  func.func @transform_4(%arg0: i32, %arg1: i32) -> (i32, i32) {
    %c0_i32 = arith.constant 0 : i32
    %c0_i32_0 = arith.constant 0 : i32
    %c0_i32_1 = arith.constant 0 : i32
    return %c0_i32, %c0_i32_0 : i32, i32
  }
  func.func @transform_5(%arg0: i32, %arg1: i32) -> (i32, i32, i32, i32) {
    %c0_i32 = arith.constant 0 : i32
    %c0_i32_0 = arith.constant 0 : i32
    %c0_i32_1 = arith.constant 0 : i32
    return %arg0, %arg1, %c0_i32, %c0_i32_0 : i32, i32, i32, i32
  }
}

module attributes {stable_mosaic.version = 11 : i64} {
  func.func @_conv3x3_bn_relu_kernel(%arg0: i32, %arg1: i32, %arg2: memref<1x16x16x128xf32, #tpu.memory_space<vmem>>, %arg3: memref<1x1x16x128xf32, #tpu.memory_space<vmem>>, %arg4: memref<1x1x16x128xf32, #tpu.memory_space<vmem>>, %arg5: memref<1152x128xf32, #tpu.memory_space<vmem>>, %arg6: memref<1x128xf32, #tpu.memory_space<vmem>>, %arg7: memref<1x16x16x128xf32, #tpu.memory_space<vmem>>, %arg8: memref<18x18x128xf32, #tpu.memory_space<vmem>>, %arg9: memref<256x1152xf32, #tpu.memory_space<vmem>>) attributes {dimension_semantics = [#tpu.dimension_semantics<parallel>, #tpu.dimension_semantics<parallel>], iteration_bounds = array<i64: 2, 1>, scalar_prefetch = 0 : i64, scratch_operands = 2 : i64, tpu.core_type = #tpu.core_type<tc>, window_params = [{transform_indices = @transform_0, window_bounds = array<i64: 1, 16, 16, 128>}, {transform_indices = @transform_1, window_bounds = array<i64: 1, 1, 16, 128>}, {transform_indices = @transform_2, window_bounds = array<i64: 1, 1, 16, 128>}, {pipeline_mode = #tpu.pipeline_mode<synchronous>, transform_indices = @transform_3, window_bounds = array<i64: 1152, 128>}, {pipeline_mode = #tpu.pipeline_mode<synchronous>, transform_indices = @transform_4, window_bounds = array<i64: 1, 128>}, {transform_indices = @transform_5, window_bounds = array<i64: 1, 16, 16, 128>}]} {
    %c0 = arith.constant 0 : index
    %c0_0 = arith.constant 0 : index
    %c0_1 = arith.constant 0 : index
    %c0_2 = arith.constant 0 : index
    %0 = vector.load %arg2[%c0, %c0_0, %c0_1, %c0_2] : memref<1x16x16x128xf32, #tpu.memory_space<vmem>>, vector<1x16x16x128xf32>
    %1 = vector.shape_cast %0 : vector<1x16x16x128xf32> to vector<16x16x128xf32>
    %c1 = arith.constant 1 : index
    %c1_3 = arith.constant 1 : index
    %c0_4 = arith.constant 0 : index
    %2 = vector.load %arg8[%c1, %c1_3, %c0_4] : memref<18x18x128xf32, #tpu.memory_space<vmem>>, vector<16x16x128xf32>
    tpu.vector_store %arg8[%c1, %c1_3, %c0_4], %1 {strides = array<i32>} : memref<18x18x128xf32, #tpu.memory_space<vmem>>, vector<16x16x128xf32>,
    %cst = arith.constant 0.000000e+00 : f32
    %3 = vector.broadcast %cst : f32 to vector<18x1x128xf32>
    %c0_5 = arith.constant 0 : index
    %c0_6 = arith.constant 0 : index
    %c0_7 = arith.constant 0 : index
    %4 = vector.load %arg8[%c0_5, %c0_6, %c0_7] : memref<18x18x128xf32, #tpu.memory_space<vmem>>, vector<18x1x128xf32>
    tpu.vector_store %arg8[%c0_5, %c0_6, %c0_7], %3 {strides = array<i32>} : memref<18x18x128xf32, #tpu.memory_space<vmem>>, vector<18x1x128xf32>,
    %c0_8 = arith.constant 0 : index
    %c17 = arith.constant 17 : index
    %c0_9 = arith.constant 0 : index
    %5 = vector.load %arg8[%c0_8, %c17, %c0_9] : memref<18x18x128xf32, #tpu.memory_space<vmem>>, vector<18x1x128xf32>
    tpu.vector_store %arg8[%c0_8, %c17, %c0_9], %3 {strides = array<i32>} : memref<18x18x128xf32, #tpu.memory_space<vmem>>, vector<18x1x128xf32>,
    %cst_10 = arith.constant 0.000000e+00 : f32
    %6 = vector.broadcast %cst_10 : f32 to vector<1x16x128xf32>
    %c0_i32 = arith.constant 0 : i32
    %7 = arith.cmpi eq, %arg1, %c0_i32 : i32
    %8 = arith.extui %7 : i1 to i32
    %c0_i32_11 = arith.constant 0 : i32
    %9 = arith.cmpi ne, %8, %c0_i32_11 : i32
    scf.if %9 {
      %c0_66 = arith.constant 0 : index
      %c1_67 = arith.constant 1 : index
      %c0_68 = arith.constant 0 : index
      %56 = vector.load %arg8[%c0_66, %c1_67, %c0_68] : memref<18x18x128xf32, #tpu.memory_space<vmem>>, vector<1x16x128xf32>
      tpu.vector_store %arg8[%c0_66, %c1_67, %c0_68], %6 {strides = array<i32>} : memref<18x18x128xf32, #tpu.memory_space<vmem>>, vector<1x16x128xf32>,
    } else {
    }
    %c0_i32_12 = arith.constant 0 : i32
    %10 = arith.cmpi sgt, %arg1, %c0_i32_12 : i32
    %11 = arith.extui %10 : i1 to i32
    %c0_i32_13 = arith.constant 0 : i32
    %12 = arith.cmpi ne, %11, %c0_i32_13 : i32
    scf.if %12 {
      %c0_66 = arith.constant 0 : index
      %c0_67 = arith.constant 0 : index
      %c0_68 = arith.constant 0 : index
      %c0_69 = arith.constant 0 : index
      %56 = vector.load %arg3[%c0_66, %c0_67, %c0_68, %c0_69] : memref<1x1x16x128xf32, #tpu.memory_space<vmem>>, vector<1x1x16x128xf32>
      %57 = vector.shape_cast %56 : vector<1x1x16x128xf32> to vector<1x16x128xf32>
      %c0_70 = arith.constant 0 : index
      %c1_71 = arith.constant 1 : index
      %c0_72 = arith.constant 0 : index
      %58 = vector.load %arg8[%c0_70, %c1_71, %c0_72] : memref<18x18x128xf32, #tpu.memory_space<vmem>>, vector<1x16x128xf32>
      tpu.vector_store %arg8[%c0_70, %c1_71, %c0_72], %57 {strides = array<i32>} : memref<18x18x128xf32, #tpu.memory_space<vmem>>, vector<1x16x128xf32>,
    } else {
    }
    %c0_i32_14 = arith.constant 0 : i32
    %13 = arith.cmpi eq, %arg1, %c0_i32_14 : i32
    %14 = arith.extui %13 : i1 to i32
    %c0_i32_15 = arith.constant 0 : i32
    %15 = arith.cmpi ne, %14, %c0_i32_15 : i32
    scf.if %15 {
      %c17_66 = arith.constant 17 : index
      %c1_67 = arith.constant 1 : index
      %c0_68 = arith.constant 0 : index
      %56 = vector.load %arg8[%c17_66, %c1_67, %c0_68] : memref<18x18x128xf32, #tpu.memory_space<vmem>>, vector<1x16x128xf32>
      tpu.vector_store %arg8[%c17_66, %c1_67, %c0_68], %6 {strides = array<i32>} : memref<18x18x128xf32, #tpu.memory_space<vmem>>, vector<1x16x128xf32>,
    } else {
    }
    %c0_i32_16 = arith.constant 0 : i32
    %16 = arith.cmpi slt, %arg1, %c0_i32_16 : i32
    %17 = arith.extui %16 : i1 to i32
    %c0_i32_17 = arith.constant 0 : i32
    %18 = arith.cmpi ne, %17, %c0_i32_17 : i32
    scf.if %18 {
      %c0_66 = arith.constant 0 : index
      %c0_67 = arith.constant 0 : index
      %c0_68 = arith.constant 0 : index
      %c0_69 = arith.constant 0 : index
      %56 = vector.load %arg4[%c0_66, %c0_67, %c0_68, %c0_69] : memref<1x1x16x128xf32, #tpu.memory_space<vmem>>, vector<1x1x16x128xf32>
      %57 = vector.shape_cast %56 : vector<1x1x16x128xf32> to vector<1x16x128xf32>
      %c17_70 = arith.constant 17 : index
      %c1_71 = arith.constant 1 : index
      %c0_72 = arith.constant 0 : index
      %58 = vector.load %arg8[%c17_70, %c1_71, %c0_72] : memref<18x18x128xf32, #tpu.memory_space<vmem>>, vector<1x16x128xf32>
      tpu.vector_store %arg8[%c17_70, %c1_71, %c0_72], %57 {strides = array<i32>} : memref<18x18x128xf32, #tpu.memory_space<vmem>>, vector<1x16x128xf32>,
    } else {
    }
    %c0_18 = arith.constant 0 : index
    %c0_19 = arith.constant 0 : index
    %c0_20 = arith.constant 0 : index
    %19 = vector.load %arg8[%c0_18, %c0_19, %c0_20] : memref<18x18x128xf32, #tpu.memory_space<vmem>>, vector<16x16x128xf32>
    %20 = vector.shape_cast %19 : vector<16x16x128xf32> to vector<256x128xf32>
    %c0_21 = arith.constant 0 : index
    %c0_22 = arith.constant 0 : index
    %21 = vector.load %arg9[%c0_21, %c0_22] : memref<256x1152xf32, #tpu.memory_space<vmem>>, vector<256x128xf32>
    tpu.vector_store %arg9[%c0_21, %c0_22], %20 {strides = array<i32>} : memref<256x1152xf32, #tpu.memory_space<vmem>>, vector<256x128xf32>,
    %c0_23 = arith.constant 0 : index
    %c1_24 = arith.constant 1 : index
    %c0_25 = arith.constant 0 : index
    %22 = vector.load %arg8[%c0_23, %c1_24, %c0_25] : memref<18x18x128xf32, #tpu.memory_space<vmem>>, vector<16x16x128xf32>
    %23 = vector.shape_cast %22 : vector<16x16x128xf32> to vector<256x128xf32>
    %c0_26 = arith.constant 0 : index
    %c128 = arith.constant 128 : index
    %24 = vector.load %arg9[%c0_26, %c128] : memref<256x1152xf32, #tpu.memory_space<vmem>>, vector<256x128xf32>
    tpu.vector_store %arg9[%c0_26, %c128], %23 {strides = array<i32>} : memref<256x1152xf32, #tpu.memory_space<vmem>>, vector<256x128xf32>,
    %c0_27 = arith.constant 0 : index
    %c2 = arith.constant 2 : index
    %c0_28 = arith.constant 0 : index
    %25 = vector.load %arg8[%c0_27, %c2, %c0_28] : memref<18x18x128xf32, #tpu.memory_space<vmem>>, vector<16x16x128xf32>
    %26 = vector.shape_cast %25 : vector<16x16x128xf32> to vector<256x128xf32>
    %c0_29 = arith.constant 0 : index
    %c256 = arith.constant 256 : index
    %27 = vector.load %arg9[%c0_29, %c256] : memref<256x1152xf32, #tpu.memory_space<vmem>>, vector<256x128xf32>
    tpu.vector_store %arg9[%c0_29, %c256], %26 {strides = array<i32>} : memref<256x1152xf32, #tpu.memory_space<vmem>>, vector<256x128xf32>,
    %c1_30 = arith.constant 1 : index
    %c0_31 = arith.constant 0 : index
    %c0_32 = arith.constant 0 : index
    %28 = vector.load %arg8[%c1_30, %c0_31, %c0_32] : memref<18x18x128xf32, #tpu.memory_space<vmem>>, vector<16x16x128xf32>
    %29 = vector.shape_cast %28 : vector<16x16x128xf32> to vector<256x128xf32>
    %c0_33 = arith.constant 0 : index
    %c384 = arith.constant 384 : index
    %30 = vector.load %arg9[%c0_33, %c384] : memref<256x1152xf32, #tpu.memory_space<vmem>>, vector<256x128xf32>
    tpu.vector_store %arg9[%c0_33, %c384], %29 {strides = array<i32>} : memref<256x1152xf32, #tpu.memory_space<vmem>>, vector<256x128xf32>,
    %c1_34 = arith.constant 1 : index
    %c1_35 = arith.constant 1 : index
    %c0_36 = arith.constant 0 : index
    %31 = vector.load %arg8[%c1_34, %c1_35, %c0_36] : memref<18x18x128xf32, #tpu.memory_space<vmem>>, vector<16x16x128xf32>
    %32 = vector.shape_cast %31 : vector<16x16x128xf32> to vector<256x128xf32>
    %c0_37 = arith.constant 0 : index
    %c512 = arith.constant 512 : index
    %33 = vector.load %arg9[%c0_37, %c512] : memref<256x1152xf32, #tpu.memory_space<vmem>>, vector<256x128xf32>
    tpu.vector_store %arg9[%c0_37, %c512], %32 {strides = array<i32>} : memref<256x1152xf32, #tpu.memory_space<vmem>>, vector<256x128xf32>,
    %c1_38 = arith.constant 1 : index
    %c2_39 = arith.constant 2 : index
    %c0_40 = arith.constant 0 : index
    %34 = vector.load %arg8[%c1_38, %c2_39, %c0_40] : memref<18x18x128xf32, #tpu.memory_space<vmem>>, vector<16x16x128xf32>
    %35 = vector.shape_cast %34 : vector<16x16x128xf32> to vector<256x128xf32>
    %c0_41 = arith.constant 0 : index
    %c640 = arith.constant 640 : index
    %36 = vector.load %arg9[%c0_41, %c640] : memref<256x1152xf32, #tpu.memory_space<vmem>>, vector<256x128xf32>
    tpu.vector_store %arg9[%c0_41, %c640], %35 {strides = array<i32>} : memref<256x1152xf32, #tpu.memory_space<vmem>>, vector<256x128xf32>,
    %c2_42 = arith.constant 2 : index
    %c0_43 = arith.constant 0 : index
    %c0_44 = arith.constant 0 : index
    %37 = vector.load %arg8[%c2_42, %c0_43, %c0_44] : memref<18x18x128xf32, #tpu.memory_space<vmem>>, vector<16x16x128xf32>
    %38 = vector.shape_cast %37 : vector<16x16x128xf32> to vector<256x128xf32>
    %c0_45 = arith.constant 0 : index
    %c768 = arith.constant 768 : index
    %39 = vector.load %arg9[%c0_45, %c768] : memref<256x1152xf32, #tpu.memory_space<vmem>>, vector<256x128xf32>
    tpu.vector_store %arg9[%c0_45, %c768], %38 {strides = array<i32>} : memref<256x1152xf32, #tpu.memory_space<vmem>>, vector<256x128xf32>,
    %c2_46 = arith.constant 2 : index
    %c1_47 = arith.constant 1 : index
    %c0_48 = arith.constant 0 : index
    %40 = vector.load %arg8[%c2_46, %c1_47, %c0_48] : memref<18x18x128xf32, #tpu.memory_space<vmem>>, vector<16x16x128xf32>
    %41 = vector.shape_cast %40 : vector<16x16x128xf32> to vector<256x128xf32>
    %c0_49 = arith.constant 0 : index
    %c896 = arith.constant 896 : index
    %42 = vector.load %arg9[%c0_49, %c896] : memref<256x1152xf32, #tpu.memory_space<vmem>>, vector<256x128xf32>
    tpu.vector_store %arg9[%c0_49, %c896], %41 {strides = array<i32>} : memref<256x1152xf32, #tpu.memory_space<vmem>>, vector<256x128xf32>,
    %c2_50 = arith.constant 2 : index
    %c2_51 = arith.constant 2 : index
    %c0_52 = arith.constant 0 : index
    %43 = vector.load %arg8[%c2_50, %c2_51, %c0_52] : memref<18x18x128xf32, #tpu.memory_space<vmem>>, vector<16x16x128xf32>
    %44 = vector.shape_cast %43 : vector<16x16x128xf32> to vector<256x128xf32>
    %c0_53 = arith.constant 0 : index
    %c1024 = arith.constant 1024 : index
    %45 = vector.load %arg9[%c0_53, %c1024] : memref<256x1152xf32, #tpu.memory_space<vmem>>, vector<256x128xf32>
    tpu.vector_store %arg9[%c0_53, %c1024], %44 {strides = array<i32>} : memref<256x1152xf32, #tpu.memory_space<vmem>>, vector<256x128xf32>,
    %c0_54 = arith.constant 0 : index
    %c0_55 = arith.constant 0 : index
    %46 = vector.load %arg9[%c0_54, %c0_55] : memref<256x1152xf32, #tpu.memory_space<vmem>>, vector<256x1152xf32>
    %c0_56 = arith.constant 0 : index
    %c0_57 = arith.constant 0 : index
    %47 = vector.load %arg5[%c0_56, %c0_57] : memref<1152x128xf32, #tpu.memory_space<vmem>>, vector<1152x128xf32>
    %cst_58 = arith.constant dense<0.000000e+00> : vector<256x128xf32>
    %48 = tpu.matmul %46, %47, %cst_58 {dimension_numbers = #tpu.dot_dimension_numbers<[1], [0], [0], [1], [0, 0, 1, 1], [], []>} : vector<256x1152xf32>, vector<1152x128xf32>, vector<256x128xf32> -> vector<256x128xf32>
    %c0_59 = arith.constant 0 : index
    %c0_60 = arith.constant 0 : index
    %49 = vector.load %arg6[%c0_59, %c0_60] : memref<1x128xf32, #tpu.memory_space<vmem>>, vector<1x128xf32>
    %50 = vector.broadcast %49 : vector<1x128xf32> to vector<256x128xf32>
    %51 = arith.addf %48, %50 : vector<256x128xf32>
    %cst_61 = arith.constant 0.000000e+00 : f32
    %52 = vector.broadcast %cst_61 : f32 to vector<256x128xf32>
    %53 = arith.maximumf %51, %52 : vector<256x128xf32>
    %54 = vector.shape_cast %53 : vector<256x128xf32> to vector<1x16x16x128xf32>
    %c0_62 = arith.constant 0 : index
    %c0_63 = arith.constant 0 : index
    %c0_64 = arith.constant 0 : index
    %c0_65 = arith.constant 0 : index
    %55 = vector.load %arg7[%c0_62, %c0_63, %c0_64, %c0_65] : memref<1x16x16x128xf32, #tpu.memory_space<vmem>>, vector<1x16x16x128xf32>
    tpu.vector_store %arg7[%c0_62, %c0_63, %c0_64, %c0_65], %54 {strides = array<i32>} : memref<1x16x16x128xf32, #tpu.memory_space<vmem>>, vector<1x16x16x128xf32>,
    return
  }
  func.func @transform_0(%arg0: i32, %arg1: i32) -> (i32, i32, i32, i32) {
    %c0_i32 = arith.constant 0 : i32
    %c0_i32_0 = arith.constant 0 : i32
    %c0_i32_1 = arith.constant 0 : i32
    return %arg0, %arg1, %c0_i32, %c0_i32_0 : i32, i32, i32, i32
  }
  func.func @transform_1(%arg0: i32, %arg1: i32) -> (i32, i32, i32, i32) {
    %c16_i32 = arith.constant 16 : i32
    %0 = arith.muli %arg1, %c16_i32 : i32
    %c1_i32 = arith.constant 1 : i32
    %1 = arith.subi %0, %c1_i32 : i32
    %c0_i32 = arith.constant 0 : i32
    %2 = arith.maxsi %1, %c0_i32 : i32
    %c0_i32_0 = arith.constant 0 : i32
    %c0_i32_1 = arith.constant 0 : i32
    %c0_i32_2 = arith.constant 0 : i32
    return %arg0, %2, %c0_i32_0, %c0_i32_1 : i32, i32, i32, i32
  }
  func.func @transform_2(%arg0: i32, %arg1: i32) -> (i32, i32, i32, i32) {
    %c16_i32 = arith.constant 16 : i32
    %0 = arith.muli %arg1, %c16_i32 : i32
    %c16_i32_0 = arith.constant 16 : i32
    %1 = arith.addi %0, %c16_i32_0 : i32
    %c15_i32 = arith.constant 15 : i32
    %2 = arith.minsi %1, %c15_i32 : i32
    %c0_i32 = arith.constant 0 : i32
    %c0_i32_1 = arith.constant 0 : i32
    %c0_i32_2 = arith.constant 0 : i32
    return %arg0, %2, %c0_i32, %c0_i32_1 : i32, i32, i32, i32
  }
  func.func @transform_3(%arg0: i32, %arg1: i32) -> (i32, i32) {
    %c0_i32 = arith.constant 0 : i32
    %c0_i32_0 = arith.constant 0 : i32
    %c0_i32_1 = arith.constant 0 : i32
    return %c0_i32, %c0_i32_0 : i32, i32
  }
  func.func @transform_4(%arg0: i32, %arg1: i32) -> (i32, i32) {
    %c0_i32 = arith.constant 0 : i32
    %c0_i32_0 = arith.constant 0 : i32
    %c0_i32_1 = arith.constant 0 : i32
    return %c0_i32, %c0_i32_0 : i32, i32
  }
  func.func @transform_5(%arg0: i32, %arg1: i32) -> (i32, i32, i32, i32) {
    %c0_i32 = arith.constant 0 : i32
    %c0_i32_0 = arith.constant 0 : i32
    %c0_i32_1 = arith.constant 0 : i32
    return %arg0, %arg1, %c0_i32, %c0_i32_0 : i32, i32, i32, i32
  }
}

</mosaic_0001>

<bundles_post_ra>
// kernel: conv_block_forward.2
= control target key start
LH: loop header
LB: loop body
LE: loop exit
PB: predicated region body
PF: predicated region fallthrough
CT: control target
= control target key end

     0   :  { %s2961_s18 = smov 0   ;;  %s2963_s19 = smov 0   ;;  %s4041_s0 = inlined_call_operand.vmem [shape: f32[2,16,16,4], index: 0, kind: input, shape index: {}, may-alias: {0,1,2}]   ;;  %s4042_s1 = inlined_call_operand.vmem [shape: f32[2,16,16,4], index: 1, kind: input, shape index: {}, may-alias: {0,1,2}]   ;;  %s4043_s2 = inlined_call_operand.vmem [shape: f32[2,16,16,4], index: 2, kind: input, shape index: {}, may-alias: {0,1,2}]   ;;  %s4044_s3 = inlined_call_operand.vmem [shape: f32[36,128], index: 3, kind: input, shape index: {}]   ;;  %s4045_s4 = inlined_call_operand.vmem [shape: f32[1,128], index: 4, kind: input, shape index: {}]   ;;  %s4046_s5 = inlined_call_operand.vmem [shape: f32[2,16,16,128], index: 5, kind: output, shape index: {}]  }
   0x1   :  { %s2965_s20 = smov 0  }
   0x2 LB: > { %s27_s1 = sadd.s32 1, %s2916_s19  ;;  %p2710_p0 = scmp.ge.s32.totalorder %s2920_s20, 1  ;;  %s2920_s20 = sphi %s2965_s20, %s15_s20   ;;  %s2916_s19 = sphi %s2963_s19, %s4064_s19   ;;  %s2912_s18 = sphi %s2961_s18, %s4063_s18  }
   0x3   : > { %p29_p1 = scmp.ge.s32.totalorder %s27_s1, 2  ;;  %p273_p2 = scmp.lt.s32.totalorder %s2920_s20, 3 }
   0x5   : > { %s4066_s1 = smov (%p29_p1, %s27_s1), 0  ;;  %p274_p3 = pnand %p2710_p0, %p273_p2 }
   0x7   : > { %277 = sbr.rel (%p274_p3) target bundleno = 872 (0x368), region = 40 }
   0xc   : > { %vm426_vm0 = vcmask 31744   ;;  %p338_p4 = scmp.lt.s32.totalorder %s2912_s18, 1  ;;  %vm459_vm1 = vcmask 24576   ;;  %v2922_v0 = vmov 0.0   ;;  %s2923_s24 = smov 4   ;;  %vm749_vm2 = vcmask 64544  }
   0xd   : > { %500 = vst.msk [vmem:[#allocation2 + $0x1] sm:$0xff] %vm426_vm0, %v2922_v0  ;;  %501 = vst.msk [vmem:[#allocation2 + $0x9] sm:$0xff] %vm426_vm0, %v2922_v0  ;;  %s2924_s25 = smov 8   ;;  %s2925_s26 = smov 12   ;;  %vm942_vm3 = vcmask 97344   ;;  %vm1135_vm4 = vcmask 130144  }
   0xe   : > { %514 = vst.msk [vmem:[#allocation2 + $0x199] sm:$0xff] %vm426_vm0, %v2922_v0  ;;  %515 = vst.msk [vmem:[#allocation2 + $0x1a1] sm:$0xff] %vm426_vm0, %v2922_v0  ;;  %s4068_s18 = smov (!%p338_p4, %s2912_s18), 1  ;;  %s2926_s27 = smov 16   ;;  %vm2275_vm5 = vcmask 1043456   ;;  %vm1328_vm6 = vcmask 162944  }
   0xf   : > { %478 = vst.msk [vmem:[#allocation2 + $0x11] sm:$0x1] %vm459_vm1, %v2922_v0  ;;  %460 = vst.msk [vmem:[#allocation2] sm:$0x1] %vm459_vm1, %v2922_v0  ;;  %s2755_s2 = sshll.u32 %s4068_s18, 8  ;;  %s2927_s28 = smov 20  }
  0x10   : > { %461 = vst.msk [vmem:[#allocation2 + $0x18] sm:$0x1] %vm459_vm1, %v2922_v0  ;;  %462 = vst.msk [vmem:[#allocation2 + $0x30] sm:$0x1] %vm459_vm1, %v2922_v0  ;;  %s3033_s23 = scalar_lea.vmem %s4041_s0, %s2755_s2  ;;  %s2928_s29 = smov 24   ;;  %vm1521_vm7 = vcmask 195744  }
  0x11   : > { %463 = vst.msk [vmem:[#allocation2 + $0x48] sm:$0x1] %vm459_vm1, %v2922_v0  ;;  %464 = vst.msk [vmem:[#allocation2 + $0x60] sm:$0x1] %vm459_vm1, %v2922_v0  ;;  %v393_v1 = vld [vmem:[%s3033_s23] sm:$0xff]  ;;  %v394_v2 = vld [vmem:[%s3033_s23 + $0x8] sm:$0xff] }
  0x12   : > { %465 = vst.msk [vmem:[#allocation2 + $0x78] sm:$0x1] %vm459_vm1, %v2922_v0  ;;  %466 = vst.msk [vmem:[#allocation2 + $0x90] sm:$0x1] %vm459_vm1, %v2922_v0  ;;  %v395_v3 = vld [vmem:[%s3033_s23 + $0x10] sm:$0xff]  ;;  %v396_v4 = vld [vmem:[%s3033_s23 + $0x18] sm:$0xff] }
  0x13   : > { %467 = vst.msk [vmem:[#allocation2 + $0xa8] sm:$0x1] %vm459_vm1, %v2922_v0  ;;  %468 = vst.msk [vmem:[#allocation2 + $0xc0] sm:$0x1] %vm459_vm1, %v2922_v0  ;;  %v397_v5 = vld [vmem:[%s3033_s23 + $0x20] sm:$0xff]  ;;  %v398_v6 = vld [vmem:[%s3033_s23 + $0x28] sm:$0xff] }
  0x14   : > { %469 = vst.msk [vmem:[#allocation2 + $0xd8] sm:$0x1] %vm459_vm1, %v2922_v0  ;;  %470 = vst.msk [vmem:[#allocation2 + $0xf0] sm:$0x1] %vm459_vm1, %v2922_v0  ;;  %v589_v7 = vld [vmem:[#allocation2 + $0x1] sm:$0xff]  ;;  %v590_v8 = vld [vmem:[#allocation2 + $0x9] sm:$0xff] }
  0x15   : > { %471 = vst.msk [vmem:[#allocation2 + $0x108] sm:$0x1] %vm459_vm1, %v2922_v0  ;;  %472 = vst.msk [vmem:[#allocation2 + $0x120] sm:$0x1] %vm459_vm1, %v2922_v0  ;;  %v399_v9 = vld [vmem:[%s3033_s23 + $0x30] sm:$0xff]  ;;  %653 = vrot.lane.b32.xlu0 %v589_v7, %s2923_s24  ;;  %v400_v10 = vld [vmem:[%s3033_s23 + $0x38] sm:$0xff] }
  0x16   : > { %473 = vst.msk [vmem:[#allocation2 + $0x138] sm:$0x1] %vm459_vm1, %v2922_v0  ;;  %474 = vst.msk [vmem:[#allocation2 + $0x150] sm:$0x1] %vm459_vm1, %v2922_v0  ;;  %v401_v11 = vld [vmem:[%s3033_s23 + $0x40] sm:$0xff]  ;;  %v402_v12 = vld [vmem:[%s3033_s23 + $0x48] sm:$0xff] }
  0x17   : > { %475 = vst.msk [vmem:[#allocation2 + $0x168] sm:$0x1] %vm459_vm1, %v2922_v0  ;;  %476 = vst.msk [vmem:[#allocation2 + $0x180] sm:$0x1] %vm459_vm1, %v2922_v0  ;;  %v403_v13 = vld [vmem:[%s3033_s23 + $0x50] sm:$0xff]  ;;  %v404_v14 = vld [vmem:[%s3033_s23 + $0x58] sm:$0xff] }
  0x18   : > { %477 = vst.msk [vmem:[#allocation2 + $0x198] sm:$0x1] %vm459_vm1, %v2922_v0  ;;  %479 = vst.msk [vmem:[#allocation2 + $0x29] sm:$0x1] %vm459_vm1, %v2922_v0  ;;  %v405_v15 = vld [vmem:[%s3033_s23 + $0x60] sm:$0xff]  ;;  %v406_v16 = vld [vmem:[%s3033_s23 + $0x68] sm:$0xff] }
  0x19   : > { %480 = vst.msk [vmem:[#allocation2 + $0x41] sm:$0x1] %vm459_vm1, %v2922_v0  ;;  %481 = vst.msk [vmem:[#allocation2 + $0x59] sm:$0x1] %vm459_vm1, %v2922_v0  ;;  %v407_v17 = vld [vmem:[%s3033_s23 + $0x70] sm:$0xff]  ;;  %v408_v18 = vld [vmem:[%s3033_s23 + $0x78] sm:$0xff]  ;;  %655 = vrot.lane.b32.xlu0 %v590_v8, %s2923_s24 }
  0x1a   : > { %482 = vst.msk [vmem:[#allocation2 + $0x71] sm:$0x1] %vm459_vm1, %v2922_v0  ;;  %483 = vst.msk [vmem:[#allocation2 + $0x89] sm:$0x1] %vm459_vm1, %v2922_v0  ;;  %v409_v19 = vld [vmem:[%s3033_s23 + $0x80] sm:$0xff]  ;;  %v410_v20 = vld [vmem:[%s3033_s23 + $0x88] sm:$0xff] }
  0x1b   : > { %484 = vst.msk [vmem:[#allocation2 + $0xa1] sm:$0x1] %vm459_vm1, %v2922_v0  ;;  %485 = vst.msk [vmem:[#allocation2 + $0xb9] sm:$0x1] %vm459_vm1, %v2922_v0  ;;  %v411_v21 = vld [vmem:[%s3033_s23 + $0x90] sm:$0xff]  ;;  %v412_v22 = vld [vmem:[%s3033_s23 + $0x98] sm:$0xff] }
  0x1c   : > { %486 = vst.msk [vmem:[#allocation2 + $0xd1] sm:$0x1] %vm459_vm1, %v2922_v0  ;;  %487 = vst.msk [vmem:[#allocation2 + $0xe9] sm:$0x1] %vm459_vm1, %v2922_v0  ;;  %v413_v23 = vld [vmem:[%s3033_s23 + $0xa0] sm:$0xff]  ;;  %v414_v24 = vld [vmem:[%s3033_s23 + $0xa8] sm:$0xff] }
  0x1d   : > { %488 = vst.msk [vmem:[#allocation2 + $0x101] sm:$0x1] %vm459_vm1, %v2922_v0  ;;  %489 = vst.msk [vmem:[#allocation2 + $0x119] sm:$0x1] %vm459_vm1, %v2922_v0  ;;  %v415_v28 = vld [vmem:[%s3033_s23 + $0xb0] sm:$0xff]  ;;  %v416_v29 = vld [vmem:[%s3033_s23 + $0xb8] sm:$0xff] }
  0x1e   : > { %490 = vst.msk [vmem:[#allocation2 + $0x131] sm:$0x1] %vm459_vm1, %v2922_v0  ;;  %491 = vst.msk [vmem:[#allocation2 + $0x149] sm:$0x1] %vm459_vm1, %v2922_v0  ;;  %v417_v33 = vld [vmem:[%s3033_s23 + $0xc0] sm:$0xff]  ;;  %v418_v34 = vld [vmem:[%s3033_s23 + $0xc8] sm:$0xff] }
  0x1f   : > { %492 = vst.msk [vmem:[#allocation2 + $0x161] sm:$0x1] %vm459_vm1, %v2922_v0  ;;  %493 = vst.msk [vmem:[#allocation2 + $0x179] sm:$0x1] %vm459_vm1, %v2922_v0  ;;  %v419_v35 = vld [vmem:[%s3033_s23 + $0xd0] sm:$0xff]  ;;  %v420_v36 = vld [vmem:[%s3033_s23 + $0xd8] sm:$0xff] }
  0x20   : > { %494 = vst.msk [vmem:[#allocation2 + $0x191] sm:$0x1] %vm459_vm1, %v2922_v0  ;;  %495 = vst.msk [vmem:[#allocation2 + $0x1a9] sm:$0x1] %vm459_vm1, %v2922_v0  ;;  %v421_v37 = vld [vmem:[%s3033_s23 + $0xe0] sm:$0xff]  ;;  %v422_v38 = vld [vmem:[%s3033_s23 + $0xe8] sm:$0xff] }
  0x21   : > { %427 = vst.msk [vmem:[#allocation2 + $0x19] sm:$0xff] %vm426_vm0, %v393_v1  ;;  %428 = vst.msk [vmem:[#allocation2 + $0x21] sm:$0xff] %vm426_vm0, %v394_v2  ;;  %v525_v45 = vld [vmem:[#allocation2] sm:$0xff]  ;;  %v526_v48 = vld [vmem:[#allocation2 + $0x8] sm:$0xff]  ;;  %s2929_s30 = smov 28   ;;  %s2930_s8 = smov 32  }
  0x22   : > { %429 = vst.msk [vmem:[#allocation2 + $0x31] sm:$0xff] %vm426_vm0, %v395_v3  ;;  %430 = vst.msk [vmem:[#allocation2 + $0x39] sm:$0xff] %vm426_vm0, %v396_v4  ;;  %vm1715_vm8 = vcmask 228544   ;;  %vm1908_vm9 = vcmask 261344   ;;  %vm2101_vm10 = vcmask 294144   ;;  %vm2178_vm11 = vcmask 293888  }
  0x23   : > { %431 = vst.msk [vmem:[#allocation2 + $0x49] sm:$0xff] %vm426_vm0, %v397_v5  ;;  %432 = vst.msk [vmem:[#allocation2 + $0x51] sm:$0xff] %vm426_vm0, %v398_v6 }
  0x24   : > { %433 = vst.msk [vmem:[#allocation2 + $0x61] sm:$0xff] %vm426_vm0, %v399_v9  ;;  %434 = vst.msk [vmem:[#allocation2 + $0x69] sm:$0xff] %vm426_vm0, %v400_v10 }
  0x25   : > { %435 = vst.msk [vmem:[#allocation2 + $0x79] sm:$0xff] %vm426_vm0, %v401_v11  ;;  %436 = vst.msk [vmem:[#allocation2 + $0x81] sm:$0xff] %vm426_vm0, %v402_v12 }
  0x26   : > { %437 = vst.msk [vmem:[#allocation2 + $0x91] sm:$0xff] %vm426_vm0, %v403_v13  ;;  %438 = vst.msk [vmem:[#allocation2 + $0x99] sm:$0xff] %vm426_vm0, %v404_v14 }
  0x27   : > { %439 = vst.msk [vmem:[#allocation2 + $0xa9] sm:$0xff] %vm426_vm0, %v405_v15  ;;  %440 = vst.msk [vmem:[#allocation2 + $0xb1] sm:$0xff] %vm426_vm0, %v406_v16 }
  0x28   : > { %441 = vst.msk [vmem:[#allocation2 + $0xc1] sm:$0xff] %vm426_vm0, %v407_v17  ;;  %442 = vst.msk [vmem:[#allocation2 + $0xc9] sm:$0xff] %vm426_vm0, %v408_v18  ;;  %v3078_v25 = vld [vmem:[#allocation2 + $0x19] sm:$0xff]  ;;  %v3087_v27 = vld [vmem:[#allocation2 + $0x21] sm:$0xff] }
  0x29   : > { %443 = vst.msk [vmem:[#allocation2 + $0xd9] sm:$0xff] %vm426_vm0, %v409_v19  ;;  %444 = vst.msk [vmem:[#allocation2 + $0xe1] sm:$0xff] %vm426_vm0, %v410_v20  ;;  %v3080_v26 = vld [vmem:[#allocation2 + $0x31] sm:$0xff]  ;;  %657 = vrot.lane.b32.xlu1 %v3078_v25, %s2923_s24  ;;  %v3099_v31 = vld [vmem:[#allocation2 + $0x39] sm:$0xff] }
  0x2a   : > { %445 = vst.msk [vmem:[#allocation2 + $0xf1] sm:$0xff] %vm426_vm0, %v411_v21  ;;  %446 = vst.msk [vmem:[#allocation2 + $0xf9] sm:$0xff] %vm426_vm0, %v412_v22  ;;  %661 = vrot.lane.b32.xlu0 %v3080_v26, %s2923_s24  ;;  %v3095_v30 = vld [vmem:[#allocation2 + $0x49] sm:$0xff]  ;;  %v3116_v39 = vld [vmem:[#allocation2 + $0x51] sm:$0xff] }
  0x2b   : > { %447 = vst.msk [vmem:[#allocation2 + $0x109] sm:$0xff] %vm426_vm0, %v413_v23  ;;  %448 = vst.msk [vmem:[#allocation2 + $0x111] sm:$0xff] %vm426_vm0, %v414_v24  ;;  %v3103_v32 = vld [vmem:[#allocation2 + $0x61] sm:$0xff]  ;;  %v3127_v41 = vld [vmem:[#allocation2 + $0x69] sm:$0xff] }
  0x2c   : > { %449 = vst.msk [vmem:[#allocation2 + $0x121] sm:$0xff] %vm426_vm0, %v415_v28  ;;  %450 = vst.msk [vmem:[#allocation2 + $0x129] sm:$0xff] %vm426_vm0, %v416_v29  ;;  %v3123_v40 = vld [vmem:[#allocation2 + $0x79] sm:$0xff]  ;;  %v3135_v43 = vld [vmem:[#allocation2 + $0x81] sm:$0xff] }
  0x2d   : > { %659 = vrot.lane.b32.xlu1 %v3087_v27, %s2923_s24  ;;  %451 = vst.msk [vmem:[#allocation2 + $0x139] sm:$0xff] %vm426_vm0, %v417_v33  ;;  %452 = vst.msk [vmem:[#allocation2 + $0x141] sm:$0xff] %vm426_vm0, %v418_v34  ;;  %v3131_v42 = vld [vmem:[#allocation2 + $0x91] sm:$0xff]  ;;  %v602_v46 = vld [vmem:[#allocation2 + $0x99] sm:$0xff] }
  0x2e   : > { %665 = vrot.lane.b32.xlu0 %v3095_v30, %s2923_s24  ;;  %453 = vst.msk [vmem:[#allocation2 + $0x151] sm:$0xff] %vm426_vm0, %v419_v35  ;;  %454 = vst.msk [vmem:[#allocation2 + $0x159] sm:$0xff] %vm426_vm0, %v420_v36  ;;  %v603_v44 = vld [vmem:[#allocation2 + $0xa9] sm:$0xff]  ;;  %v3142_v47 = vld [vmem:[#allocation2 + $0x18] sm:$0xff] }
  0x2f   : > { %455 = vst.msk [vmem:[#allocation2 + $0x169] sm:$0xff] %vm426_vm0, %v421_v37  ;;  %456 = vst.msk [vmem:[#allocation2 + $0x171] sm:$0xff] %vm426_vm0, %v422_v38  ;;  %v3148_v49 = vld [vmem:[#allocation2 + $0x20] sm:$0xff]  ;;  %v3150_v50 = vld [vmem:[#allocation2 + $0x30] sm:$0xff] }
  0x30   : > { %557 = vst.msk [vmem:[#allocation3] sm:$0xff] %vm426_vm0, %v525_v45  ;;  %559 = vst.msk [vmem:[#allocation3 + $0x10] sm:$0xff] %vm426_vm0, %v3142_v47  ;;  %v605_v51 = vld [vmem:[#allocation2 + $0xc1] sm:$0xff]  ;;  %v3156_v52 = vld [vmem:[#allocation2 + $0x38] sm:$0xff] }
  0x31   : > { %663 = vrot.lane.b32.xlu1 %v3099_v31, %s2923_s24  ;;  %558 = vst.msk [vmem:[#allocation3 + $0x8] sm:$0xff] %vm426_vm0, %v526_v48  ;;  %560 = vst.msk [vmem:[#allocation3 + $0x18] sm:$0xff] %vm426_vm0, %v3148_v49  ;;  %v604_v53 = vld [vmem:[#allocation2 + $0xb1] sm:$0xff]  ;;  %v3161_v54 = vld [vmem:[#allocation2 + $0x48] sm:$0xff] }
  0x32   : > { %669 = vrot.lane.b32.xlu0 %v3103_v32, %s2923_s24  ;;  %561 = vst.msk [vmem:[#allocation3 + $0x20] sm:$0xff] %vm426_vm0, %v3150_v50  ;;  %562 = vst.msk [vmem:[#allocation3 + $0x28] sm:$0xff] %vm426_vm0, %v3156_v52  ;;  %v3163_v55 = vld [vmem:[#allocation2 + $0x50] sm:$0xff]  ;;  %v3165_v56 = vld [vmem:[#allocation2 + $0xd9] sm:$0xff] }
  0x33   : > { %563 = vst.msk [vmem:[#allocation3 + $0x30] sm:$0xff] %vm426_vm0, %v3161_v54  ;;  %564 = vst.msk [vmem:[#allocation3 + $0x38] sm:$0xff] %vm426_vm0, %v3163_v55  ;;  %v3171_v57 = vld [vmem:[#allocation2 + $0x60] sm:$0xff]  ;;  %v3173_v58 = vld [vmem:[#allocation2 + $0x68] sm:$0xff] }
  0x34   : > { %v3175_v59 = vld [vmem:[#allocation2 + $0x78] sm:$0xff]  ;;  %565 = vst.msk [vmem:[#allocation3 + $0x40] sm:$0xff] %vm426_vm0, %v3171_v57  ;;  %566 = vst.msk [vmem:[#allocation3 + $0x48] sm:$0xff] %vm426_vm0, %v3173_v58  ;;  %v3184_v60 = vld [vmem:[#allocation2 + $0x80] sm:$0xff] }
  0x35   : > { %667 = vrot.lane.b32.xlu1 %v3116_v39, %s2923_s24  ;;  %567 = vst.msk [vmem:[#allocation3 + $0x50] sm:$0xff] %vm426_vm0, %v3175_v59  ;;  %v3186_v61 = vld [vmem:[#allocation2 + $0x90] sm:$0xff]  ;;  %v3188_v62 = vld [vmem:[#allocation2 + $0x98] sm:$0xff]  ;;  %568 = vst.msk [vmem:[#allocation3 + $0x58] sm:$0xff] %vm426_vm0, %v3184_v60 }
  0x36   : > { %673 = vrot.lane.b32.xlu0 %v3123_v40, %s2923_s24  ;;  %v606_v63 = vld [vmem:[#allocation2 + $0xc9] sm:$0xff]  ;;  %569 = vst.msk [vmem:[#allocation3 + $0x60] sm:$0xff] %vm426_vm0, %v3186_v61  ;;  %570 = vst.msk [vmem:[#allocation3 + $0x68] sm:$0xff] %vm426_vm0, %v3188_v62  ;;  %v3200_v2 = vld [vmem:[#allocation2 + $0xc0] sm:$0xff] }
  0x37   : > { %v3196_v0 = vld [vmem:[#allocation2 + $0xa8] sm:$0xff]  ;;  %v3198_v1 = vld [vmem:[#allocation2 + $0xb0] sm:$0xff]  ;;  %573 = vst.msk [vmem:[#allocation3 + $0x80] sm:$0xff] %vm426_vm0, %v3200_v2  ;;  %v3211_v4 = vld [vmem:[#allocation2 + $0xd8] sm:$0xff] }
  0x38   : > { %571 = vst.msk [vmem:[#allocation3 + $0x70] sm:$0xff] %vm426_vm0, %v3196_v0  ;;  %572 = vst.msk [vmem:[#allocation3 + $0x78] sm:$0xff] %vm426_vm0, %v3198_v1  ;;  %v3209_v3 = vld [vmem:[#allocation2 + $0xc8] sm:$0xff]  ;;  %v3213_v5 = vld [vmem:[#allocation2 + $0xe0] sm:$0xff] }
  0x39   : > { %671 = vrot.lane.b32.xlu1 %v3127_v41, %s2923_s24  ;;  %574 = vst.msk [vmem:[#allocation3 + $0x88] sm:$0xff] %vm426_vm0, %v3209_v3  ;;  %575 = vst.msk [vmem:[#allocation3 + $0x90] sm:$0xff] %vm426_vm0, %v3211_v4  ;;  %v3221_v6 = vld [vmem:[#allocation2 + $0xf0] sm:$0xff]  ;;  %v3223_v7 = vld [vmem:[#allocation2 + $0xf8] sm:$0xff] }
  0x3a   : > { %677 = vrot.lane.b32.xlu0 %v3131_v42, %s2923_s24  ;;  %576 = vst.msk [vmem:[#allocation3 + $0x98] sm:$0xff] %vm426_vm0, %v3213_v5  ;;  %v3225_v8 = vld [vmem:[#allocation2 + $0x108] sm:$0xff]  ;;  %577 = vst.msk [vmem:[#allocation3 + $0xa0] sm:$0xff] %vm426_vm0, %v3221_v6  ;;  %v3235_v9 = vld [vmem:[#allocation2 + $0x110] sm:$0xff] }
  0x3b   : > { %578 = vst.msk [vmem:[#allocation3 + $0xa8] sm:$0xff] %vm426_vm0, %v3223_v7  ;;  %579 = vst.msk [vmem:[#allocation3 + $0xb0] sm:$0xff] %vm426_vm0, %v3225_v8  ;;  %v3237_v10 = vld [vmem:[#allocation2 + $0xf1] sm:$0xff]  ;;  %v3241_v11 = vld [vmem:[#allocation2 + $0x120] sm:$0xff] }
  0x3c   : > { %580 = vst.msk [vmem:[#allocation3 + $0xb8] sm:$0xff] %vm426_vm0, %v3235_v9  ;;  %581 = vst.msk [vmem:[#allocation3 + $0xc0] sm:$0xff] %vm426_vm0, %v3241_v11  ;;  %v3246_v12 = vld [vmem:[#allocation2 + $0x128] sm:$0xff]  ;;  %v3254_v15 = vld [vmem:[#allocation2 + $0x138] sm:$0xff] }
  0x3d   : > { %675 = vrot.lane.b32.xlu1 %v3135_v43, %s2923_s24  ;;  %v3248_v13 = vld [vmem:[#allocation2 + $0xe1] sm:$0xff]  ;;  %582 = vst.msk [vmem:[#allocation3 + $0xc8] sm:$0xff] %vm426_vm0, %v3246_v12  ;;  %v611_v14 = vld [vmem:[#allocation2 + $0x109] sm:$0xff]  ;;  %583 = vst.msk [vmem:[#allocation3 + $0xd0] sm:$0xff] %vm426_vm0, %v3254_v15 }
  0x3e   : > { %681 = vrot.lane.b32.xlu0 %v603_v44, %s2923_s24  ;;  %v3260_v16 = vld [vmem:[#allocation2 + $0x140] sm:$0xff]  ;;  %v3267_v19 = vld [vmem:[#allocation2 + $0x150] sm:$0xff]  ;;  %v3273_v20 = vld [vmem:[#allocation2 + $0x158] sm:$0xff] }
  0x3f   : > { %v3262_v17 = vld [vmem:[#allocation2 + $0xf9] sm:$0xff]  ;;  %584 = vst.msk [vmem:[#allocation3 + $0xd8] sm:$0xff] %vm426_vm0, %v3260_v16  ;;  %v613_v18 = vld [vmem:[#allocation2 + $0x121] sm:$0xff]  ;;  %585 = vst.msk [vmem:[#allocation3 + $0xe0] sm:$0xff] %vm426_vm0, %v3267_v19 }
  0x40   : > { %v612_v21 = vld [vmem:[#allocation2 + $0x111] sm:$0xff]  ;;  %586 = vst.msk [vmem:[#allocation3 + $0xe8] sm:$0xff] %vm426_vm0, %v3273_v20  ;;  %v615_v22 = vld [vmem:[#allocation2 + $0x139] sm:$0xff]  ;;  %v3278_v23 = vld [vmem:[#allocation2 + $0x168] sm:$0xff] }
  0x41   : > { %679 = vrot.lane.b32.xlu1 %v602_v46, %s2923_s24  ;;  %587 = vst.msk [vmem:[#allocation3 + $0xf0] sm:$0xff] %vm426_vm0, %v3278_v23  ;;  %v3283_v24 = vld [vmem:[#allocation2 + $0x170] sm:$0xff]  ;;  %v616_v33 = vld [vmem:[#allocation2 + $0x141] sm:$0xff]  ;;  %v424_v36 = vld [vmem:[%s3033_s23 + $0xf8] sm:$0xff] }
  0x42   : > { %685 = vrot.lane.b32.xlu0 %v605_v51, %s2923_s24  ;;  %v614_v28 = vld [vmem:[#allocation2 + $0x129] sm:$0xff]  ;;  %588 = vst.msk [vmem:[#allocation3 + $0xf8] sm:$0xff] %vm426_vm0, %v3283_v24  ;;  %v617_v29 = vld [vmem:[#allocation2 + $0x151] sm:$0xff]  ;;  %458 = vst.msk [vmem:[#allocation2 + $0x189] sm:$0xff] %vm426_vm0, %v424_v36 }
  0x43   : > { %v423_v34 = vld [vmem:[%s3033_s23 + $0xf0] sm:$0xff]  ;;  %v618_v37 = vld [vmem:[#allocation2 + $0x159] sm:$0xff]  ;;  %v782_v38 = vld [vmem:[#allocation2 + $0x2] sm:$0xff] }
  0x44   : > { %457 = vst.msk [vmem:[#allocation2 + $0x181] sm:$0xff] %vm426_vm0, %v423_v34  ;;  %v619_v35 = vld [vmem:[#allocation2 + $0x169] sm:$0xff]  ;;  %v620_v44 = vld [vmem:[#allocation2 + $0x171] sm:$0xff]  ;;  %v3298_v45 = vld [vmem:[#allocation2 + $0x1a] sm:$0xff] }
  0x45   : > { %683 = vrot.lane.b32.xlu1 %v604_v53, %s2923_s24  ;;  %v783_v46 = vld [vmem:[#allocation2 + $0xa] sm:$0xff]  ;;  %v3303_v48 = vld [vmem:[#allocation2 + $0x32] sm:$0xff]  ;;  %v3306_v51 = vld [vmem:[#allocation2 + $0x22] sm:$0xff] }
  0x46   : > { %689 = vrot.lane.b32.xlu0 %v3165_v56, %s2923_s24  ;;  %v3310_v53 = vld [vmem:[#allocation2 + $0x4a] sm:$0xff]  ;;  %v795_v34 = vld [vmem:[#allocation2 + $0x9a] sm:$0xff]  ;;  %v797_v36 = vld [vmem:[#allocation2 + $0xb2] sm:$0xff] }
  0x49   : > { %687 = vrot.lane.b32.xlu1 %v606_v63, %s2923_s24  ;;  %v3314_v63 = vld [vmem:[#allocation2 + $0x3a] sm:$0xff] }
  0x4a   : > { %693 = vrot.lane.b32.xlu0 %v3237_v10, %s2923_s24 }
  0x4d   : > { %691 = vrot.lane.b32.xlu1 %v3248_v13, %s2923_s24 }
  0x4e   : > { %697 = vrot.lane.b32.xlu0 %v611_v14, %s2923_s24  ;;  %v790_v14 = vld [vmem:[#allocation2 + $0x62] sm:$0xff] }
  0x51   : > { %695 = vrot.lane.b32.xlu1 %v3262_v17, %s2923_s24 }
  0x52   : > { %701 = vrot.lane.b32.xlu0 %v613_v18, %s2923_s24  ;;  %v3320_v18 = vld [vmem:[#allocation2 + $0x52] sm:$0xff] }
  0x53   : > { %4055 = vst [vmem:[#allocation4_spill] sm:$0xff] %v3320_v18 }
  0x55   : > { %699 = vrot.lane.b32.xlu1 %v612_v21, %s2923_s24  ;;  %v792_v21 = vld [vmem:[#allocation2 + $0x7a] sm:$0xff] }
  0x56   : > { %705 = vrot.lane.b32.xlu0 %v615_v22, %s2923_s24  ;;  %v791_v22 = vld [vmem:[#allocation2 + $0x6a] sm:$0xff] }
  0x59   : > { %703 = vrot.lane.b32.xlu1 %v614_v28, %s2923_s24  ;;  %v794_v28 = vld [vmem:[#allocation2 + $0x92] sm:$0xff] }
  0x5a   : > { %709 = vrot.lane.b32.xlu0 %v617_v29, %s2923_s24  ;;  %v793_v29 = vld [vmem:[#allocation2 + $0x82] sm:$0xff] }
  0x5d   : > { %707 = vrot.lane.b32.xlu1 %v616_v33, %s2923_s24  ;;  %v796_v33 = vld [vmem:[#allocation2 + $0xaa] sm:$0xff] }
  0x5e   : > { %713 = vrot.lane.b32.xlu0 %v619_v35, %s2923_s24  ;;  %v798_v35 = vld [vmem:[#allocation2 + $0xc2] sm:$0xff] }
  0x61   : > { %711 = vrot.lane.b32.xlu1 %v618_v37, %s2923_s24  ;;  %v3332_v37 = vld [vmem:[#allocation2 + $0xda] sm:$0xff] }
  0x62   : > { %846 = vrot.lane.b32.xlu0 %v782_v38, %s2924_s25  ;;  %v799_v38 = vld [vmem:[#allocation2 + $0xca] sm:$0xff] }
  0x65   : > { %715 = vrot.lane.b32.xlu1 %v620_v44, %s2923_s24  ;;  %v3337_v44 = vld [vmem:[#allocation2 + $0xf2] sm:$0xff]  ;;  %s3934_s24 = scalar_lea.vmem %s4046_s5, %s2755_s2 }
  0x66   : > { %850 = vrot.lane.b32.xlu0 %v3298_v45, %s2924_s25 }
  0x69   : > { %848 = vrot.lane.b32.xlu1 %v783_v46, %s2924_s25  ;;  %v3340_v46 = vld [vmem:[#allocation2 + $0xe2] sm:$0xff] }
  0x6a   : > { %854 = vrot.lane.b32.xlu0 %v3303_v48, %s2924_s25 }
  0x6d   : > { %852 = vrot.lane.b32.xlu1 %v3306_v51, %s2924_s25 }
  0x6e   : > { %858 = vrot.lane.b32.xlu0 %v3310_v53, %s2924_s25 }
  0x71   : > { %856 = vrot.lane.b32.xlu1 %v3314_v63, %s2924_s25 }
  0x72   : > { %862 = vrot.lane.b32.xlu0 %v790_v14, %s2924_s25  ;;  %v3344_v14 = vld [vmem:[#allocation2 + $0x10a] sm:$0xff] }
  0x75   : > { %860 = vrot.lane.b32.xlu1 %v3320_v18, %s2924_s25  ;;  %v812_v18 = vld [vmem:[#allocation2 + $0x16a] sm:$0xff] }
  0x76   : > { %866 = vrot.lane.b32.xlu0 %v792_v21, %s2924_s25  ;;  %v3348_v21 = vld [vmem:[#allocation2 + $0xfa] sm:$0xff] }
  0x79   : > { %864 = vrot.lane.b32.xlu1 %v791_v22, %s2924_s25  ;;  %v3352_v22 = vld [vmem:[#allocation2 + $0x122] sm:$0xff] }
  0x7a   : > { %870 = vrot.lane.b32.xlu0 %v794_v28, %s2924_s25  ;;  %4056 = vst [vmem:[#allocation5_spill] sm:$0xff] %v3352_v22  ;;  %v3356_v28 = vld [vmem:[#allocation2 + $0x112] sm:$0xff] }
  0x7b   : > { %4057 = vst [vmem:[#allocation6_spill] sm:$0xff] %v3356_v28 }
  0x7d   : > { %868 = vrot.lane.b32.xlu1 %v793_v29, %s2924_s25  ;;  %v808_v29 = vld [vmem:[#allocation2 + $0x13a] sm:$0xff] }
  0x7e   : > { %874 = vrot.lane.b32.xlu0 %v796_v33, %s2924_s25 }
  0x81   : > { %872 = vrot.lane.b32.xlu1 %v795_v34, %s2924_s25  ;;  %v3363_v34 = vld [vmem:[#allocation2 + $0x12a] sm:$0xff] }
  0x82   : > { %878 = vrot.lane.b32.xlu0 %v798_v35, %s2924_s25  ;;  %4058 = vst [vmem:[#allocation7_spill] sm:$0xff] %v3363_v34  ;;  %v810_v35 = vld [vmem:[#allocation2 + $0x152] sm:$0xff] }
  0x85   : > { %876 = vrot.lane.b32.xlu1 %v797_v36, %s2924_s25 }
  0x86   : > { %882 = vrot.lane.b32.xlu0 %v3332_v37, %s2924_s25 }
  0x87   : > { %v654_v33 = vpop.permute.xlu0 %653 }
  0x88   : > { %750 = vst.msk [vmem:[#allocation3] sm:$0xff] %vm749_vm2, %v654_v33 }
  0x89   : > { %880 = vrot.lane.b32.xlu1 %v799_v38, %s2924_s25  ;;  %v809_v38 = vld [vmem:[#allocation2 + $0x142] sm:$0xff] }
  0x8a   : > { %886 = vrot.lane.b32.xlu0 %v3337_v44, %s2924_s25 }
  0x8b   : > { %v656_v36 = vpop.permute.xlu0 %655 }
  0x8c   : > { %751 = vst.msk [vmem:[#allocation3 + $0x8] sm:$0xff] %vm749_vm2, %v656_v36 }
  0x8d   : > { %884 = vrot.lane.b32.xlu1 %v3340_v46, %s2924_s25 }
  0x8e   : > { %890 = vrot.lane.b32.xlu0 %v3344_v14, %s2924_s25 }
  0x91   : > { %888 = vrot.lane.b32.xlu1 %v3348_v21, %s2924_s25 }
  0x92   : > { %894 = vrot.lane.b32.xlu0 %v3352_v22, %s2924_s25 }
  0x95   : > { %892 = vrot.lane.b32.xlu1 %v3356_v28, %s2924_s25 }
  0x96   : > { %898 = vrot.lane.b32.xlu0 %v808_v29, %s2924_s25  ;;  %v811_v29 = vld [vmem:[#allocation2 + $0x15a] sm:$0xff] }
  0x99   : > { %896 = vrot.lane.b32.xlu1 %v3363_v34, %s2924_s25 }
  0x9a   : > { %902 = vrot.lane.b32.xlu0 %v810_v35, %s2924_s25  ;;  %v813_v35 = vld [vmem:[#allocation2 + $0x172] sm:$0xff] }
  0x9b   : > { %v658_v22 = vpop.permute.xlu1 %657 }
  0x9c   : > { %752 = vst.msk [vmem:[#allocation3 + $0x10] sm:$0xff] %vm749_vm2, %v658_v22  ;;  %v662_v33 = vpop.permute.xlu0 %661 }
  0x9d   : > { %900 = vrot.lane.b32.xlu1 %v809_v38, %s2924_s25  ;;  %754 = vst.msk [vmem:[#allocation3 + $0x20] sm:$0xff] %vm749_vm2, %v662_v33 }
  0x9e   : > { %906 = vrot.lane.b32.xlu0 %v812_v18, %s2924_s25 }
  0x9f   : > { %v660_v28 = vpop.permute.xlu1 %659 }
  0xa0   : > { %753 = vst.msk [vmem:[#allocation3 + $0x18] sm:$0xff] %vm749_vm2, %v660_v28  ;;  %v666_v36 = vpop.permute.xlu0 %665 }
  0xa1   : > { %904 = vrot.lane.b32.xlu1 %v811_v29, %s2924_s25  ;;  %756 = vst.msk [vmem:[#allocation3 + $0x30] sm:$0xff] %vm749_vm2, %v666_v36 }
  0xa2   : > { %1039 = vrot.lane.b32.xlu0 %v3142_v47, %s2925_s26 }
  0xa3   : > { %v664_v34 = vpop.permute.xlu1 %663 }
  0xa4   : > { %755 = vst.msk [vmem:[#allocation3 + $0x28] sm:$0xff] %vm749_vm2, %v664_v34  ;;  %v670_v22 = vpop.permute.xlu0 %669 }
  0xa5   : > { %908 = vrot.lane.b32.xlu1 %v813_v35, %s2924_s25  ;;  %758 = vst.msk [vmem:[#allocation3 + $0x40] sm:$0xff] %vm749_vm2, %v670_v22 }
  0xa6   : > { %1043 = vrot.lane.b32.xlu0 %v3150_v50, %s2925_s26 }
  0xa7   : > { %v668_v18 = vpop.permute.xlu1 %667 }
  0xa8   : > { %757 = vst.msk [vmem:[#allocation3 + $0x38] sm:$0xff] %vm749_vm2, %v668_v18  ;;  %v674_v28 = vpop.permute.xlu0 %673 }
  0xa9   : > { %1041 = vrot.lane.b32.xlu1 %v3148_v49, %s2925_s26  ;;  %760 = vst.msk [vmem:[#allocation3 + $0x50] sm:$0xff] %vm749_vm2, %v674_v28 }
  0xaa   : > { %1047 = vrot.lane.b32.xlu0 %v3161_v54, %s2925_s26 }
  0xab   : > { %v672_v47 = vpop.permute.xlu1 %671 }
  0xac   : > { %759 = vst.msk [vmem:[#allocation3 + $0x48] sm:$0xff] %vm749_vm2, %v672_v47  ;;  %v678_v34 = vpop.permute.xlu0 %677 }
  0xad   : > { %1045 = vrot.lane.b32.xlu1 %v3156_v52, %s2925_s26  ;;  %762 = vst.msk [vmem:[#allocation3 + $0x60] sm:$0xff] %vm749_vm2, %v678_v34 }
  0xae   : > { %1051 = vrot.lane.b32.xlu0 %v3171_v57, %s2925_s26 }
  0xaf   : > { %v676_v38 = vpop.permute.xlu1 %675 }
  0xb0   : > { %761 = vst.msk [vmem:[#allocation3 + $0x58] sm:$0xff] %vm749_vm2, %v676_v38  ;;  %v682_v49 = vpop.permute.xlu0 %681 }
  0xb1   : > { %1049 = vrot.lane.b32.xlu1 %v3163_v55, %s2925_s26  ;;  %764 = vst.msk [vmem:[#allocation3 + $0x70] sm:$0xff] %vm749_vm2, %v682_v49 }
  0xb2   : > { %1055 = vrot.lane.b32.xlu0 %v3175_v59, %s2925_s26 }
  0xb3   : > { %v680_v33 = vpop.permute.xlu1 %679 }
  0xb4   : > { %763 = vst.msk [vmem:[#allocation3 + $0x68] sm:$0xff] %vm749_vm2, %v680_v33  ;;  %v686_v29 = vpop.permute.xlu0 %685 }
  0xb5   : > { %1053 = vrot.lane.b32.xlu1 %v3173_v58, %s2925_s26  ;;  %766 = vst.msk [vmem:[#allocation3 + $0x80] sm:$0xff] %vm749_vm2, %v686_v29 }
  0xb6   : > { %1059 = vrot.lane.b32.xlu0 %v3186_v61, %s2925_s26 }
  0xb7   : > { %v684_v36 = vpop.permute.xlu1 %683 }
  0xb8   : > { %765 = vst.msk [vmem:[#allocation3 + $0x78] sm:$0xff] %vm749_vm2, %v684_v36  ;;  %v690_v35 = vpop.permute.xlu0 %689  ;;  %v1005_v36 = vld [vmem:[#allocation2 + $0x180] sm:$0xff] }
  0xb9   : > { %1057 = vrot.lane.b32.xlu1 %v3184_v60, %s2925_s26  ;;  %768 = vst.msk [vmem:[#allocation3 + $0x90] sm:$0xff] %vm749_vm2, %v690_v35 }
  0xba   : > { %1063 = vrot.lane.b32.xlu0 %v3196_v0, %s2925_s26 }
  0xbb   : > { %v688_v22 = vpop.permute.xlu1 %687 }
  0xbc   : > { %767 = vst.msk [vmem:[#allocation3 + $0x88] sm:$0xff] %vm749_vm2, %v688_v22  ;;  %v694_v18 = vpop.permute.xlu0 %693 }
  0xbd   : > { %1061 = vrot.lane.b32.xlu1 %v3188_v62, %s2925_s26  ;;  %770 = vst.msk [vmem:[#allocation3 + $0xa0] sm:$0xff] %vm749_vm2, %v694_v18 }
  0xbe   : > { %1067 = vrot.lane.b32.xlu0 %v3200_v2, %s2925_s26 }
  0xbf   : > { %v692_v61 = vpop.permute.xlu1 %691 }
  0xc0   : > { %769 = vst.msk [vmem:[#allocation3 + $0x98] sm:$0xff] %vm749_vm2, %v692_v61  ;;  %v698_v28 = vpop.permute.xlu0 %697 }
  0xc1   : > { %1065 = vrot.lane.b32.xlu1 %v3198_v1, %s2925_s26  ;;  %772 = vst.msk [vmem:[#allocation3 + $0xb0] sm:$0xff] %vm749_vm2, %v698_v28 }
  0xc2   : > { %1071 = vrot.lane.b32.xlu0 %v3211_v4, %s2925_s26 }
  0xc3   : > { %v696_v0 = vpop.permute.xlu1 %695 }
  0xc4   : > { %771 = vst.msk [vmem:[#allocation3 + $0xa8] sm:$0xff] %vm749_vm2, %v696_v0  ;;  %v702_v62 = vpop.permute.xlu0 %701 }
  0xc5   : > { %1069 = vrot.lane.b32.xlu1 %v3209_v3, %s2925_s26  ;;  %774 = vst.msk [vmem:[#allocation3 + $0xc0] sm:$0xff] %vm749_vm2, %v702_v62 }
  0xc6   : > { %1075 = vrot.lane.b32.xlu0 %v3221_v6, %s2925_s26 }
  0xc7   : > { %v700_v2 = vpop.permute.xlu1 %699 }
  0xc8   : > { %773 = vst.msk [vmem:[#allocation3 + $0xb8] sm:$0xff] %vm749_vm2, %v700_v2  ;;  %v706_v1 = vpop.permute.xlu0 %705 }
  0xc9   : > { %1073 = vrot.lane.b32.xlu1 %v3213_v5, %s2925_s26  ;;  %776 = vst.msk [vmem:[#allocation3 + $0xd0] sm:$0xff] %vm749_vm2, %v706_v1 }
  0xca   : > { %1079 = vrot.lane.b32.xlu0 %v3225_v8, %s2925_s26 }
  0xcb   : > { %v704_v4 = vpop.permute.xlu1 %703 }
  0xcc   : > { %775 = vst.msk [vmem:[#allocation3 + $0xc8] sm:$0xff] %vm749_vm2, %v704_v4  ;;  %v710_v3 = vpop.permute.xlu0 %709  ;;  %v2170_v4 = vld [vmem:[%s4044_s3 + $0x20] sm:$0xf] }
  0xcd   : > { %1077 = vrot.lane.b32.xlu1 %v3223_v7, %s2925_s26  ;;  %778 = vst.msk [vmem:[#allocation3 + $0xe0] sm:$0xff] %vm749_vm2, %v710_v3  ;;  %2797 = vmatprep.subr.msk.mxu0 %vm2275_vm5, %v2170_v4 }
  0xce   : > { %1083 = vrot.lane.b32.xlu0 %v3241_v11, %s2925_s26  ;;  %2855 = vmatprep.subr.msk.mxu1 %vm2275_vm5, %v2170_v4 }
  0xcf   : > { %v708_v47 = vpop.permute.xlu1 %707  ;;  %2798 = vmatpush3.msk.msra.mxu0 %vm2275_vm5, %v2170_v4  ;;  %2860 = vmatpush3.msk.msra.mxu1 %vm2275_vm5, %v2170_v4 }
  0xd0   : > { %777 = vst.msk [vmem:[#allocation3 + $0xd8] sm:$0xff] %vm749_vm2, %v708_v47  ;;  %v714_v5 = vpop.permute.xlu0 %713 }
  0xd1   : > { %1081 = vrot.lane.b32.xlu1 %v3235_v9, %s2925_s26  ;;  %780 = vst.msk [vmem:[#allocation3 + $0xf0] sm:$0xff] %vm749_vm2, %v714_v5  ;;  %v2168_v5 = vld [vmem:[%s4044_s3 + $0x10] sm:$0xff] }
  0xd2   : > { %1087 = vrot.lane.b32.xlu0 %v3254_v15, %s2925_s26 }
  0xd3   : > { %v712_v34 = vpop.permute.xlu1 %711 }
  0xd4   : > { %779 = vst.msk [vmem:[#allocation3 + $0xe8] sm:$0xff] %vm749_vm2, %v712_v34  ;;  %v847_v38 = vpop.permute.xlu0 %846 }
  0xd5   : > { %1085 = vrot.lane.b32.xlu1 %v3246_v12, %s2925_s26  ;;  %943 = vst.msk [vmem:[#allocation3] sm:$0xff] %vm942_vm3, %v847_v38  ;;  %v2167_v38 = vld [vmem:[%s4044_s3 + $0x8] sm:$0xff] }
  0xd6   : > { %1091 = vrot.lane.b32.xlu0 %v3267_v19, %s2925_s26 }
  0xd7   : > { %v716_v49 = vpop.permute.xlu1 %715 }
  0xd8   : > { %781 = vst.msk [vmem:[#allocation3 + $0xf8] sm:$0xff] %vm749_vm2, %v716_v49  ;;  %v851_v33 = vpop.permute.xlu0 %850 }
  0xd9   : > { %1089 = vrot.lane.b32.xlu1 %v3260_v16, %s2925_s26  ;;  %945 = vst.msk [vmem:[#allocation3 + $0x10] sm:$0xff] %vm942_vm3, %v851_v33  ;;  %v2166_v33 = vld [vmem:[%s4044_s3] sm:$0xff] }
  0xda   : > { %1095 = vrot.lane.b32.xlu0 %v3278_v23, %s2925_s26  ;;  %v1006_v23 = vld [vmem:[#allocation2 + $0x188] sm:$0xff] }
  0xdb   : > { %v849_v29 = vpop.permute.xlu1 %848 }
  0xdc   : > { %944 = vst.msk [vmem:[#allocation3 + $0x8] sm:$0xff] %vm942_vm3, %v849_v29  ;;  %v855_v35 = vpop.permute.xlu0 %854 }
  0xdd   : > { %1093 = vrot.lane.b32.xlu1 %v3273_v20, %s2925_s26  ;;  %947 = vst.msk [vmem:[#allocation3 + $0x20] sm:$0xff] %vm942_vm3, %v855_v35 }
  0xde   : > { %1099 = vrot.lane.b32.xlu0 %v1005_v36, %s2925_s26 }
  0xdf   : > { %v853_v22 = vpop.permute.xlu1 %852 }
  0xe0   : > { %946 = vst.msk [vmem:[#allocation3 + $0x18] sm:$0xff] %vm942_vm3, %v853_v22  ;;  %v859_v18 = vpop.permute.xlu0 %858 }
  0xe1   : > { %1097 = vrot.lane.b32.xlu1 %v3283_v24, %s2925_s26  ;;  %949 = vst.msk [vmem:[#allocation3 + $0x30] sm:$0xff] %vm942_vm3, %v859_v18 }
  0xe2   : > { %1232 = vrot.lane.b32.xlu0 %v3078_v25, %s2926_s27 }
  0xe3   : > { %v857_v61 = vpop.permute.xlu1 %856 }
  0xe4   : > { %948 = vst.msk [vmem:[#allocation3 + $0x28] sm:$0xff] %vm942_vm3, %v857_v61  ;;  %v863_v28 = vpop.permute.xlu0 %862 }
  0xe5   : > { %1101 = vrot.lane.b32.xlu1 %v1006_v23, %s2925_s26  ;;  %951 = vst.msk [vmem:[#allocation3 + $0x40] sm:$0xff] %vm942_vm3, %v863_v28 }
  0xe6   : > { %1236 = vrot.lane.b32.xlu0 %v3080_v26, %s2926_s27 }
  0xe7   : > { %v861_v0 = vpop.permute.xlu1 %860 }
  0xe8   : > { %950 = vst.msk [vmem:[#allocation3 + $0x38] sm:$0xff] %vm942_vm3, %v861_v0  ;;  %v867_v24 = vpop.permute.xlu0 %866  ;;  %v1767_v0 = vld [vmem:[#allocation2 + $0x111] sm:$0xff] }
  0xe9   : > { %1234 = vrot.lane.b32.xlu1 %v3087_v27, %s2926_s27  ;;  %953 = vst.msk [vmem:[#allocation3 + $0x50] sm:$0xff] %vm942_vm3, %v867_v24 }
  0xea   : > { %1240 = vrot.lane.b32.xlu0 %v3095_v30, %s2926_s27 }
  0xeb   : > { %v865_v25 = vpop.permute.xlu1 %864 }
  0xec   : > { %952 = vst.msk [vmem:[#allocation3 + $0x48] sm:$0xff] %vm942_vm3, %v865_v25  ;;  %v871_v62 = vpop.permute.xlu0 %870 }
  0xed   : > { %1238 = vrot.lane.b32.xlu1 %v3099_v31, %s2926_s27  ;;  %955 = vst.msk [vmem:[#allocation3 + $0x60] sm:$0xff] %vm942_vm3, %v871_v62 }
  0xee   : > { %1244 = vrot.lane.b32.xlu0 %v3103_v32, %s2926_s27 }
  0xef   : > { %v869_v26 = vpop.permute.xlu1 %868 }
  0xf0   : > { %954 = vst.msk [vmem:[#allocation3 + $0x58] sm:$0xff] %vm942_vm3, %v869_v26  ;;  %v875_v27 = vpop.permute.xlu0 %874 }
  0xf1   : > { %1242 = vrot.lane.b32.xlu1 %v3116_v39, %s2926_s27  ;;  %957 = vst.msk [vmem:[#allocation3 + $0x70] sm:$0xff] %vm942_vm3, %v875_v27 }
  0xf2   : > { %1248 = vrot.lane.b32.xlu0 %v3123_v40, %s2926_s27 }
  0xf3   : > { %v873_v30 = vpop.permute.xlu1 %872 }
  0xf4   : > { %956 = vst.msk [vmem:[#allocation3 + $0x68] sm:$0xff] %vm942_vm3, %v873_v30  ;;  %v879_v31 = vpop.permute.xlu0 %878 }
  0xf5   : > { %1246 = vrot.lane.b32.xlu1 %v3127_v41, %s2926_s27  ;;  %959 = vst.msk [vmem:[#allocation3 + $0x80] sm:$0xff] %vm942_vm3, %v879_v31 }
  0xf6   : > { %1252 = vrot.lane.b32.xlu0 %v3131_v42, %s2926_s27 }
  0xf7   : > { %v877_v32 = vpop.permute.xlu1 %876 }
  0xf8   : > { %958 = vst.msk [vmem:[#allocation3 + $0x78] sm:$0xff] %vm942_vm3, %v877_v32  ;;  %v883_v39 = vpop.permute.xlu0 %882  ;;  %v4059_v32 = vld [vmem:[#allocation6_spill] sm:$0xff] }
  0xf9   : > { %1250 = vrot.lane.b32.xlu1 %v3135_v43, %s2926_s27  ;;  %961 = vst.msk [vmem:[#allocation3 + $0x90] sm:$0xff] %vm942_vm3, %v883_v39  ;;  %v4060_v39 = vld [vmem:[#allocation4_spill] sm:$0xff] }
  0xfa   : > { %1266 = vrot.lane.b32.xlu0 %v3248_v13, %s2926_s27 }
  0xfb   : > { %v881_v40 = vpop.permute.xlu1 %880 }
  0xfc   : > { %960 = vst.msk [vmem:[#allocation3 + $0x88] sm:$0xff] %vm942_vm3, %v881_v40  ;;  %v887_v41 = vpop.permute.xlu0 %886 }
  0xfd   : > { %1264 = vrot.lane.b32.xlu1 %v3165_v56, %s2926_s27  ;;  %963 = vst.msk [vmem:[#allocation3 + $0xa0] sm:$0xff] %vm942_vm3, %v887_v41 }
  0xfe   : > { %1457 = vrot.lane.b32.xlu0 %v3332_v37, %s2927_s28 }
  0xff   : > { %v885_v42 = vpop.permute.xlu1 %884 }
 0x100   : > { %962 = vst.msk [vmem:[#allocation3 + $0x98] sm:$0xff] %vm942_vm3, %v885_v42  ;;  %v891_v43 = vpop.permute.xlu0 %890 }
 0x101   : > { %1425 = vrot.lane.b32.xlu1 %v3298_v45, %s2927_s28  ;;  %965 = vst.msk [vmem:[#allocation3 + $0xb0] sm:$0xff] %vm942_vm3, %v891_v43 }
 0x102   : > { %1459 = vrot.lane.b32.xlu0 %v3340_v46, %s2927_s28 }
 0x103   : > { %v889_v13 = vpop.permute.xlu1 %888 }
 0x104   : > { %964 = vst.msk [vmem:[#allocation3 + $0xa8] sm:$0xff] %vm942_vm3, %v889_v13  ;;  %v895_v56 = vpop.permute.xlu0 %894  ;;  %v1768_v13 = vld [vmem:[#allocation2 + $0x121] sm:$0xff] }
 0x105   : > { %1427 = vrot.lane.b32.xlu1 %v3306_v51, %s2927_s28  ;;  %967 = vst.msk [vmem:[#allocation3 + $0xc0] sm:$0xff] %vm942_vm3, %v895_v56  ;;  %v1752_v56 = vld [vmem:[#allocation2 + $0x61] sm:$0xff] }
 0x106   : > { %1651 = vrot.lane.b32.xlu0 %v3221_v6, %s2928_s29  ;;  %v1748_v6 = vld [vmem:[#allocation2 + $0x31] sm:$0xff] }
 0x107   : > { %v893_v37 = vpop.permute.xlu1 %892 }
 0x108   : > { %966 = vst.msk [vmem:[#allocation3 + $0xb8] sm:$0xff] %vm942_vm3, %v893_v37  ;;  %v899_v45 = vpop.permute.xlu0 %898 }
 0x109   : > { %1619 = vrot.lane.b32.xlu1 %v3150_v50, %s2928_s29  ;;  %969 = vst.msk [vmem:[#allocation3 + $0xd0] sm:$0xff] %vm942_vm3, %v899_v45  ;;  %v1749_v50 = vld [vmem:[#allocation2 + $0x39] sm:$0xff] }
 0x10a   : > { %1653 = vrot.lane.b32.xlu0 %v3223_v7, %s2928_s29 }
 0x10b   : > { %v897_v46 = vpop.permute.xlu1 %896 }
 0x10c   : > { %968 = vst.msk [vmem:[#allocation3 + $0xc8] sm:$0xff] %vm942_vm3, %v897_v46  ;;  %v903_v51 = vpop.permute.xlu0 %902 }
 0x10d   : > { %1621 = vrot.lane.b32.xlu1 %v3156_v52, %s2928_s29  ;;  %971 = vst.msk [vmem:[#allocation3 + $0xe0] sm:$0xff] %vm942_vm3, %v903_v51  ;;  %v1769_v51 = vld [vmem:[#allocation2 + $0x129] sm:$0xff] }
 0x10e   : > { %1844 = vrot.lane.b32.xlu0 %v3237_v10, %s2929_s30 }
 0x10f   : > { %v901_v2 = vpop.permute.xlu1 %900 }
 0x110   : > { %970 = vst.msk [vmem:[#allocation3 + $0xd8] sm:$0xff] %vm942_vm3, %v901_v2  ;;  %v907_v7 = vpop.permute.xlu0 %906 }
 0x111   : > { %1812 = vrot.lane.b32.xlu1 %v1748_v6, %s2929_s30  ;;  %973 = vst.msk [vmem:[#allocation3 + $0xf0] sm:$0xff] %vm942_vm3, %v907_v7  ;;  %v4061_v7 = vld [vmem:[#allocation5_spill] sm:$0xff] }
 0x112   : > { %1814 = vrot.lane.b32.xlu0 %v1749_v50, %s2929_s30 }
 0x113   : > { %v905_v1 = vpop.permute.xlu1 %904 }
 0x114   : > { %972 = vst.msk [vmem:[#allocation3 + $0xe8] sm:$0xff] %vm942_vm3, %v905_v1  ;;  %v1040_v52 = vpop.permute.xlu0 %1039 }
 0x115   : > { %1268 = vrot.lane.b32.xlu1 %v3237_v10, %s2926_s27  ;;  %1136 = vst.msk [vmem:[#allocation3] sm:$0xff] %vm1135_vm4, %v1040_v52  ;;  %v2169_v10 = vld [vmem:[%s4044_s3 + $0x18] sm:$0xff] }
 0x116   : > { %2005 = vrot.lane.b32.xlu0 %v3303_v48, %s2930_s8  ;;  %2799 = vmatprep.subr.mxu0 %v2169_v10 }
 0x117   : > { %v909_v3 = vpop.permute.xlu1 %908  ;;  %2800 = vmatpush3.msra.mxu0 %v2169_v10  ;;  %2856 = vmatprep.subr.mxu1 %v2169_v10 }
 0x118   : > { %974 = vst.msk [vmem:[#allocation3 + $0xf8] sm:$0xff] %vm942_vm3, %v909_v3  ;;  %v1044_v47 = vpop.permute.xlu0 %1043  ;;  %2801 = vmatprep.subr.mxu0 %v2168_v5  ;;  %2861 = vmatpush3.msra.mxu1 %v2169_v10  ;;  %v1946_v3 = vld [vmem:[#allocation2 + $0x6a] sm:$0xff] }
 0x119   : > { %1846 = vrot.lane.b32.xlu1 %v3262_v17, %s2929_s30  ;;  %1138 = vst.msk [vmem:[#allocation3 + $0x10] sm:$0xff] %vm1135_vm4, %v1044_v47  ;;  %2802 = vmatpush3.msra.mxu0 %v2168_v5  ;;  %v4062_v47 = vld [vmem:[#allocation7_spill] sm:$0xff] }
 0x11a   : > { %1270 = vrot.lane.b32.xlu0 %v3262_v17, %s2926_s27  ;;  %2857 = vmatprep.subr.mxu1 %v2168_v5 }
 0x11b   : > { %v1042_v34 = vpop.permute.xlu1 %1041  ;;  %2803 = vmatprep.subr.mxu0 %v2167_v38  ;;  %2862 = vmatpush3.msra.mxu1 %v2168_v5 }
 0x11c   : > { %1137 = vst.msk [vmem:[#allocation3 + $0x8] sm:$0xff] %vm1135_vm4, %v1042_v34  ;;  %v1048_v49 = vpop.permute.xlu0 %1047  ;;  %2804 = vmatpush3.msra.mxu0 %v2167_v38  ;;  %2858 = vmatprep.subr.mxu1 %v2167_v38 }
 0x11d   : > { %2037 = vrot.lane.b32.xlu1 %v3337_v44, %s2930_s8  ;;  %1140 = vst.msk [vmem:[#allocation3 + $0x20] sm:$0xff] %vm1135_vm4, %v1048_v49  ;;  %2805 = vmatprep.subr.mxu0 %v2166_v33 }
 0x11e   : > { %1461 = vrot.lane.b32.xlu0 %v3337_v44, %s2927_s28  ;;  %2863 = vmatpush3.msra.mxu1 %v2167_v38 }
 0x11f   : > { %v1046_v17 = vpop.permute.xlu1 %1045  ;;  %2806 = vmatpush3.msra.mxu0 %v2166_v33  ;;  %2859 = vmatprep.subr.mxu1 %v2166_v33 }
 0x120   : > { %1139 = vst.msk [vmem:[#allocation3 + $0x18] sm:$0xff] %vm1135_vm4, %v1046_v17  ;;  %v1052_v29 = vpop.permute.xlu0 %1051  ;;  %2864 = vmatpush3.msra.mxu1 %v2166_v33 }
 0x121   : > { %1429 = vrot.lane.b32.xlu1 %v3303_v48, %s2927_s28  ;;  %1142 = vst.msk [vmem:[#allocation3 + $0x30] sm:$0xff] %vm1135_vm4, %v1052_v29  ;;  %v1770_v29 = vld [vmem:[#allocation2 + $0x139] sm:$0xff] }
 0x122   : > { %2039 = vrot.lane.b32.xlu0 %v3348_v21, %s2930_s8 }
 0x123   : > { %v1050_v36 = vpop.permute.xlu1 %1049 }
 0x124   : > { %1141 = vst.msk [vmem:[#allocation3 + $0x28] sm:$0xff] %vm1135_vm4, %v1050_v36  ;;  %v1056_v44 = vpop.permute.xlu0 %1055  ;;  %v1754_v36 = vld [vmem:[#allocation2 + $0x79] sm:$0xff] }
 0x125   : > { %2007 = vrot.lane.b32.xlu1 %v3314_v63, %s2930_s8  ;;  %1144 = vst.msk [vmem:[#allocation3 + $0x40] sm:$0xff] %vm1135_vm4, %v1056_v44 }
 0x126   : > { %1463 = vrot.lane.b32.xlu0 %v3348_v21, %s2927_s28 }
 0x127   : > { %v1054_v35 = vpop.permute.xlu1 %1053 }
 0x128   : > { %1143 = vst.msk [vmem:[#allocation3 + $0x38] sm:$0xff] %vm1135_vm4, %v1054_v35  ;;  %v1060_v48 = vpop.permute.xlu0 %1059 }
 0x129   : > { %1431 = vrot.lane.b32.xlu1 %v3314_v63, %s2927_s28  ;;  %1146 = vst.msk [vmem:[#allocation3 + $0x50] sm:$0xff] %vm1135_vm4, %v1060_v48  ;;  %v1766_v63 = vld [vmem:[#allocation2 + $0x109] sm:$0xff] }
 0x12a   : > { %1655 = vrot.lane.b32.xlu0 %v3225_v8, %s2928_s29  ;;  %v1750_v8 = vld [vmem:[#allocation2 + $0x49] sm:$0xff] }
 0x12b   : > { %v1058_v22 = vpop.permute.xlu1 %1057 }
 0x12c   : > { %1145 = vst.msk [vmem:[#allocation3 + $0x48] sm:$0xff] %vm1135_vm4, %v1058_v22  ;;  %v1064_v18 = vpop.permute.xlu0 %1063  ;;  %v1771_v22 = vld [vmem:[#allocation2 + $0x141] sm:$0xff] }
 0x12d   : > { %1623 = vrot.lane.b32.xlu1 %v3161_v54, %s2928_s29  ;;  %1148 = vst.msk [vmem:[#allocation3 + $0x60] sm:$0xff] %vm1135_vm4, %v1064_v18  ;;  %v1751_v54 = vld [vmem:[#allocation2 + $0x51] sm:$0xff] }
 0x12e   : > { %1657 = vrot.lane.b32.xlu0 %v3235_v9, %s2928_s29 }
 0x12f   : > { %v1062_v21 = vpop.permute.xlu1 %1061 }
 0x130   : > { %1147 = vst.msk [vmem:[#allocation3 + $0x58] sm:$0xff] %vm1135_vm4, %v1062_v21  ;;  %v1068_v23 = vpop.permute.xlu0 %1067 }
 0x131   : > { %1625 = vrot.lane.b32.xlu1 %v3163_v55, %s2928_s29  ;;  %1150 = vst.msk [vmem:[#allocation3 + $0x70] sm:$0xff] %vm1135_vm4, %v1068_v23 }
 0x132   : > { %1848 = vrot.lane.b32.xlu0 %v1766_v63, %s2929_s30 }
 0x133   : > { %v1066_v61 = vpop.permute.xlu1 %1065 }
 0x134   : > { %1149 = vst.msk [vmem:[#allocation3 + $0x68] sm:$0xff] %vm1135_vm4, %v1066_v61  ;;  %v1072_v28 = vpop.permute.xlu0 %1071 }
 0x135   : > { %1816 = vrot.lane.b32.xlu1 %v1750_v8, %s2929_s30  ;;  %1152 = vst.msk [vmem:[#allocation3 + $0x80] sm:$0xff] %vm1135_vm4, %v1072_v28 }
 0x136   : > { %1818 = vrot.lane.b32.xlu0 %v1751_v54, %s2929_s30  ;;  %v1964_v54 = vld [vmem:[#allocation2 + $0x142] sm:$0xff] }
 0x137   : > { %v1070_v9 = vpop.permute.xlu1 %1069 }
 0x138   : > { %1151 = vst.msk [vmem:[#allocation3 + $0x78] sm:$0xff] %vm1135_vm4, %v1070_v9  ;;  %v1076_v55 = vpop.permute.xlu0 %1075  ;;  %v1948_v9 = vld [vmem:[#allocation2 + $0x82] sm:$0xff] }
 0x139   : > { %1272 = vrot.lane.b32.xlu1 %v1766_v63, %s2926_s27  ;;  %1154 = vst.msk [vmem:[#allocation3 + $0x90] sm:$0xff] %vm1135_vm4, %v1076_v55  ;;  %v1963_v63 = vld [vmem:[#allocation2 + $0x13a] sm:$0xff] }
 0x13a   : > { %2009 = vrot.lane.b32.xlu0 %v3310_v53, %s2930_s8 }
 0x13b   : > { %v1074_v24 = vpop.permute.xlu1 %1073 }
 0x13c   : > { %1153 = vst.msk [vmem:[#allocation3 + $0x88] sm:$0xff] %vm1135_vm4, %v1074_v24  ;;  %v1080_v25 = vpop.permute.xlu0 %1079 }
 0x13d   : > { %1850 = vrot.lane.b32.xlu1 %v1767_v0, %s2929_s30  ;;  %1156 = vst.msk [vmem:[#allocation3 + $0xa0] sm:$0xff] %vm1135_vm4, %v1080_v25 }
 0x13e   : > { %1274 = vrot.lane.b32.xlu0 %v1767_v0, %s2926_s27 }
 0x13f   : > { %v1078_v62 = vpop.permute.xlu1 %1077 }
 0x140   : > { %1155 = vst.msk [vmem:[#allocation3 + $0x98] sm:$0xff] %vm1135_vm4, %v1078_v62  ;;  %v1084_v26 = vpop.permute.xlu0 %1083 }
 0x141   : > { %2041 = vrot.lane.b32.xlu1 %v3344_v14, %s2930_s8  ;;  %1158 = vst.msk [vmem:[#allocation3 + $0xb0] sm:$0xff] %vm1135_vm4, %v1084_v26  ;;  %v1563_v26 = vld [vmem:[#allocation2 + $0x90] sm:$0xff] }
 0x142   : > { %1465 = vrot.lane.b32.xlu0 %v3344_v14, %s2927_s28 }
 0x143   : > { %v1082_v27 = vpop.permute.xlu1 %1081 }
 0x144   : > { %1157 = vst.msk [vmem:[#allocation3 + $0xa8] sm:$0xff] %vm1135_vm4, %v1082_v27  ;;  %v1088_v30 = vpop.permute.xlu0 %1087 }
 0x145   : > { %1433 = vrot.lane.b32.xlu1 %v3310_v53, %s2927_s28  ;;  %1160 = vst.msk [vmem:[#allocation3 + $0xc0] sm:$0xff] %vm1135_vm4, %v1088_v30 }
 0x146   : > { %2043 = vrot.lane.b32.xlu0 %v4059_v32, %s2930_s8 }
 0x147   : > { %v1086_v31 = vpop.permute.xlu1 %1085 }
 0x148   : > { %1159 = vst.msk [vmem:[#allocation3 + $0xb8] sm:$0xff] %vm1135_vm4, %v1086_v31  ;;  %v1092_v40 = vpop.permute.xlu0 %1091 }
 0x149   : > { %2011 = vrot.lane.b32.xlu1 %v4060_v39, %s2930_s8  ;;  %1162 = vst.msk [vmem:[#allocation3 + $0xd0] sm:$0xff] %vm1135_vm4, %v1092_v40  ;;  %v1772_v40 = vld [vmem:[#allocation2 + $0x151] sm:$0xff] }
 0x14a   : > { %1467 = vrot.lane.b32.xlu0 %v4059_v32, %s2927_s28  ;;  %v1564_v32 = vld [vmem:[#allocation2 + $0x98] sm:$0xff] }
 0x14b   : > { %v1090_v14 = vpop.permute.xlu1 %1089 }
 0x14c   : > { %1161 = vst.msk [vmem:[#allocation3 + $0xc8] sm:$0xff] %vm1135_vm4, %v1090_v14  ;;  %v1096_v53 = vpop.permute.xlu0 %1095 }
 0x14d   : > { %1435 = vrot.lane.b32.xlu1 %v4060_v39, %s2927_s28  ;;  %1164 = vst.msk [vmem:[#allocation3 + $0xe0] sm:$0xff] %vm1135_vm4, %v1096_v53  ;;  %v1756_v53 = vld [vmem:[#allocation2 + $0x91] sm:$0xff] }
 0x14e   : > { %1659 = vrot.lane.b32.xlu0 %v3241_v11, %s2928_s29 }
 0x14f   : > { %v1094_v41 = vpop.permute.xlu1 %1093 }
 0x150   : > { %1163 = vst.msk [vmem:[#allocation3 + $0xd8] sm:$0xff] %vm1135_vm4, %v1094_v41  ;;  %v1100_v42 = vpop.permute.xlu0 %1099 }
 0x151   : > { %1627 = vrot.lane.b32.xlu1 %v3171_v57, %s2928_s29  ;;  %1166 = vst.msk [vmem:[#allocation3 + $0xf0] sm:$0xff] %vm1135_vm4, %v1100_v42  ;;  %v1753_v57 = vld [vmem:[#allocation2 + $0x69] sm:$0xff] }
 0x152   : > { %1661 = vrot.lane.b32.xlu0 %v3246_v12, %s2928_s29 }
 0x153   : > { %v1098_v43 = vpop.permute.xlu1 %1097 }
 0x154   : > { %1165 = vst.msk [vmem:[#allocation3 + $0xe8] sm:$0xff] %vm1135_vm4, %v1098_v43  ;;  %v1233_v11 = vpop.permute.xlu0 %1232 }
 0x155   : > { %1629 = vrot.lane.b32.xlu1 %v3173_v58, %s2928_s29  ;;  %1329 = vst.msk [vmem:[#allocation3] sm:$0xff] %vm1328_vm6, %v1233_v11  ;;  %v1945_v58 = vld [vmem:[#allocation2 + $0x62] sm:$0xff]  ;;  %v1949_v11 = vld [vmem:[#allocation2 + $0x92] sm:$0xff] }
 0x156   : > { %1852 = vrot.lane.b32.xlu0 %v1768_v13, %s2929_s30 }
 0x157   : > { %v1102_v37 = vpop.permute.xlu1 %1101 }
 0x158   : > { %1167 = vst.msk [vmem:[#allocation3 + $0xf8] sm:$0xff] %vm1135_vm4, %v1102_v37  ;;  %v1237_v12 = vpop.permute.xlu0 %1236  ;;  %v1773_v37 = vld [vmem:[#allocation2 + $0x159] sm:$0xff] }
 0x159   : > { %1820 = vrot.lane.b32.xlu1 %v1752_v56, %s2929_s30  ;;  %1331 = vst.msk [vmem:[#allocation3 + $0x10] sm:$0xff] %vm1328_vm6, %v1237_v12 }
 0x15a   : > { %1822 = vrot.lane.b32.xlu0 %v1753_v57, %s2929_s30 }
 0x15b   : > { %v1235_v45 = vpop.permute.xlu1 %1234 }
 0x15c   : > { %1330 = vst.msk [vmem:[#allocation3 + $0x8] sm:$0xff] %vm1328_vm6, %v1235_v45  ;;  %v1241_v46 = vpop.permute.xlu0 %1240  ;;  %v1965_v45 = vld [vmem:[#allocation2 + $0x152] sm:$0xff] }
 0x15d   : > { %1276 = vrot.lane.b32.xlu1 %v1768_v13, %s2926_s27  ;;  %1333 = vst.msk [vmem:[#allocation3 + $0x20] sm:$0xff] %vm1328_vm6, %v1241_v46 }
 0x15e   : > { %2013 = vrot.lane.b32.xlu0 %v1945_v58, %s2930_s8 }
 0x15f   : > { %v1239_v6 = vpop.permute.xlu1 %1238 }
 0x160   : > { %1332 = vst.msk [vmem:[#allocation3 + $0x18] sm:$0xff] %vm1328_vm6, %v1239_v6  ;;  %v1245_v2 = vpop.permute.xlu0 %1244  ;;  %v1950_v6 = vld [vmem:[#allocation2 + $0x9a] sm:$0xff] }
 0x161   : > { %1854 = vrot.lane.b32.xlu1 %v1769_v51, %s2929_s30  ;;  %1335 = vst.msk [vmem:[#allocation3 + $0x30] sm:$0xff] %vm1328_vm6, %v1245_v2 }
 0x162   : > { %1278 = vrot.lane.b32.xlu0 %v1769_v51, %s2926_s27 }
 0x163   : > { %v1243_v50 = vpop.permute.xlu1 %1242 }
 0x164   : > { %1334 = vst.msk [vmem:[#allocation3 + $0x28] sm:$0xff] %vm1328_vm6, %v1243_v50  ;;  %v1249_v1 = vpop.permute.xlu0 %1248 }
 0x165   : > { %2045 = vrot.lane.b32.xlu1 %v4061_v7, %s2930_s8  ;;  %1337 = vst.msk [vmem:[#allocation3 + $0x40] sm:$0xff] %vm1328_vm6, %v1249_v1 }
 0x166   : > { %1469 = vrot.lane.b32.xlu0 %v4061_v7, %s2927_s28 }
 0x167   : > { %v1247_v52 = vpop.permute.xlu1 %1246 }
 0x168   : > { %1336 = vst.msk [vmem:[#allocation3 + $0x38] sm:$0xff] %vm1328_vm6, %v1247_v52  ;;  %v1253_v4 = vpop.permute.xlu0 %1252  ;;  %v1966_v52 = vld [vmem:[#allocation2 + $0x15a] sm:$0xff] }
 0x169   : > { %1437 = vrot.lane.b32.xlu1 %v1945_v58, %s2927_s28  ;;  %1339 = vst.msk [vmem:[#allocation3 + $0x50] sm:$0xff] %vm1328_vm6, %v1253_v4 }
 0x16a   : > { %2047 = vrot.lane.b32.xlu0 %v4062_v47, %s2930_s8 }
 0x16b   : > { %v1251_v10 = vpop.permute.xlu1 %1250 }
 0x16c   : > { %1338 = vst.msk [vmem:[#allocation3 + $0x48] sm:$0xff] %vm1328_vm6, %v1251_v10  ;;  %v1267_v5 = vpop.permute.xlu0 %1266 }
 0x16d   : > { %2015 = vrot.lane.b32.xlu1 %v1946_v3, %s2930_s8  ;;  %1346 = vst.msk [vmem:[#allocation3 + $0x88] sm:$0xff] %vm1328_vm6, %v1267_v5 }
 0x16e   : > { %1471 = vrot.lane.b32.xlu0 %v4062_v47, %s2927_s28 }
 0x16f   : > { %v1265_v34 = vpop.permute.xlu1 %1264 }
 0x170   : > { %1345 = vst.msk [vmem:[#allocation3 + $0x80] sm:$0xff] %vm1328_vm6, %v1265_v34  ;;  %v1458_v38 = vpop.permute.xlu0 %1457  ;;  %v1566_v34 = vld [vmem:[#allocation2 + $0xb0] sm:$0xff] }
 0x171   : > { %1439 = vrot.lane.b32.xlu1 %v1946_v3, %s2927_s28  ;;  %1538 = vst.msk [vmem:[#allocation3 + $0x80] sm:$0xff] %vm1521_vm7, %v1458_v38  ;;  %v1565_v3 = vld [vmem:[#allocation2 + $0xa8] sm:$0xff] }
 0x172   : > { %1663 = vrot.lane.b32.xlu0 %v3254_v15, %s2928_s29 }
 0x173   : > { %v1426_v49 = vpop.permute.xlu1 %1425 }
 0x174   : > { %1522 = vst.msk [vmem:[#allocation3] sm:$0xff] %vm1521_vm7, %v1426_v49  ;;  %v1460_v33 = vpop.permute.xlu0 %1459  ;;  %v1581_v49 = vld [vmem:[#allocation2 + $0x168] sm:$0xff] }
 0x175   : > { %1631 = vrot.lane.b32.xlu1 %v3175_v59, %s2928_s29  ;;  %1539 = vst.msk [vmem:[#allocation3 + $0x88] sm:$0xff] %vm1521_vm7, %v1460_v33  ;;  %v1755_v59 = vld [vmem:[#allocation2 + $0x81] sm:$0xff] }
 0x176   : > { %1665 = vrot.lane.b32.xlu0 %v3260_v16, %s2928_s29 }
 0x177   : > { %v1428_v17 = vpop.permute.xlu1 %1427 }
 0x178   : > { %1523 = vst.msk [vmem:[#allocation3 + $0x8] sm:$0xff] %vm1521_vm7, %v1428_v17  ;;  %v1652_v15 = vpop.permute.xlu0 %1651  ;;  %v1758_v17 = vld [vmem:[#allocation2 + $0xa9] sm:$0xff] }
 0x179   : > { %1633 = vrot.lane.b32.xlu1 %v3184_v60, %s2928_s29  ;;  %1732 = vst.msk [vmem:[#allocation3 + $0x80] sm:$0xff] %vm1715_vm8, %v1652_v15  ;;  %v1947_v60 = vld [vmem:[#allocation2 + $0x7a] sm:$0xff] }
 0x17a   : > { %1856 = vrot.lane.b32.xlu0 %v1770_v29, %s2929_s30 }
 0x17b   : > { %v1620_v44 = vpop.permute.xlu1 %1619 }
 0x17c   : > { %1716 = vst.msk [vmem:[#allocation3] sm:$0xff] %vm1715_vm8, %v1620_v44  ;;  %v1654_v16 = vpop.permute.xlu0 %1653 }
 0x17d   : > { %1824 = vrot.lane.b32.xlu1 %v1754_v36, %s2929_s30  ;;  %1733 = vst.msk [vmem:[#allocation3 + $0x88] sm:$0xff] %vm1715_vm8, %v1654_v16  ;;  %v1582_v36 = vld [vmem:[#allocation2 + $0x170] sm:$0xff] }
 0x17e   : > { %1826 = vrot.lane.b32.xlu0 %v1755_v59, %s2929_s30 }
 0x17f   : > { %v1622_v35 = vpop.permute.xlu1 %1621 }
 0x180   : > { %1717 = vst.msk [vmem:[#allocation3 + $0x8] sm:$0xff] %vm1715_vm8, %v1622_v35  ;;  %v1845_v48 = vpop.permute.xlu0 %1844  ;;  %v1774_v35 = vld [vmem:[#allocation2 + $0x169] sm:$0xff] }
 0x181   : > { %1280 = vrot.lane.b32.xlu1 %v1770_v29, %s2926_s27  ;;  %1925 = vst.msk [vmem:[#allocation3 + $0x80] sm:$0xff] %vm1908_vm9, %v1845_v48  ;;  %v1759_v48 = vld [vmem:[#allocation2 + $0xb1] sm:$0xff] }
 0x182   : > { %2017 = vrot.lane.b32.xlu0 %v1947_v60, %s2930_s8 }
 0x183   : > { %v1813_v18 = vpop.permute.xlu1 %1812 }
 0x184   : > { %1909 = vst.msk [vmem:[#allocation3] sm:$0xff] %vm1908_vm9, %v1813_v18  ;;  %v1815_v21 = vpop.permute.xlu0 %1814 }
 0x185   : > { %1858 = vrot.lane.b32.xlu1 %v1771_v22, %s2929_s30  ;;  %1910 = vst.msk [vmem:[#allocation3 + $0x8] sm:$0xff] %vm1908_vm9, %v1815_v21  ;;  %v1951_v21 = vld [vmem:[#allocation2 + $0xaa] sm:$0xff] }
 0x186   : > { %1282 = vrot.lane.b32.xlu0 %v1771_v22, %s2926_s27 }
 0x187   : > { %v1269_v23 = vpop.permute.xlu1 %1268 }
 0x188   : > { %1347 = vst.msk [vmem:[#allocation3 + $0x90] sm:$0xff] %vm1328_vm6, %v1269_v23  ;;  %v2006_v8 = vpop.permute.xlu0 %2005  ;;  %v1775_v23 = vld [vmem:[#allocation2 + $0x171] sm:$0xff] }
 0x189   : > { %2049 = vrot.lane.b32.xlu1 %v1963_v63, %s2930_s8  ;;  %2102 = vst.msk [vmem:[#allocation3] sm:$0xff] %vm2101_vm10, %v2006_v8 }
 0x18a   : > { %1473 = vrot.lane.b32.xlu0 %v1963_v63, %s2927_s28 }
 0x18b   : > { %v1847_v61 = vpop.permute.xlu1 %1846 }
 0x18c   : > { %1926 = vst.msk [vmem:[#allocation3 + $0x88] sm:$0xff] %vm1908_vm9, %v1847_v61  ;;  %v1271_v28 = vpop.permute.xlu0 %1270 }
 0x18d   : > { %1441 = vrot.lane.b32.xlu1 %v1947_v60, %s2927_s28  ;;  %1348 = vst.msk [vmem:[#allocation3 + $0x98] sm:$0xff] %vm1328_vm6, %v1271_v28 }
 0x18e   : > { %2051 = vrot.lane.b32.xlu0 %v1964_v54, %s2930_s8 }
 0x18f   : > { %v2038_v55 = vpop.permute.xlu1 %2037 }
 0x190   : > { %2118 = vst.msk [vmem:[#allocation3 + $0x80] sm:$0xff] %vm2101_vm10, %v2038_v55  ;;  %v1462_v0 = vpop.permute.xlu0 %1461  ;;  %v2134_v24 = vld [vmem:[#allocation3] sm:$0xff] }
 0x191   : > { %2019 = vrot.lane.b32.xlu1 %v1948_v9, %s2930_s8  ;;  %1540 = vst.msk [vmem:[#allocation3 + $0x90] sm:$0xff] %vm1521_vm7, %v1462_v0  ;;  %2807 = vmatprep.mubr.msk.f32.mxu0 %vm2178_vm11, %v2134_v24  ;;  %v1952_v0 = vld [vmem:[#allocation2 + $0xb2] sm:$0xff] }
 0x192   : > { %1475 = vrot.lane.b32.xlu0 %v1964_v54, %s2927_s28  ;;  %v1967_v54 = vld [vmem:[#allocation2 + $0x16a] sm:$0xff] }
 0x193   : > { %v1430_v25 = vpop.permute.xlu1 %1429 }
 0x194   : > { %1524 = vst.msk [vmem:[#allocation3 + $0x10] sm:$0xff] %vm1521_vm7, %v1430_v25  ;;  %v2040_v62 = vpop.permute.xlu0 %2039 }
 0x195   : > { %1443 = vrot.lane.b32.xlu1 %v1948_v9, %s2927_s28  ;;  %2119 = vst.msk [vmem:[#allocation3 + $0x88] sm:$0xff] %vm2101_vm10, %v2040_v62 }
 0x196   : > { %1667 = vrot.lane.b32.xlu0 %v3267_v19, %s2928_s29 }
 0x197   : > { %v2008_v27 = vpop.permute.xlu1 %2007  ;;  %v2150_v30 = vld [vmem:[#allocation3 + $0x80] sm:$0xff] }
 0x198   : > { %2103 = vst.msk [vmem:[#allocation3 + $0x8] sm:$0xff] %vm2101_vm10, %v2008_v27  ;;  %2831 = vmatprep.mubr.msk.f32.mxu1 %vm2178_vm11, %v2150_v30  ;;  %v1464_v31 = vpop.permute.xlu0 %1463  ;;  %v1968_v27 = vld [vmem:[#allocation2 + $0x172] sm:$0xff] }
 0x199   : > { %1635 = vrot.lane.b32.xlu1 %v1563_v26, %s2928_s29  ;;  %1541 = vst.msk [vmem:[#allocation3 + $0x98] sm:$0xff] %vm1521_vm7, %v1464_v31 }
 0x19a   : > { %1669 = vrot.lane.b32.xlu0 %v3273_v20, %s2928_s29  ;;  %v1757_v20 = vld [vmem:[#allocation2 + $0x99] sm:$0xff] }
 0x19b   : > { %v1432_v39 = vpop.permute.xlu1 %1431 }
 0x19c   : > { %1525 = vst.msk [vmem:[#allocation3 + $0x18] sm:$0xff] %vm1521_vm7, %v1432_v39  ;;  %v1656_v19 = vpop.permute.xlu0 %1655  ;;  %v2151_v14 = vld [vmem:[#allocation3 + $0x88] sm:$0xff] }
 0x19d   : > { %1637 = vrot.lane.b32.xlu1 %v1564_v32, %s2928_s29  ;;  %1734 = vst.msk [vmem:[#allocation3 + $0x90] sm:$0xff] %vm1715_vm8, %v1656_v19  ;;  %2832 = vmatmul.mubr.msk.f32.vlgmr.msra.gmra.mxu1 %vm2178_vm11, %v2151_v14  ;;  %v1567_v32 = vld [vmem:[#allocation2 + $0xc0] sm:$0xff]  ;;  %v1568_v19 = vld [vmem:[#allocation2 + $0xc8] sm:$0xff] }
 0x19e   : > { %1860 = vrot.lane.b32.xlu0 %v1772_v40, %s2929_s30 }
 0x19f   : > { %v1624_v41 = vpop.permute.xlu1 %1623  ;;  %v2135_v42 = vld [vmem:[#allocation3 + $0x8] sm:$0xff] }
 0x1a0   : > { %1718 = vst.msk [vmem:[#allocation3 + $0x10] sm:$0xff] %vm1715_vm8, %v1624_v41  ;;  %2808 = vmatmul.mubr.msk.f32.vlgmr.msra.gmra.mxu0 %vm2178_vm11, %v2135_v42  ;;  %v1658_v43 = vpop.permute.xlu0 %1657  ;;  %v1583_v41 = vld [vmem:[#allocation2 + $0x180] sm:$0xff] }
 0x1a1   : > { %1828 = vrot.lane.b32.xlu1 %v1756_v53, %s2929_s30  ;;  %1735 = vst.msk [vmem:[#allocation3 + $0x98] sm:$0xff] %vm1715_vm8, %v1658_v43  ;;  %v1760_v43 = vld [vmem:[#allocation2 + $0xc1] sm:$0xff] }
 0x1a2   : > { %1830 = vrot.lane.b32.xlu0 %v1757_v20, %s2929_s30 }
 0x1a3   : > { %v1626_v13 = vpop.permute.xlu1 %1625 }
 0x1a4   : > { %1719 = vst.msk [vmem:[#allocation3 + $0x18] sm:$0xff] %vm1715_vm8, %v1626_v13  ;;  %v1849_v56 = vpop.permute.xlu0 %1848 }
 0x1a5   : > { %1284 = vrot.lane.b32.xlu1 %v1772_v40, %s2926_s27  ;;  %1927 = vst.msk [vmem:[#allocation3 + $0x90] sm:$0xff] %vm1908_vm9, %v1849_v56 }
 0x1a6   : > { %2021 = vrot.lane.b32.xlu0 %v1949_v11, %s2930_s8 }
 0x1a7   : > { %v1817_v57 = vpop.permute.xlu1 %1816 }
 0x1a8   : > { %1911 = vst.msk [vmem:[#allocation3 + $0x10] sm:$0xff] %vm1908_vm9, %v1817_v57  ;;  %v1819_v12 = vpop.permute.xlu0 %1818  ;;  %v1776_v57 = vld [vmem:[#allocation2 + $0x181] sm:$0xff] }
 0x1a9   : > { %1862 = vrot.lane.b32.xlu1 %v1773_v37, %s2929_s30  ;;  %1912 = vst.msk [vmem:[#allocation3 + $0x18] sm:$0xff] %vm1908_vm9, %v1819_v12 }
 0x1aa   : > { %1254 = vrot.lane.b32.xlu0 %v1757_v20, %s2926_s27 }
 0x1ab   : > { %v1273_v58 = vpop.permute.xlu1 %1272 }
 0x1ac   : > { %1349 = vst.msk [vmem:[#allocation3 + $0xa0] sm:$0xff] %vm1328_vm6, %v1273_v58  ;;  %v2010_v46 = vpop.permute.xlu0 %2009 }
 0x1ad   : > { %2053 = vrot.lane.b32.xlu1 %v1965_v45, %s2930_s8  ;;  %2104 = vst.msk [vmem:[#allocation3 + $0x10] sm:$0xff] %vm2101_vm10, %v2010_v46 }
 0x1ae   : > { %1445 = vrot.lane.b32.xlu0 %v1949_v11, %s2927_s28  ;;  %v1584_v11 = vld [vmem:[#allocation2 + $0x188] sm:$0xff] }
 0x1af   : > { %v1851_v51 = vpop.permute.xlu1 %1850 }
 0x1b0   : > { %1928 = vst.msk [vmem:[#allocation3 + $0x98] sm:$0xff] %vm1908_vm9, %v1851_v51  ;;  %v1275_v2 = vpop.permute.xlu0 %1274  ;;  %v1953_v51 = vld [vmem:[#allocation2 + $0xc2] sm:$0xff] }
 0x1b1   : > { %1286 = vrot.lane.b32.xlu1 %v1773_v37, %s2926_s27  ;;  %1350 = vst.msk [vmem:[#allocation3 + $0xa8] sm:$0xff] %vm1328_vm6, %v1275_v2  ;;  %v1777_v2 = vld [vmem:[#allocation2 + $0x189] sm:$0xff] }
 0x1b2   : > { %2023 = vrot.lane.b32.xlu0 %v1950_v6, %s2930_s8 }
 0x1b3   : > { %v2042_v50 = vpop.permute.xlu1 %2041 }
 0x1b4   : > { %2120 = vst.msk [vmem:[#allocation3 + $0x90] sm:$0xff] %vm2101_vm10, %v2042_v50  ;;  %v1466_v7 = vpop.permute.xlu0 %1465  ;;  %v2136_v1 = vld [vmem:[#allocation3 + $0x10] sm:$0xff] }
 0x1b5   : > { %1477 = vrot.lane.b32.xlu1 %v1965_v45, %s2927_s28  ;;  %1542 = vst.msk [vmem:[#allocation3 + $0xa0] sm:$0xff] %vm1521_vm7, %v1466_v7  ;;  %2810 = vmatprep.mubr.msk.f32.mxu0 %vm2178_vm11, %v2136_v1  ;;  %v1761_v45 = vld [vmem:[#allocation2 + $0xc9] sm:$0xff] }
 0x1b6   : > { %1447 = vrot.lane.b32.xlu0 %v1950_v6, %s2927_s28  ;;  %v1969_v1 = vld [vmem:[#allocation2 + $0x182] sm:$0xff] }
 0x1b7   : > { %v1434_v4 = vpop.permute.xlu1 %1433 }
 0x1b8   : > { %1526 = vst.msk [vmem:[#allocation3 + $0x20] sm:$0xff] %vm1521_vm7, %v1434_v4  ;;  %v2044_v10 = vpop.permute.xlu0 %2043 }
 0x1b9   : > { %2055 = vrot.lane.b32.xlu1 %v1966_v52, %s2930_s8  ;;  %2121 = vst.msk [vmem:[#allocation3 + $0x98] sm:$0xff] %vm2101_vm10, %v2044_v10 }
 0x1ba   : > { %1639 = vrot.lane.b32.xlu0 %v1565_v3, %s2928_s29 }
 0x1bb   : > { %v2012_v47 = vpop.permute.xlu1 %2011  ;;  %v2152_v5 = vld [vmem:[#allocation3 + $0x90] sm:$0xff] }
 0x1bc   : > { %2105 = vst.msk [vmem:[#allocation3 + $0x18] sm:$0xff] %vm2101_vm10, %v2012_v47  ;;  %2834 = vmatprep.mubr.msk.f32.mxu1 %vm2178_vm11, %v2152_v5  ;;  %v1468_v38 = vpop.permute.xlu0 %1467  ;;  %v1954_v47 = vld [vmem:[#allocation2 + $0xca] sm:$0xff] }
 0x1bd   : > { %1479 = vrot.lane.b32.xlu1 %v1966_v52, %s2927_s28  ;;  %1543 = vst.msk [vmem:[#allocation3 + $0xa8] sm:$0xff] %vm1521_vm7, %v1468_v38 }
 0x1be   : > { %1641 = vrot.lane.b32.xlu0 %v1566_v34, %s2928_s29 }
 0x1bf   : > { %v1436_v33 = vpop.permute.xlu1 %1435 }
 0x1c0   : > { %1527 = vst.msk [vmem:[#allocation3 + $0x28] sm:$0xff] %vm1521_vm7, %v1436_v33  ;;  %v1660_v29 = vpop.permute.xlu0 %1659  ;;  %v2153_v15 = vld [vmem:[#allocation3 + $0x98] sm:$0xff] }
 0x1c1   : > { %1671 = vrot.lane.b32.xlu1 %v1581_v49, %s2928_s29  ;;  %1736 = vst.msk [vmem:[#allocation3 + $0xa0] sm:$0xff] %vm1715_vm8, %v1660_v29  ;;  %2835 = vmatmul.mubr.msk.f32.gmra.mxu1 %vm2178_vm11, %v2153_v15  ;;  %v1970_v33 = vld [vmem:[#allocation2 + $0x18a] sm:$0xff]  ;;  %v1569_v29 = vld [vmem:[#allocation2 + $0xd8] sm:$0xff] }
 0x1c2   : > { %1832 = vrot.lane.b32.xlu0 %v1758_v17, %s2929_s30 }
 0x1c3   : > { %v1628_v44 = vpop.permute.xlu1 %1627  ;;  %v2137_v59 = vld [vmem:[#allocation3 + $0x18] sm:$0xff] }
 0x1c4   : > { %1720 = vst.msk [vmem:[#allocation3 + $0x20] sm:$0xff] %vm1715_vm8, %v1628_v44  ;;  %2811 = vmatmul.mubr.msk.f32.gmra.mxu0 %vm2178_vm11, %v2137_v59  ;;  %v1662_v16 = vpop.permute.xlu0 %1661 }
 0x1c5   : > { %1673 = vrot.lane.b32.xlu1 %v1582_v36, %s2928_s29  ;;  %1737 = vst.msk [vmem:[#allocation3 + $0xa8] sm:$0xff] %vm1715_vm8, %v1662_v16  ;;  %v1570_v16 = vld [vmem:[#allocation2 + $0xe0] sm:$0xff] }
 0x1c6   : > { %1256 = vrot.lane.b32.xlu0 %v1758_v17, %s2926_s27 }
 0x1c7   : > { %v1630_v60 = vpop.permute.xlu1 %1629 }
 0x1c8   : > { %1721 = vst.msk [vmem:[#allocation3 + $0x28] sm:$0xff] %vm1715_vm8, %v1630_v60  ;;  %v1853_v22 = vpop.permute.xlu0 %1852  ;;  %v1585_v60 = vld [vmem:[#allocation2 + $0x198] sm:$0xff] }
 0x1c9   : > { %1864 = vrot.lane.b32.xlu1 %v1774_v35, %s2929_s30  ;;  %1929 = vst.msk [vmem:[#allocation3 + $0xa0] sm:$0xff] %vm1908_vm9, %v1853_v22  ;;  %v1762_v22 = vld [vmem:[#allocation2 + $0xd9] sm:$0xff] }
 0x1ca   : > { %1834 = vrot.lane.b32.xlu0 %v1759_v48, %s2929_s30 }
 0x1cb   : > { %v1821_v18 = vpop.permute.xlu1 %1820 }
 0x1cc   : > { %1913 = vst.msk [vmem:[#allocation3 + $0x20] sm:$0xff] %vm1908_vm9, %v1821_v18  ;;  %v1823_v63 = vpop.permute.xlu0 %1822 }
 0x1cd   : > { %1288 = vrot.lane.b32.xlu1 %v1774_v35, %s2926_s27  ;;  %1914 = vst.msk [vmem:[#allocation3 + $0x28] sm:$0xff] %vm1908_vm9, %v1823_v63 }
 0x1ce   : > { %2025 = vrot.lane.b32.xlu0 %v1951_v21, %s2930_s8 }
 0x1cf   : > { %v1277_v8 = vpop.permute.xlu1 %1276 }
 0x1d0   : > { %1351 = vst.msk [vmem:[#allocation3 + $0xb0] sm:$0xff] %vm1328_vm6, %v1277_v8  ;;  %v2014_v61 = vpop.permute.xlu0 %2013 }
 0x1d1   : > { %1866 = vrot.lane.b32.xlu1 %v1775_v23, %s2929_s30  ;;  %2106 = vst.msk [vmem:[#allocation3 + $0x20] sm:$0xff] %vm2101_vm10, %v2014_v61  ;;  %v1778_v61 = vld [vmem:[#allocation2 + $0x199] sm:$0xff] }
 0x1d2   : > { %1258 = vrot.lane.b32.xlu0 %v1759_v48, %s2926_s27 }
 0x1d3   : > { %v1855_v28 = vpop.permute.xlu1 %1854 }
 0x1d4   : > { %1930 = vst.msk [vmem:[#allocation3 + $0xa8] sm:$0xff] %vm1908_vm9, %v1855_v28  ;;  %v1279_v9 = vpop.permute.xlu0 %1278  ;;  %v1955_v28 = vld [vmem:[#allocation2 + $0xda] sm:$0xff] }
 0x1d5   : > { %2057 = vrot.lane.b32.xlu1 %v1967_v54, %s2930_s8  ;;  %1352 = vst.msk [vmem:[#allocation3 + $0xb8] sm:$0xff] %vm1328_vm6, %v1279_v9 }
 0x1d6   : > { %1449 = vrot.lane.b32.xlu0 %v1951_v21, %s2927_s28  ;;  %v1586_v21 = vld [vmem:[#allocation2 + $0x1a0] sm:$0xff] }
 0x1d7   : > { %v2046_v55 = vpop.permute.xlu1 %2045 }
 0x1d8   : > { %2122 = vst.msk [vmem:[#allocation3 + $0xa0] sm:$0xff] %vm2101_vm10, %v2046_v55  ;;  %v1470_v24 = vpop.permute.xlu0 %1469  ;;  %v2138_v25 = vld [vmem:[#allocation3 + $0x20] sm:$0xff]  ;;  %v1779_v55 = vld [vmem:[#allocation2 + $0x1a1] sm:$0xff] }
 0x1d9   : > { %1290 = vrot.lane.b32.xlu1 %v1775_v23, %s2926_s27  ;;  %1544 = vst.msk [vmem:[#allocation3 + $0xb0] sm:$0xff] %vm1521_vm7, %v1470_v24  ;;  %2813 = vmatprep.mubr.msk.f32.mxu0 %vm2178_vm11, %v2138_v25  ;;  %v1763_v23 = vld [vmem:[#allocation2 + $0xe1] sm:$0xff] }
 0x1da   : > { %2027 = vrot.lane.b32.xlu0 %v1952_v0, %s2930_s8  ;;  %v1956_v24 = vld [vmem:[#allocation2 + $0xe2] sm:$0xff] }
 0x1db   : > { %v1438_v62 = vpop.permute.xlu1 %1437 }
 0x1dc   : > { %1528 = vst.msk [vmem:[#allocation3 + $0x30] sm:$0xff] %vm1521_vm7, %v1438_v62  ;;  %v2048_v26 = vpop.permute.xlu0 %2047  ;;  %v1971_v62 = vld [vmem:[#allocation2 + $0x19a] sm:$0xff] }
 0x1dd   : > { %1481 = vrot.lane.b32.xlu1 %v1967_v54, %s2927_s28  ;;  %2123 = vst.msk [vmem:[#allocation3 + $0xa8] sm:$0xff] %vm2101_vm10, %v2048_v26 }
 0x1de   : > { %1451 = vrot.lane.b32.xlu0 %v1952_v0, %s2927_s28 }
 0x1df   : > { %v2016_v30 = vpop.permute.xlu1 %2015  ;;  %v2154_v31 = vld [vmem:[#allocation3 + $0xa0] sm:$0xff] }
 0x1e0   : > { %2107 = vst.msk [vmem:[#allocation3 + $0x28] sm:$0xff] %vm2101_vm10, %v2016_v30  ;;  %2837 = vmatprep.mubr.msk.f32.mxu1 %vm2178_vm11, %v2154_v31  ;;  %v1472_v39 = vpop.permute.xlu0 %1471  ;;  %v1972_v31 = vld [vmem:[#allocation2 + $0x1a2] sm:$0xff] }
 0x1e1   : > { %2059 = vrot.lane.b32.xlu1 %v1968_v27, %s2930_s8  ;;  %1545 = vst.msk [vmem:[#allocation3 + $0xb8] sm:$0xff] %vm1521_vm7, %v1472_v39 }
 0x1e2   : > { %1643 = vrot.lane.b32.xlu0 %v1567_v32, %s2928_s29 }
 0x1e3   : > { %v1440_v40 = vpop.permute.xlu1 %1439 }
 0x1e4   : > { %1529 = vst.msk [vmem:[#allocation3 + $0x38] sm:$0xff] %vm1521_vm7, %v1440_v40  ;;  %v1664_v14 = vpop.permute.xlu0 %1663  ;;  %v2155_v53 = vld [vmem:[#allocation3 + $0xa8] sm:$0xff] }
 0x1e5   : > { %1483 = vrot.lane.b32.xlu1 %v1968_v27, %s2927_s28  ;;  %1738 = vst.msk [vmem:[#allocation3 + $0xb0] sm:$0xff] %vm1715_vm8, %v1664_v14  ;;  %2838 = vmatmul.mubr.msk.f32.gmra.mxu1 %vm2178_vm11, %v2155_v53 }
 0x1e6   : > { %1645 = vrot.lane.b32.xlu0 %v1568_v19, %s2928_s29 }
 0x1e7   : > { %v1632_v42 = vpop.permute.xlu1 %1631  ;;  %v2139_v20 = vld [vmem:[#allocation3 + $0x28] sm:$0xff] }
 0x1e8   : > { %1722 = vst.msk [vmem:[#allocation3 + $0x30] sm:$0xff] %vm1715_vm8, %v1632_v42  ;;  %2814 = vmatmul.mubr.msk.f32.gmra.mxu0 %vm2178_vm11, %v2139_v20  ;;  %v1666_v13 = vpop.permute.xlu0 %1665 }
 0x1e9   : > { %1675 = vrot.lane.b32.xlu1 %v1583_v41, %s2928_s29  ;;  %1739 = vst.msk [vmem:[#allocation3 + $0xb8] sm:$0xff] %vm1715_vm8, %v1666_v13 }
 0x1ea   : > { %1836 = vrot.lane.b32.xlu0 %v1760_v43, %s2929_s30 }
 0x1eb   : > { %v1634_v56 = vpop.permute.xlu1 %1633 }
 0x1ec   : > { %1723 = vst.msk [vmem:[#allocation3 + $0x38] sm:$0xff] %vm1715_vm8, %v1634_v56  ;;  %v1857_v37 = vpop.permute.xlu0 %1856 }
 0x1ed   : > { %1677 = vrot.lane.b32.xlu1 %v1584_v11, %s2928_s29  ;;  %1931 = vst.msk [vmem:[#allocation3 + $0xb0] sm:$0xff] %vm1908_vm9, %v1857_v37 }
 0x1ee   : > { %1260 = vrot.lane.b32.xlu0 %v1760_v43, %s2926_s27 }
 0x1ef   : > { %v1825_v12 = vpop.permute.xlu1 %1824 }
 0x1f0   : > { %1915 = vst.msk [vmem:[#allocation3 + $0x30] sm:$0xff] %vm1908_vm9, %v1825_v12  ;;  %v1827_v58 = vpop.permute.xlu0 %1826 }
 0x1f1   : > { %1868 = vrot.lane.b32.xlu1 %v1776_v57, %s2929_s30  ;;  %1916 = vst.msk [vmem:[#allocation3 + $0x38] sm:$0xff] %vm1908_vm9, %v1827_v58 }
 0x1f2   : > { %1838 = vrot.lane.b32.xlu0 %v1761_v45, %s2929_s30 }
 0x1f3   : > { %v1281_v46 = vpop.permute.xlu1 %1280 }
 0x1f4   : > { %1353 = vst.msk [vmem:[#allocation3 + $0xc0] sm:$0xff] %vm1328_vm6, %v1281_v46  ;;  %v2018_v6 = vpop.permute.xlu0 %2017 }
 0x1f5   : > { %1292 = vrot.lane.b32.xlu1 %v1776_v57, %s2926_s27  ;;  %2108 = vst.msk [vmem:[#allocation3 + $0x30] sm:$0xff] %vm2101_vm10, %v2018_v6 }
 0x1f6   : > { %2029 = vrot.lane.b32.xlu0 %v1953_v51, %s2930_s8 }
 0x1f7   : > { %v1859_v50 = vpop.permute.xlu1 %1858 }
 0x1f8   : > { %1932 = vst.msk [vmem:[#allocation3 + $0xb8] sm:$0xff] %vm1908_vm9, %v1859_v50  ;;  %v1283_v7 = vpop.permute.xlu0 %1282 }
 0x1f9   : > { %1870 = vrot.lane.b32.xlu1 %v1777_v2, %s2929_s30  ;;  %1354 = vst.msk [vmem:[#allocation3 + $0xc8] sm:$0xff] %vm1328_vm6, %v1283_v7 }
 0x1fa   : > { %1262 = vrot.lane.b32.xlu0 %v1761_v45, %s2926_s27 }
 0x1fb   : > { %v2050_v52 = vpop.permute.xlu1 %2049 }
 0x1fc   : > { %2124 = vst.msk [vmem:[#allocation3 + $0xb0] sm:$0xff] %vm2101_vm10, %v2050_v52  ;;  %v1474_v4 = vpop.permute.xlu0 %1473  ;;  %v2140_v3 = vld [vmem:[#allocation3 + $0x30] sm:$0xff] }
 0x1fd   : > { %2061 = vrot.lane.b32.xlu1 %v1969_v1, %s2930_s8  ;;  %1546 = vst.msk [vmem:[#allocation3 + $0xc0] sm:$0xff] %vm1521_vm7, %v1474_v4  ;;  %2816 = vmatprep.mubr.msk.f32.mxu0 %vm2178_vm11, %v2140_v3 }
 0x1fe   : > { %1453 = vrot.lane.b32.xlu0 %v1953_v51, %s2927_s28 }
 0x1ff   : > { %v1442_v10 = vpop.permute.xlu1 %1441 }
 0x200   : > { %1530 = vst.msk [vmem:[#allocation3 + $0x40] sm:$0xff] %vm1521_vm7, %v1442_v10  ;;  %v2052_v5 = vpop.permute.xlu0 %2051 }
 0x201   : > { %1294 = vrot.lane.b32.xlu1 %v1777_v2, %s2926_s27  ;;  %2125 = vst.msk [vmem:[#allocation3 + $0xb8] sm:$0xff] %vm2101_vm10, %v2052_v5 }
 0x202   : > { %2031 = vrot.lane.b32.xlu0 %v1954_v47, %s2930_s8 }
 0x203   : > { %v2020_v34 = vpop.permute.xlu1 %2019  ;;  %v2156_v38 = vld [vmem:[#allocation3 + $0xb0] sm:$0xff] }
 0x204   : > { %2109 = vst.msk [vmem:[#allocation3 + $0x38] sm:$0xff] %vm2101_vm10, %v2020_v34  ;;  %2840 = vmatprep.mubr.msk.f32.mxu1 %vm2178_vm11, %v2156_v38  ;;  %v1476_v49 = vpop.permute.xlu0 %1475 }
 0x205   : > { %1485 = vrot.lane.b32.xlu1 %v1969_v1, %s2927_s28  ;;  %1547 = vst.msk [vmem:[#allocation3 + $0xc8] sm:$0xff] %vm1521_vm7, %v1476_v49 }
 0x206   : > { %1455 = vrot.lane.b32.xlu0 %v1954_v47, %s2927_s28 }
 0x207   : > { %v1444_v17 = vpop.permute.xlu1 %1443 }
 0x208   : > { %1531 = vst.msk [vmem:[#allocation3 + $0x48] sm:$0xff] %vm1521_vm7, %v1444_v17  ;;  %v1668_v15 = vpop.permute.xlu0 %1667  ;;  %v2157_v36 = vld [vmem:[#allocation3 + $0xb8] sm:$0xff] }
 0x209   : > { %2063 = vrot.lane.b32.xlu1 %v1970_v33, %s2930_s8  ;;  %1740 = vst.msk [vmem:[#allocation3 + $0xc0] sm:$0xff] %vm1715_vm8, %v1668_v15  ;;  %2841 = vmatmul.mubr.msk.f32.gmra.mxu1 %vm2178_vm11, %v2157_v36  ;;  %v3922_v15 = vld [vmem:[%s4045_s4] ss:$0 sm:$0xff] }
 0x20a   : > { %1647 = vrot.lane.b32.xlu0 %v1569_v29, %s2928_s29 }
 0x20b   : > { %v1636_v44 = vpop.permute.xlu1 %1635  ;;  %v2141_v59 = vld [vmem:[#allocation3 + $0x38] sm:$0xff] }
 0x20c   : > { %1724 = vst.msk [vmem:[#allocation3 + $0x40] sm:$0xff] %vm1715_vm8, %v1636_v44  ;;  %2817 = vmatmul.mubr.msk.f32.gmra.mxu0 %vm2178_vm11, %v2141_v59  ;;  %v1670_v35 = vpop.permute.xlu0 %1669 }
 0x20d   : > { %1487 = vrot.lane.b32.xlu1 %v1970_v33, %s2927_s28  ;;  %1741 = vst.msk [vmem:[#allocation3 + $0xc8] sm:$0xff] %vm1715_vm8, %v1670_v35 }
 0x20e   : > { %1649 = vrot.lane.b32.xlu0 %v1570_v16, %s2928_s29 }
 0x20f   : > { %v1638_v48 = vpop.permute.xlu1 %1637 }
 0x210   : > { %1725 = vst.msk [vmem:[#allocation3 + $0x48] sm:$0xff] %vm1715_vm8, %v1638_v48  ;;  %v1861_v18 = vpop.permute.xlu0 %1860 }
 0x211   : > { %1679 = vrot.lane.b32.xlu1 %v1585_v60, %s2928_s29  ;;  %1933 = vst.msk [vmem:[#allocation3 + $0xc0] sm:$0xff] %vm1908_vm9, %v1861_v18 }
 0x212   : > { %1840 = vrot.lane.b32.xlu0 %v1762_v22, %s2929_s30 }
 0x213   : > { %v1829_v63 = vpop.permute.xlu1 %1828 }
 0x214   : > { %1917 = vst.msk [vmem:[#allocation3 + $0x40] sm:$0xff] %vm1908_vm9, %v1829_v63  ;;  %v1831_v8 = vpop.permute.xlu0 %1830 }
 0x215   : > { %1681 = vrot.lane.b32.xlu1 %v1586_v21, %s2928_s29  ;;  %1918 = vst.msk [vmem:[#allocation3 + $0x48] sm:$0xff] %vm1908_vm9, %v1831_v8 }
 0x216   : > { %1842 = vrot.lane.b32.xlu0 %v1763_v23, %s2929_s30 }
 0x217   : > { %v1285_v54 = vpop.permute.xlu1 %1284 }
 0x218   : > { %1355 = vst.msk [vmem:[#allocation3 + $0xd0] sm:$0xff] %vm1328_vm6, %v1285_v54  ;;  %v2022_v9 = vpop.permute.xlu0 %2021 }
 0x219   : > { %1872 = vrot.lane.b32.xlu1 %v1778_v61, %s2929_s30  ;;  %2110 = vst.msk [vmem:[#allocation3 + $0x40] sm:$0xff] %vm2101_vm10, %v2022_v9 }
 0x21a   : > { %2033 = vrot.lane.b32.xlu0 %v1955_v28, %s2930_s8 }
 0x21b   : > { %v1863_v0 = vpop.permute.xlu1 %1862 }
 0x21c   : > { %1934 = vst.msk [vmem:[#allocation3 + $0xc8] sm:$0xff] %vm1908_vm9, %v1863_v0  ;;  %v1255_v25 = vpop.permute.xlu0 %1254 }
 0x21d   : > { %1874 = vrot.lane.b32.xlu1 %v1779_v55, %s2929_s30  ;;  %1340 = vst.msk [vmem:[#allocation3 + $0x58] sm:$0xff] %vm1328_vm6, %v1255_v25 }
 0x21e   : > { %2035 = vrot.lane.b32.xlu0 %v1956_v24, %s2930_s8 }
 0x21f   : > { %v2054_v26 = vpop.permute.xlu1 %2053 }
 0x220   : > { %2126 = vst.msk [vmem:[#allocation3 + $0xc0] sm:$0xff] %vm2101_vm10, %v2054_v26  ;;  %v1446_v27 = vpop.permute.xlu0 %1445  ;;  %v2142_v30 = vld [vmem:[#allocation3 + $0x40] sm:$0xff] }
 0x221   : > { %2065 = vrot.lane.b32.xlu1 %v1971_v62, %s2930_s8  ;;  %1532 = vst.msk [vmem:[#allocation3 + $0x50] sm:$0xff] %vm1521_vm7, %v1446_v27  ;;  %2819 = vmatprep.mubr.msk.f32.mxu0 %vm2178_vm11, %v2142_v30 }
 0x223   : > { %v1287_v32 = vpop.permute.xlu1 %1286 }
 0x224   : > { %1356 = vst.msk [vmem:[#allocation3 + $0xd8] sm:$0xff] %vm1328_vm6, %v1287_v32  ;;  %v2024_v39 = vpop.permute.xlu0 %2023 }
 0x225   : > { %2067 = vrot.lane.b32.xlu1 %v1972_v31, %s2930_s8  ;;  %2111 = vst.msk [vmem:[#allocation3 + $0x48] sm:$0xff] %vm2101_vm10, %v2024_v39 }
 0x227   : > { %v1478_v40 = vpop.permute.xlu1 %1477  ;;  %v2158_v19 = vld [vmem:[#allocation3 + $0xc0] sm:$0xff] }
 0x228   : > { %1548 = vst.msk [vmem:[#allocation3 + $0xd0] sm:$0xff] %vm1521_vm7, %v1478_v40  ;;  %2843 = vmatprep.mubr.msk.f32.mxu1 %vm2178_vm11, %v2158_v19  ;;  %v1448_v14 = vpop.permute.xlu0 %1447 }
 0x229   : > { %1533 = vst.msk [vmem:[#allocation3 + $0x58] sm:$0xff] %vm1521_vm7, %v1448_v14 }
 0x22b   : > { %v2056_v53 = vpop.permute.xlu1 %2055 }
 0x22c   : > { %2127 = vst.msk [vmem:[#allocation3 + $0xc8] sm:$0xff] %vm2101_vm10, %v2056_v53  ;;  %v1640_v41 = vpop.permute.xlu0 %1639  ;;  %v2143_v42 = vld [vmem:[#allocation3 + $0x48] sm:$0xff] }
 0x22d   : > { %1726 = vst.msk [vmem:[#allocation3 + $0x50] sm:$0xff] %vm1715_vm8, %v1640_v41  ;;  %2820 = vmatmul.mubr.msk.f32.gmra.mxu0 %vm2178_vm11, %v2143_v42 }
 0x22f   : > { %v1480_v20 = vpop.permute.xlu1 %1479 }
 0x230   : > { %1549 = vst.msk [vmem:[#allocation3 + $0xd8] sm:$0xff] %vm1521_vm7, %v1480_v20  ;;  %v1642_v43 = vpop.permute.xlu0 %1641 }
 0x231   : > { %1727 = vst.msk [vmem:[#allocation3 + $0x58] sm:$0xff] %vm1715_vm8, %v1642_v43 }
 0x233   : > { %v1672_v13 = vpop.permute.xlu1 %1671  ;;  %v2159_v11 = vld [vmem:[#allocation3 + $0xc8] sm:$0xff] }
 0x234   : > { %1742 = vst.msk [vmem:[#allocation3 + $0xd0] sm:$0xff] %vm1715_vm8, %v1672_v13  ;;  %2844 = vmatmul.mubr.msk.f32.gmra.mxu1 %vm2178_vm11, %v2159_v11  ;;  %v1833_v56 = vpop.permute.xlu0 %1832 }
 0x235   : > { %1919 = vst.msk [vmem:[#allocation3 + $0x50] sm:$0xff] %vm1908_vm9, %v1833_v56 }
 0x237   : > { %v1674_v37 = vpop.permute.xlu1 %1673 }
 0x238   : > { %1743 = vst.msk [vmem:[#allocation3 + $0xd8] sm:$0xff] %vm1715_vm8, %v1674_v37  ;;  %v1257_v57 = vpop.permute.xlu0 %1256 }
 0x239   : > { %1341 = vst.msk [vmem:[#allocation3 + $0x60] sm:$0xff] %vm1328_vm6, %v1257_v57 }
 0x23b   : > { %v1865_v12 = vpop.permute.xlu1 %1864 }
 0x23c   : > { %1935 = vst.msk [vmem:[#allocation3 + $0xd0] sm:$0xff] %vm1908_vm9, %v1865_v12  ;;  %v1835_v45 = vpop.permute.xlu0 %1834 }
 0x23d   : > { %1920 = vst.msk [vmem:[#allocation3 + $0x58] sm:$0xff] %vm1908_vm9, %v1835_v45 }
 0x23f   : > { %v1289_v58 = vpop.permute.xlu1 %1288 }
 0x240   : > { %1357 = vst.msk [vmem:[#allocation3 + $0xe0] sm:$0xff] %vm1328_vm6, %v1289_v58  ;;  %v2026_v46 = vpop.permute.xlu0 %2025 }
 0x241   : > { %2112 = vst.msk [vmem:[#allocation3 + $0x50] sm:$0xff] %vm2101_vm10, %v2026_v46 }
 0x243   : > { %v1867_v51 = vpop.permute.xlu1 %1866 }
 0x244   : > { %1936 = vst.msk [vmem:[#allocation3 + $0xd8] sm:$0xff] %vm1908_vm9, %v1867_v51  ;;  %v1259_v6 = vpop.permute.xlu0 %1258 }
 0x245   : > { %1342 = vst.msk [vmem:[#allocation3 + $0x68] sm:$0xff] %vm1328_vm6, %v1259_v6 }
 0x247   : > { %v2058_v2 = vpop.permute.xlu1 %2057 }
 0x248   : > { %2128 = vst.msk [vmem:[#allocation3 + $0xd0] sm:$0xff] %vm2101_vm10, %v2058_v2  ;;  %v1450_v50 = vpop.permute.xlu0 %1449  ;;  %v2144_v7 = vld [vmem:[#allocation3 + $0x50] sm:$0xff] }
 0x249   : > { %1534 = vst.msk [vmem:[#allocation3 + $0x60] sm:$0xff] %vm1521_vm7, %v1450_v50  ;;  %2822 = vmatprep.mubr.msk.f32.mxu0 %vm2178_vm11, %v2144_v7 }
 0x24b   : > { %v1291_v1 = vpop.permute.xlu1 %1290 }
 0x24c   : > { %1358 = vst.msk [vmem:[#allocation3 + $0xe8] sm:$0xff] %vm1328_vm6, %v1291_v1  ;;  %v2028_v52 = vpop.permute.xlu0 %2027 }
 0x24d   : > { %2113 = vst.msk [vmem:[#allocation3 + $0x58] sm:$0xff] %vm2101_vm10, %v2028_v52 }
 0x24f   : > { %v1482_v4 = vpop.permute.xlu1 %1481  ;;  %v2160_v3 = vld [vmem:[#allocation3 + $0xd0] sm:$0xff] }
 0x250   : > { %1550 = vst.msk [vmem:[#allocation3 + $0xe0] sm:$0xff] %vm1521_vm7, %v1482_v4  ;;  %2846 = vmatprep.mubr.msk.f32.mxu1 %vm2178_vm11, %v2160_v3  ;;  %v1452_v10 = vpop.permute.xlu0 %1451 }
 0x251   : > { %1535 = vst.msk [vmem:[#allocation3 + $0x68] sm:$0xff] %vm1521_vm7, %v1452_v10 }
 0x253   : > { %v2060_v47 = vpop.permute.xlu1 %2059 }
 0x254   : > { %2129 = vst.msk [vmem:[#allocation3 + $0xd8] sm:$0xff] %vm2101_vm10, %v2060_v47  ;;  %v1644_v5 = vpop.permute.xlu0 %1643  ;;  %v2145_v34 = vld [vmem:[#allocation3 + $0x58] sm:$0xff] }
 0x255   : > { %1728 = vst.msk [vmem:[#allocation3 + $0x60] sm:$0xff] %vm1715_vm8, %v1644_v5  ;;  %2823 = vmatmul.mubr.msk.f32.gmra.mxu0 %vm2178_vm11, %v2145_v34 }
 0x257   : > { %v1484_v38 = vpop.permute.xlu1 %1483 }
 0x258   : > { %1551 = vst.msk [vmem:[#allocation3 + $0xe8] sm:$0xff] %vm1521_vm7, %v1484_v38  ;;  %v1646_v49 = vpop.permute.xlu0 %1645 }
 0x259   : > { %1729 = vst.msk [vmem:[#allocation3 + $0x68] sm:$0xff] %vm1715_vm8, %v1646_v49 }
 0x25b   : > { %v1676_v33 = vpop.permute.xlu1 %1675  ;;  %v2161_v17 = vld [vmem:[#allocation3 + $0xd8] sm:$0xff] }
 0x25c   : > { %1744 = vst.msk [vmem:[#allocation3 + $0xe0] sm:$0xff] %vm1715_vm8, %v1676_v33  ;;  %2847 = vmatmul.mubr.msk.f32.gmra.mxu1 %vm2178_vm11, %v2161_v17  ;;  %v1837_v29 = vpop.permute.xlu0 %1836 }
 0x25d   : > { %1921 = vst.msk [vmem:[#allocation3 + $0x60] sm:$0xff] %vm1908_vm9, %v1837_v29  ;;  %v2833_v36 = vpop.f32.mrf.mxu1 }
 0x25e   : > { %v2431_v59 = vadd.f32 %v2833_v36, %v3922_v15 }
 0x25f   : > { %v1678_v44 = vpop.permute.xlu1 %1677  ;;  %v2425_v35 = vpop.f32.mrf.mxu1 }
 0x260   : > { %1745 = vst.msk [vmem:[#allocation3 + $0xe8] sm:$0xff] %vm1715_vm8, %v1678_v44  ;;  %v2809_v16 = vpop.f32.mrf.mxu0  ;;  %v2521_v48 = vmax.f32 %v2431_v59, 0.0  ;;  %v2426_v22 = vadd.f32 %v3922_v15, %v2425_v35  ;;  %v1261_v18 = vpop.permute.xlu0 %1260 }
 0x261   : > { %v2351_v60 = vadd.f32 %v2809_v16, %v3922_v15  ;;  %1343 = vst.msk [vmem:[#allocation3 + $0x70] sm:$0xff] %vm1328_vm6, %v1261_v18 }
 0x262   : > { %v2345_v21 = vpop.f32.mrf.mxu0  ;;  %2553 = vst [vmem:[%s3934_s24 + $0x88] sm:$0xff] %v2521_v48  ;;  %v2520_v61 = vmax.f32 %v2426_v22, 0.0 }
 0x263   : > { %v2505_v63 = vmax.f32 %v2351_v60, 0.0  ;;  %v2346_v23 = vadd.f32 %v3922_v15, %v2345_v21  ;;  %v1869_v8 = vpop.permute.xlu1 %1868 }
 0x264   : > { %1937 = vst.msk [vmem:[#allocation3 + $0xe0] sm:$0xff] %vm1908_vm9, %v1869_v8  ;;  %2552 = vst [vmem:[%s3934_s24 + $0x80] sm:$0xff] %v2520_v61  ;;  %v1839_v28 = vpop.permute.xlu0 %1838 }
 0x265   : > { %2537 = vst [vmem:[%s3934_s24 + $0x8] sm:$0xff] %v2505_v63  ;;  %v2504_v54 = vmax.f32 %v2346_v23, 0.0  ;;  %1922 = vst.msk [vmem:[#allocation3 + $0x68] sm:$0xff] %vm1908_vm9, %v1839_v28 }
 0x267   : > { %2536 = vst [vmem:[%s3934_s24] sm:$0xff] %v2504_v54  ;;  %v1293_v9 = vpop.permute.xlu1 %1292 }
 0x268   : > { %1359 = vst.msk [vmem:[#allocation3 + $0xf0] sm:$0xff] %vm1328_vm6, %v1293_v9  ;;  %v2030_v55 = vpop.permute.xlu0 %2029 }
 0x269   : > { %2114 = vst.msk [vmem:[#allocation3 + $0x60] sm:$0xff] %vm2101_vm10, %v2030_v55 }
 0x26b   : > { %v1871_v0 = vpop.permute.xlu1 %1870 }
 0x26c   : > { %1938 = vst.msk [vmem:[#allocation3 + $0xe8] sm:$0xff] %vm1908_vm9, %v1871_v0  ;;  %v1263_v24 = vpop.permute.xlu0 %1262 }
 0x26d   : > { %1344 = vst.msk [vmem:[#allocation3 + $0x78] sm:$0xff] %vm1328_vm6, %v1263_v24 }
 0x26f   : > { %v2062_v25 = vpop.permute.xlu1 %2061 }
 0x270   : > { %2130 = vst.msk [vmem:[#allocation3 + $0xe0] sm:$0xff] %vm2101_vm10, %v2062_v25  ;;  %v1454_v62 = vpop.permute.xlu0 %1453  ;;  %v2146_v26 = vld [vmem:[#allocation3 + $0x60] sm:$0xff] }
 0x271   : > { %1536 = vst.msk [vmem:[#allocation3 + $0x70] sm:$0xff] %vm1521_vm7, %v1454_v62  ;;  %2825 = vmatprep.mubr.msk.f32.mxu0 %vm2178_vm11, %v2146_v26 }
 0x273   : > { %v1295_v27 = vpop.permute.xlu1 %1294 }
 0x274   : > { %1360 = vst.msk [vmem:[#allocation3 + $0xf8] sm:$0xff] %vm1328_vm6, %v1295_v27  ;;  %v2032_v30 = vpop.permute.xlu0 %2031 }
 0x275   : > { %2115 = vst.msk [vmem:[#allocation3 + $0x68] sm:$0xff] %vm2101_vm10, %v2032_v30 }
 0x277   : > { %v1486_v31 = vpop.permute.xlu1 %1485  ;;  %v2162_v32 = vld [vmem:[#allocation3 + $0xe0] sm:$0xff] }
 0x278   : > { %1552 = vst.msk [vmem:[#allocation3 + $0xf0] sm:$0xff] %vm1521_vm7, %v1486_v31  ;;  %2849 = vmatprep.mubr.msk.f32.mxu1 %vm2178_vm11, %v2162_v32  ;;  %v1456_v39 = vpop.permute.xlu0 %1455 }
 0x279   : > { %1537 = vst.msk [vmem:[#allocation3 + $0x78] sm:$0xff] %vm1521_vm7, %v1456_v39 }
 0x27b   : > { %v2064_v40 = vpop.permute.xlu1 %2063 }
 0x27c   : > { %2131 = vst.msk [vmem:[#allocation3 + $0xe8] sm:$0xff] %vm2101_vm10, %v2064_v40  ;;  %v1648_v19 = vpop.permute.xlu0 %1647  ;;  %v2147_v14 = vld [vmem:[#allocation3 + $0x68] sm:$0xff] }
 0x27d   : > { %1730 = vst.msk [vmem:[#allocation3 + $0x70] sm:$0xff] %vm1715_vm8, %v1648_v19  ;;  %2826 = vmatmul.mubr.msk.f32.gmra.mxu0 %vm2178_vm11, %v2147_v14 }
 0x27f   : > { %v1488_v53 = vpop.permute.xlu1 %1487 }
 0x280   : > { %1553 = vst.msk [vmem:[#allocation3 + $0xf8] sm:$0xff] %vm1521_vm7, %v1488_v53  ;;  %v1650_v41 = vpop.permute.xlu0 %1649 }
 0x281   : > { %1731 = vst.msk [vmem:[#allocation3 + $0x78] sm:$0xff] %vm1715_vm8, %v1650_v41  ;;  %v2836_v42 = vpop.f32.mrf.mxu1 }
 0x282   : > { %v2441_v13 = vadd.f32 %v2836_v42, %v3922_v15 }
 0x283   : > { %v1680_v20 = vpop.permute.xlu1 %1679  ;;  %v2163_v43 = vld [vmem:[#allocation3 + $0xe8] sm:$0xff]  ;;  %v2435_v56 = vpop.f32.mrf.mxu1 }
 0x284   : > { %1746 = vst.msk [vmem:[#allocation3 + $0xf0] sm:$0xff] %vm1715_vm8, %v1680_v20  ;;  %v2812_v11 = vpop.f32.mrf.mxu0  ;;  %2850 = vmatmul.mubr.msk.f32.gmra.mxu1 %vm2178_vm11, %v2163_v43  ;;  %v2523_v57 = vmax.f32 %v2441_v13, 0.0  ;;  %v2436_v12 = vadd.f32 %v3922_v15, %v2435_v56  ;;  %v1841_v45 = vpop.permute.xlu0 %1840 }
 0x285   : > { %v2361_v37 = vadd.f32 %v2812_v11, %v3922_v15  ;;  %1923 = vst.msk [vmem:[#allocation3 + $0x70] sm:$0xff] %vm1908_vm9, %v1841_v45 }
 0x286   : > { %v2355_v58 = vpop.f32.mrf.mxu0  ;;  %2555 = vst [vmem:[%s3934_s24 + $0x98] sm:$0xff] %v2523_v57  ;;  %v2522_v2 = vmax.f32 %v2436_v12, 0.0 }
 0x287   : > { %v2507_v46 = vmax.f32 %v2361_v37, 0.0  ;;  %v2356_v51 = vadd.f32 %v3922_v15, %v2355_v58  ;;  %v1682_v6 = vpop.permute.xlu1 %1681 }
 0x288   : > { %1747 = vst.msk [vmem:[#allocation3 + $0xf8] sm:$0xff] %vm1715_vm8, %v1682_v6  ;;  %2554 = vst [vmem:[%s3934_s24 + $0x90] sm:$0xff] %v2522_v2  ;;  %v1843_v7 = vpop.permute.xlu0 %1842 }
 0x289   : > { %2539 = vst [vmem:[%s3934_s24 + $0x18] sm:$0xff] %v2507_v46  ;;  %v2506_v50 = vmax.f32 %v2356_v51, 0.0  ;;  %1924 = vst.msk [vmem:[#allocation3 + $0x78] sm:$0xff] %vm1908_vm9, %v1843_v7 }
 0x28b   : > { %2538 = vst [vmem:[%s3934_s24 + $0x10] sm:$0xff] %v2506_v50  ;;  %v1873_v1 = vpop.permute.xlu1 %1872 }
 0x28c   : > { %1939 = vst.msk [vmem:[#allocation3 + $0xf0] sm:$0xff] %vm1908_vm9, %v1873_v1  ;;  %v2034_v52 = vpop.permute.xlu0 %2033 }
 0x28d   : > { %2116 = vst.msk [vmem:[#allocation3 + $0x70] sm:$0xff] %vm2101_vm10, %v2034_v52 }
 0x28f   : > { %v1875_v4 = vpop.permute.xlu1 %1874 }
 0x290   : > { %1940 = vst.msk [vmem:[#allocation3 + $0xf8] sm:$0xff] %vm1908_vm9, %v1875_v4  ;;  %v2036_v3 = vpop.permute.xlu0 %2035 }
 0x291   : > { %2117 = vst.msk [vmem:[#allocation3 + $0x78] sm:$0xff] %vm2101_vm10, %v2036_v3 }
 0x293   : > { %v2066_v10 = vpop.permute.xlu1 %2065 }
 0x294   : > { %2132 = vst.msk [vmem:[#allocation3 + $0xf0] sm:$0xff] %vm2101_vm10, %v2066_v10  ;;  %v2148_v47 = vld [vmem:[#allocation3 + $0x70] sm:$0xff] }
 0x295   : > { %2828 = vmatprep.mubr.msk.f32.mxu0 %vm2178_vm11, %v2148_v47 }
 0x297   : > { %v2068_v5 = vpop.permute.xlu1 %2067 }
 0x298   : > { %2133 = vst.msk [vmem:[#allocation3 + $0xf8] sm:$0xff] %vm2101_vm10, %v2068_v5  ;;  %v2149_v34 = vld [vmem:[#allocation3 + $0x78] sm:$0xff] }
 0x299   : > { %2829 = vmatmul.mubr.msk.f32.gmra.mxu0 %vm2178_vm11, %v2149_v34 }
 0x29b   : > { %v2164_v38 = vld [vmem:[#allocation3 + $0xf0] sm:$0xff] }
 0x29c   : > { %2852 = vmatprep.mubr.msk.f32.mxu1 %vm2178_vm11, %v2164_v38 }
 0x29f   : > { %v2165_v49 = vld [vmem:[#allocation3 + $0xf8] sm:$0xff] }
 0x2a0   : > { %2853 = vmatmul.mubr.msk.f32.gmra.mxu1 %vm2178_vm11, %v2165_v49 }
 0x2a5   : > { %v2839_v33 = vpop.f32.mrf.mxu1 }
 0x2a6   : > { %v2451_v17 = vadd.f32 %v2839_v33, %v3922_v15 }
 0x2a7   : > { %v2445_v36 = vpop.f32.mrf.mxu1 }
 0x2a8   : > { %v2815_v29 = vpop.f32.mrf.mxu0  ;;  %v2525_v59 = vmax.f32 %v2451_v17, 0.0  ;;  %v2446_v16 = vadd.f32 %v3922_v15, %v2445_v36 }
 0x2a9   : > { %v2371_v44 = vadd.f32 %v2815_v29, %v3922_v15 }
 0x2aa   : > { %v2365_v35 = vpop.f32.mrf.mxu0  ;;  %2557 = vst [vmem:[%s3934_s24 + $0xa8] sm:$0xff] %v2525_v59  ;;  %v2524_v22 = vmax.f32 %v2446_v16, 0.0 }
 0x2ab   : > { %v2509_v60 = vmax.f32 %v2371_v44, 0.0  ;;  %v2366_v48 = vadd.f32 %v3922_v15, %v2365_v35 }
 0x2ac   : > { %2556 = vst [vmem:[%s3934_s24 + $0xa0] sm:$0xff] %v2524_v22 }
 0x2ad   : > { %2541 = vst [vmem:[%s3934_s24 + $0x28] sm:$0xff] %v2509_v60  ;;  %v2508_v18 = vmax.f32 %v2366_v48, 0.0 }
 0x2af   : > { %2540 = vst [vmem:[%s3934_s24 + $0x20] sm:$0xff] %v2508_v18 }
 0x2c9   : > { %v2842_v21 = vpop.f32.mrf.mxu1 }
 0x2ca   : > { %v2461_v63 = vadd.f32 %v2842_v21, %v3922_v15 }
 0x2cb   : > { %v2455_v8 = vpop.f32.mrf.mxu1 }
 0x2cc   : > { %v2818_v23 = vpop.f32.mrf.mxu0  ;;  %v2527_v54 = vmax.f32 %v2461_v63, 0.0  ;;  %v2456_v28 = vadd.f32 %v3922_v15, %v2455_v8 }
 0x2cd   : > { %v2381_v61 = vadd.f32 %v2818_v23, %v3922_v15 }
 0x2ce   : > { %v2375_v9 = vpop.f32.mrf.mxu0  ;;  %2559 = vst [vmem:[%s3934_s24 + $0xb8] sm:$0xff] %v2527_v54  ;;  %v2526_v24 = vmax.f32 %v2456_v28, 0.0 }
 0x2cf   : > { %v2511_v55 = vmax.f32 %v2381_v61, 0.0  ;;  %v2376_v0 = vadd.f32 %v3922_v15, %v2375_v9 }
 0x2d0   : > { %2558 = vst [vmem:[%s3934_s24 + $0xb0] sm:$0xff] %v2526_v24 }
 0x2d1   : > { %2543 = vst [vmem:[%s3934_s24 + $0x38] sm:$0xff] %v2511_v55  ;;  %v2510_v25 = vmax.f32 %v2376_v0, 0.0 }
 0x2d3   : > { %2542 = vst [vmem:[%s3934_s24 + $0x30] sm:$0xff] %v2510_v25 }
 0x2ed   : > { %v2821_v62 = vpop.f32.mrf.mxu0 }
 0x2ee   : > { %v2391_v26 = vadd.f32 %v2821_v62, %v3922_v15 }
 0x2ef   : > { %v2385_v27 = vpop.f32.mrf.mxu0 }
 0x2f0   : > { %v2513_v30 = vmax.f32 %v2391_v26, 0.0  ;;  %v2386_v31 = vadd.f32 %v3922_v15, %v2385_v27 }
 0x2f2   : > { %2545 = vst [vmem:[%s3934_s24 + $0x48] sm:$0xff] %v2513_v30  ;;  %v2512_v32 = vmax.f32 %v2386_v31, 0.0 }
 0x2f4   : > { %v2845_v39 = vpop.f32.mrf.mxu1  ;;  %2544 = vst [vmem:[%s3934_s24 + $0x40] sm:$0xff] %v2512_v32 }
 0x2f5   : > { %v2471_v40 = vadd.f32 %v2845_v39, %v3922_v15 }
 0x2f6   : > { %v2465_v19 = vpop.f32.mrf.mxu1 }
 0x2f7   : > { %v2529_v14 = vmax.f32 %v2471_v40, 0.0  ;;  %v2466_v53 = vadd.f32 %v3922_v15, %v2465_v19 }
 0x2f9   : > { %2561 = vst [vmem:[%s3934_s24 + $0xc8] sm:$0xff] %v2529_v14  ;;  %v2528_v41 = vmax.f32 %v2466_v53, 0.0 }
 0x2fb   : > { %2560 = vst [vmem:[%s3934_s24 + $0xc0] sm:$0xff] %v2528_v41 }
 0x315   : > { %v2824_v42 = vpop.f32.mrf.mxu0 }
 0x316   : > { %v2401_v20 = vadd.f32 %v2824_v42, %v3922_v15 }
 0x317   : > { %v2395_v43 = vpop.f32.mrf.mxu0 }
 0x318   : > { %v2515_v13 = vmax.f32 %v2401_v20, 0.0  ;;  %v2396_v11 = vadd.f32 %v3922_v15, %v2395_v43 }
 0x31a   : > { %2547 = vst [vmem:[%s3934_s24 + $0x58] sm:$0xff] %v2515_v13  ;;  %v2514_v56 = vmax.f32 %v2396_v11, 0.0 }
 0x31c   : > { %v2848_v37 = vpop.f32.mrf.mxu1  ;;  %2546 = vst [vmem:[%s3934_s24 + $0x50] sm:$0xff] %v2514_v56 }
 0x31d   : > { %v2481_v57 = vadd.f32 %v2848_v37, %v3922_v15 }
 0x31e   : > { %v2475_v12 = vpop.f32.mrf.mxu1 }
 0x31f   : > { %v2531_v45 = vmax.f32 %v2481_v57, 0.0  ;;  %v2476_v58 = vadd.f32 %v3922_v15, %v2475_v12 }
 0x321   : > { %2563 = vst [vmem:[%s3934_s24 + $0xd8] sm:$0xff] %v2531_v45  ;;  %v2530_v46 = vmax.f32 %v2476_v58, 0.0 }
 0x323   : > { %2562 = vst [vmem:[%s3934_s24 + $0xd0] sm:$0xff] %v2530_v46 }
 0x33d   : > { %v2827_v51 = vpop.f32.mrf.mxu0 }
 0x33e   : > { %v2411_v6 = vadd.f32 %v2827_v51, %v3922_v15 }
 0x33f   : > { %v2405_v2 = vpop.f32.mrf.mxu0 }
 0x340   : > { %v2517_v50 = vmax.f32 %v2411_v6, 0.0  ;;  %v2406_v7 = vadd.f32 %v3922_v15, %v2405_v2 }
 0x342   : > { %2549 = vst [vmem:[%s3934_s24 + $0x68] sm:$0xff] %v2517_v50  ;;  %v2516_v1 = vmax.f32 %v2406_v7, 0.0 }
 0x344   : > { %v2851_v52 = vpop.f32.mrf.mxu1  ;;  %2548 = vst [vmem:[%s3934_s24 + $0x60] sm:$0xff] %v2516_v1 }
 0x345   : > { %v2491_v4 = vadd.f32 %v2851_v52, %v3922_v15 }
 0x346   : > { %v2485_v3 = vpop.f32.mrf.mxu1 }
 0x347   : > { %v2533_v10 = vmax.f32 %v2491_v4, 0.0  ;;  %v2486_v47 = vadd.f32 %v3922_v15, %v2485_v3 }
 0x349   : > { %2565 = vst [vmem:[%s3934_s24 + $0xe8] sm:$0xff] %v2533_v10  ;;  %v2532_v5 = vmax.f32 %v2486_v47, 0.0 }
 0x34b   : > { %2564 = vst [vmem:[%s3934_s24 + $0xe0] sm:$0xff] %v2532_v5 }
 0x359   : > { %v2830_v34 = vpop.f32.mrf.mxu0 }
 0x35a   : > { %v2421_v38 = vadd.f32 %v2830_v34, %v3922_v15 }
 0x35b   : > { %v2415_v49 = vpop.f32.mrf.mxu0 }
 0x35c   : > { %v2519_v33 = vmax.f32 %v2421_v38, 0.0  ;;  %v2416_v17 = vadd.f32 %v3922_v15, %v2415_v49 }
 0x35e   : > { %2551 = vst [vmem:[%s3934_s24 + $0x78] sm:$0xff] %v2519_v33  ;;  %v2518_v29 = vmax.f32 %v2416_v17, 0.0 }
 0x360   : > { %v2854_v36 = vpop.f32.mrf.mxu1  ;;  %2550 = vst [vmem:[%s3934_s24 + $0x70] sm:$0xff] %v2518_v29 }
 0x361   : > { %v2501_v44 = vadd.f32 %v2854_v36, %v3922_v15 }
 0x362   : > { %v2495_v59 = vpop.f32.mrf.mxu1 }
 0x363   : > { %v2535_v16 = vmax.f32 %v2501_v44, 0.0  ;;  %v2496_v35 = vadd.f32 %v3922_v15, %v2495_v59 }
 0x365   : > { %2567 = vst [vmem:[%s3934_s24 + $0xf8] sm:$0xff] %v2535_v16  ;;  %v2534_v60 = vmax.f32 %v2496_v35, 0.0 }
 0x367   : > { %2566 = vst [vmem:[%s3934_s24 + $0xf0] sm:$0xff] %v2534_v60 }
 0x368 PF: > { %s15_s20 = sadd.s32 1, %s2920_s20   ;;  %s4063_s18 = smov %s2916_s19 }
 0x369   : > { %p12_p5 = scmp.ge.s32.totalorder %s15_s20, 4   ;;  %s4064_s19 = smov %s4066_s1 }
 0x36b   :  { %14 = sbr.rel (!%p12_p5) target bundleno = 2 (0x2), region = 96 }

// kernel: conv_block_forward.3
= control target key start
LH: loop header
LB: loop body
LE: loop exit
PB: predicated region body
PF: predicated region fallthrough
CT: control target
= control target key end

     0   :  { %s3159_s18 = smov 0   ;;  %s3161_s19 = smov 0   ;;  %s4529_s0 = inlined_call_operand.vmem [shape: f32[2,16,16,128], index: 0, kind: input, shape index: {}, may-alias: {0,1,2}]   ;;  %s4530_s1 = inlined_call_operand.vmem [shape: f32[2,16,16,128], index: 1, kind: input, shape index: {}, may-alias: {0,1,2}]   ;;  %s4531_s2 = inlined_call_operand.vmem [shape: f32[2,16,16,128], index: 2, kind: input, shape index: {}, may-alias: {0,1,2}]   ;;  %s4532_s3 = inlined_call_operand.vmem [shape: f32[1152,128], index: 3, kind: input, shape index: {}]   ;;  %s4533_s4 = inlined_call_operand.vmem [shape: f32[1,128], index: 4, kind: input, shape index: {}]   ;;  %s4534_s5 = inlined_call_operand.vmem [shape: f32[2,16,16,128], index: 5, kind: output, shape index: {}]  }
   0x1   :  { %s3163_s20 = smov 0  }
   0x2 LB: > { %s27_s1 = sadd.s32 1, %s3122_s19  ;;  %p2870_p0 = scmp.ge.s32.totalorder %s3126_s20, 1  ;;  %s3126_s20 = sphi %s3163_s20, %s15_s20   ;;  %s3122_s19 = sphi %s3161_s19, %s4566_s19   ;;  %s3118_s18 = sphi %s3159_s18, %s4565_s18  }
   0x3   : > { %p29_p1 = scmp.ge.s32.totalorder %s27_s1, 2  ;;  %p273_p2 = scmp.lt.s32.totalorder %s3126_s20, 3 }
   0x5   : > { %s4568_s1 = smov (%p29_p1, %s27_s1), 0  ;;  %p274_p3 = pnand %p2870_p0, %p273_p2 }
   0x7   : > { %277 = sbr.rel (%p274_p3) target bundleno = 562 (0x232), region = 40 }
   0xc   : > { %v1403_v0 = vld [vmem:[%s4532_s3 + $0x78] sm:$0xff]  ;;  %v3128_v2 = vmov 0.0   ;;  %v1402_v3 = vld [vmem:[%s4532_s3 + $0x70] sm:$0xff]  ;;  %v1401_v5 = vld [vmem:[%s4532_s3 + $0x68] sm:$0xff]  ;;  %p338_p4 = scmp.lt.s32.totalorder %s3118_s18, 1 }
   0xd   : > { %v1435_v1 = vld [vmem:[%s4532_s3 + $0x178] sm:$0xff]  ;;  %1539 = vmatprep.subr.mxu0 %v3128_v2  ;;  %458 = vst [vmem:[#allocation2] sm:$0x1] %v3128_v2  ;;  %459 = vst [vmem:[#allocation2 + $0x18] sm:$0x1] %v3128_v2  ;;  %1764 = vmatprep.subr.mxu1 %v3128_v2  ;;  %v1434_v4 = vld [vmem:[%s4532_s3 + $0x170] sm:$0xff] }
   0xe   : > { %460 = vst [vmem:[#allocation2 + $0x30] sm:$0x1] %v3128_v2  ;;  %461 = vst [vmem:[#allocation2 + $0x48] sm:$0x1] %v3128_v2  ;;  %1540 = vmatpush1.msra.mxu0 %v1403_v0  ;;  %1765 = vmatpush1.msra.mxu1 %v1435_v1  ;;  %v1433_v6 = vld [vmem:[%s4532_s3 + $0x168] sm:$0xff]  ;;  %v1400_v7 = vld [vmem:[%s4532_s3 + $0x60] sm:$0xff] }
   0xf   : > { %462 = vst [vmem:[#allocation2 + $0x60] sm:$0x1] %v3128_v2  ;;  %463 = vst [vmem:[#allocation2 + $0x78] sm:$0x1] %v3128_v2  ;;  %1541 = vmatprep.subr.mxu0 %v3128_v2  ;;  %1766 = vmatprep.subr.mxu1 %v3128_v2  ;;  %v1432_v8 = vld [vmem:[%s4532_s3 + $0x160] sm:$0xff]  ;;  %v1399_v9 = vld [vmem:[%s4532_s3 + $0x58] sm:$0xff] }
  0x10   : > { %464 = vst [vmem:[#allocation2 + $0x90] sm:$0x1] %v3128_v2  ;;  %465 = vst [vmem:[#allocation2 + $0xa8] sm:$0x1] %v3128_v2  ;;  %1542 = vmatpush1.msra.mxu0 %v1402_v3  ;;  %1767 = vmatpush1.msra.mxu1 %v1434_v4  ;;  %v1431_v10 = vld [vmem:[%s4532_s3 + $0x158] sm:$0xff]  ;;  %v1398_v11 = vld [vmem:[%s4532_s3 + $0x50] sm:$0xff] }
  0x11   : > { %466 = vst [vmem:[#allocation2 + $0xc0] sm:$0x1] %v3128_v2  ;;  %467 = vst [vmem:[#allocation2 + $0xd8] sm:$0x1] %v3128_v2  ;;  %1543 = vmatprep.subr.mxu0 %v3128_v2  ;;  %1768 = vmatprep.subr.mxu1 %v3128_v2  ;;  %v1430_v12 = vld [vmem:[%s4532_s3 + $0x150] sm:$0xff]  ;;  %v1397_v13 = vld [vmem:[%s4532_s3 + $0x48] sm:$0xff] }
  0x12   : > { %468 = vst [vmem:[#allocation2 + $0xf0] sm:$0x1] %v3128_v2  ;;  %469 = vst [vmem:[#allocation2 + $0x108] sm:$0x1] %v3128_v2  ;;  %1544 = vmatpush1.msra.mxu0 %v1401_v5  ;;  %1769 = vmatpush1.msra.mxu1 %v1433_v6  ;;  %v1429_v14 = vld [vmem:[%s4532_s3 + $0x148] sm:$0xff]  ;;  %s4570_s18 = smov (!%p338_p4, %s3118_s18), 1 }
  0x13   : > { %470 = vst [vmem:[#allocation2 + $0x120] sm:$0x1] %v3128_v2  ;;  %471 = vst [vmem:[#allocation2 + $0x138] sm:$0x1] %v3128_v2  ;;  %1545 = vmatprep.subr.mxu0 %v3128_v2  ;;  %1770 = vmatprep.subr.mxu1 %v3128_v2  ;;  %v1396_v15 = vld [vmem:[%s4532_s3 + $0x40] sm:$0xff]  ;;  %v1395_v17 = vld [vmem:[%s4532_s3 + $0x38] sm:$0xff] }
  0x14   : > { %472 = vst [vmem:[#allocation2 + $0x150] sm:$0x1] %v3128_v2  ;;  %473 = vst [vmem:[#allocation2 + $0x168] sm:$0x1] %v3128_v2  ;;  %1546 = vmatpush1.msra.mxu0 %v1400_v7  ;;  %1771 = vmatpush1.msra.mxu1 %v1432_v8  ;;  %v1428_v16 = vld [vmem:[%s4532_s3 + $0x140] sm:$0xff]  ;;  %v1427_v18 = vld [vmem:[%s4532_s3 + $0x138] sm:$0xff] }
  0x15   : > { %474 = vst [vmem:[#allocation2 + $0x180] sm:$0x1] %v3128_v2  ;;  %475 = vst [vmem:[#allocation2 + $0x198] sm:$0x1] %v3128_v2  ;;  %1547 = vmatprep.subr.mxu0 %v3128_v2  ;;  %1772 = vmatprep.subr.mxu1 %v3128_v2  ;;  %s2882_s8 = sshll.u32 %s4570_s18, 8  ;;  %v1394_v19 = vld [vmem:[%s4532_s3 + $0x30] sm:$0xff] }
  0x16   : > { %476 = vst [vmem:[#allocation2 + $0x11] sm:$0x1] %v3128_v2  ;;  %477 = vst [vmem:[#allocation2 + $0x29] sm:$0x1] %v3128_v2  ;;  %1548 = vmatpush1.msra.mxu0 %v1399_v9  ;;  %1773 = vmatpush1.msra.mxu1 %v1431_v10  ;;  %v1426_v20 = vld [vmem:[%s4532_s3 + $0x130] sm:$0xff]  ;;  %s3307_s15 = scalar_lea.vmem %s4529_s0, %s2882_s8  ;;  %v1393_v21 = vld [vmem:[%s4532_s3 + $0x28] sm:$0xff]  ;;  %s4435_s7 = scalar_lea.vmem %s4534_s5, %s2882_s8 }
  0x17   : > { %478 = vst [vmem:[#allocation2 + $0x41] sm:$0x1] %v3128_v2  ;;  %479 = vst [vmem:[#allocation2 + $0x59] sm:$0x1] %v3128_v2  ;;  %1549 = vmatprep.subr.mxu0 %v3128_v2  ;;  %1774 = vmatprep.subr.mxu1 %v3128_v2  ;;  %v1425_v22 = vld [vmem:[%s4532_s3 + $0x128] sm:$0xff]  ;;  %v1392_v23 = vld [vmem:[%s4532_s3 + $0x20] sm:$0xff] }
  0x18   : > { %480 = vst [vmem:[#allocation2 + $0x71] sm:$0x1] %v3128_v2  ;;  %481 = vst [vmem:[#allocation2 + $0x89] sm:$0x1] %v3128_v2  ;;  %1550 = vmatpush1.msra.mxu0 %v1398_v11  ;;  %1775 = vmatpush1.msra.mxu1 %v1430_v12  ;;  %v1424_v24 = vld [vmem:[%s4532_s3 + $0x120] sm:$0xff]  ;;  %v1391_v26 = vld [vmem:[%s4532_s3 + $0x18] sm:$0xff] }
  0x19   : > { %482 = vst [vmem:[#allocation2 + $0xa1] sm:$0x1] %v3128_v2  ;;  %483 = vst [vmem:[#allocation2 + $0xb9] sm:$0x1] %v3128_v2  ;;  %1551 = vmatprep.subr.mxu0 %v3128_v2  ;;  %1776 = vmatprep.subr.mxu1 %v3128_v2  ;;  %v3326_v25 = vld [vmem:[%s3307_s15] sm:$0xff]  ;;  %v1423_v27 = vld [vmem:[%s4532_s3 + $0x118] sm:$0xff] }
  0x1a   : > { %484 = vst [vmem:[#allocation2 + $0xd1] sm:$0x1] %v3128_v2  ;;  %485 = vst [vmem:[#allocation2 + $0xe9] sm:$0x1] %v3128_v2  ;;  %1552 = vmatpush1.msra.mxu0 %v1397_v13  ;;  %1777 = vmatpush1.msra.mxu1 %v1429_v14  ;;  %v3338_v28 = vld [vmem:[%s3307_s15 + $0x8] sm:$0xff]  ;;  %v3342_v29 = vld [vmem:[%s3307_s15 + $0x10] sm:$0xff] }
  0x1b   : > { %486 = vst [vmem:[#allocation2 + $0x101] sm:$0x1] %v3128_v2  ;;  %487 = vst [vmem:[#allocation2 + $0x119] sm:$0x1] %v3128_v2  ;;  %1553 = vmatprep.subr.mxu0 %v3128_v2  ;;  %1778 = vmatprep.subr.mxu1 %v3128_v2  ;;  %v1390_v30 = vld [vmem:[%s4532_s3 + $0x10] sm:$0xff]  ;;  %v3354_v32 = vld [vmem:[%s3307_s15 + $0x18] sm:$0xff] }
  0x1c   : > { %488 = vst [vmem:[#allocation2 + $0x131] sm:$0x1] %v3128_v2  ;;  %489 = vst [vmem:[#allocation2 + $0x149] sm:$0x1] %v3128_v2  ;;  %1554 = vmatpush1.msra.mxu0 %v1396_v15  ;;  %1779 = vmatpush1.msra.mxu1 %v1428_v16  ;;  %v1422_v31 = vld [vmem:[%s4532_s3 + $0x110] sm:$0xff]  ;;  %v3358_v33 = vld [vmem:[%s3307_s15 + $0x20] sm:$0xff] }
  0x1d   : > { %490 = vst [vmem:[#allocation2 + $0x161] sm:$0x1] %v3128_v2  ;;  %491 = vst [vmem:[#allocation2 + $0x179] sm:$0x1] %v3128_v2  ;;  %1555 = vmatprep.subr.mxu0 %v3128_v2  ;;  %1780 = vmatprep.subr.mxu1 %v3128_v2  ;;  %v1389_v34 = vld [vmem:[%s4532_s3 + $0x8] sm:$0xff]  ;;  %v3374_v37 = vld [vmem:[%s3307_s15 + $0x30] sm:$0xff] }
  0x1e   : > { %492 = vst [vmem:[#allocation2 + $0x191] sm:$0x1] %v3128_v2  ;;  %493 = vst [vmem:[#allocation2 + $0x1a9] sm:$0x1] %v3128_v2  ;;  %1556 = vmatpush1.msra.mxu0 %v1395_v17  ;;  %1781 = vmatpush1.msra.mxu1 %v1427_v18  ;;  %v1421_v35 = vld [vmem:[%s4532_s3 + $0x108] sm:$0xff]  ;;  %v1388_v38 = vld [vmem:[%s4532_s3] sm:$0xff] }
  0x1f   : > { %498 = vst [vmem:[#allocation2 + $0x1] sm:$0xff] %v3128_v2  ;;  %499 = vst [vmem:[#allocation2 + $0x9] sm:$0xff] %v3128_v2  ;;  %1557 = vmatprep.subr.mxu0 %v3128_v2  ;;  %1782 = vmatprep.subr.mxu1 %v3128_v2  ;;  %v3370_v36 = vld [vmem:[%s3307_s15 + $0x28] sm:$0xff]  ;;  %v1420_v39 = vld [vmem:[%s4532_s3 + $0x100] sm:$0xff] }
  0x20   : > { %512 = vst [vmem:[#allocation2 + $0x199] sm:$0xff] %v3128_v2  ;;  %513 = vst [vmem:[#allocation2 + $0x1a1] sm:$0xff] %v3128_v2  ;;  %1558 = vmatpush1.msra.mxu0 %v1394_v19  ;;  %1783 = vmatpush1.msra.mxu1 %v1426_v20  ;;  %v3386_v40 = vld [vmem:[%s3307_s15 + $0x38] sm:$0xff]  ;;  %v3398_v43 = vld [vmem:[%s3307_s15 + $0x40] sm:$0xff] }
  0x21   : > { %1559 = vmatprep.subr.mxu0 %v3128_v2  ;;  %1784 = vmatprep.subr.mxu1 %v3128_v2  ;;  %426 = vst [vmem:[#allocation2 + $0x19] sm:$0xff] %v3326_v25  ;;  %427 = vst [vmem:[#allocation2 + $0x21] sm:$0xff] %v3338_v28  ;;  %v1419_v41 = vld [vmem:[%s4532_s3 + $0xf8] sm:$0xff]  ;;  %v1418_v44 = vld [vmem:[%s4532_s3 + $0xf0] sm:$0xff] }
  0x22   : > { %1560 = vmatpush1.msra.mxu0 %v1393_v21  ;;  %1785 = vmatpush1.msra.mxu1 %v1425_v22  ;;  %428 = vst [vmem:[#allocation2 + $0x31] sm:$0xff] %v3342_v29  ;;  %429 = vst [vmem:[#allocation2 + $0x39] sm:$0xff] %v3354_v32  ;;  %v1451_v42 = vld [vmem:[%s4532_s3 + $0x1f8] sm:$0xff]  ;;  %v1450_v45 = vld [vmem:[%s4532_s3 + $0x1f0] sm:$0xff] }
  0x23   : > { %1561 = vmatprep.subr.mxu0 %v3128_v2  ;;  %1786 = vmatprep.subr.mxu1 %v3128_v2  ;;  %430 = vst [vmem:[#allocation2 + $0x49] sm:$0xff] %v3358_v33  ;;  %431 = vst [vmem:[#allocation2 + $0x51] sm:$0xff] %v3370_v36  ;;  %v3410_v46 = vld [vmem:[%s3307_s15 + $0x48] sm:$0xff]  ;;  %v1416_v49 = vld [vmem:[%s4532_s3 + $0xe0] sm:$0xff] }
  0x24   : > { %1562 = vmatpush1.msra.mxu0 %v1392_v23  ;;  %1787 = vmatpush1.msra.mxu1 %v1424_v24  ;;  %432 = vst [vmem:[#allocation2 + $0x61] sm:$0xff] %v3374_v37  ;;  %433 = vst [vmem:[#allocation2 + $0x69] sm:$0xff] %v3386_v40  ;;  %v1417_v47 = vld [vmem:[%s4532_s3 + $0xe8] sm:$0xff]  ;;  %v1448_v50 = vld [vmem:[%s4532_s3 + $0x1e0] sm:$0xff] }
  0x25   : > { %1563 = vmatprep.subr.mxu0 %v3128_v2  ;;  %1788 = vmatprep.subr.mxu1 %v3128_v2  ;;  %434 = vst [vmem:[#allocation2 + $0x79] sm:$0xff] %v3398_v43  ;;  %v1449_v48 = vld [vmem:[%s4532_s3 + $0x1e8] sm:$0xff]  ;;  %435 = vst [vmem:[#allocation2 + $0x81] sm:$0xff] %v3410_v46  ;;  %v3430_v51 = vld [vmem:[%s3307_s15 + $0x50] sm:$0xff] }
  0x26   : > { %1564 = vmatpush1.msra.mxu0 %v1391_v26  ;;  %1789 = vmatpush1.msra.mxu1 %v1423_v27  ;;  %436 = vst [vmem:[#allocation2 + $0x91] sm:$0xff] %v3430_v51  ;;  %v1415_v52 = vld [vmem:[%s4532_s3 + $0xd8] sm:$0xff]  ;;  %v3446_v55 = vld [vmem:[%s3307_s15 + $0x60] sm:$0xff]  ;;  %v1414_v56 = vld [vmem:[%s4532_s3 + $0xd0] sm:$0xff] }
  0x27   : > { %1565 = vmatprep.subr.mxu0 %v3128_v2  ;;  %1790 = vmatprep.subr.mxu1 %v3128_v2  ;;  %v1447_v53 = vld [vmem:[%s4532_s3 + $0x1d8] sm:$0xff]  ;;  %v1446_v57 = vld [vmem:[%s4532_s3 + $0x1d0] sm:$0xff]  ;;  %438 = vst [vmem:[#allocation2 + $0xa9] sm:$0xff] %v3446_v55  ;;  %v3458_v58 = vld [vmem:[%s3307_s15 + $0x68] sm:$0xff] }
  0x28   : > { %1566 = vmatpush1.msra.mxu0 %v1390_v30  ;;  %1791 = vmatpush1.msra.mxu1 %v1422_v31  ;;  %v3442_v54 = vld [vmem:[%s3307_s15 + $0x58] sm:$0xff]  ;;  %439 = vst [vmem:[#allocation2 + $0xb1] sm:$0xff] %v3458_v58  ;;  %v1413_v59 = vld [vmem:[%s4532_s3 + $0xc8] sm:$0xff]  ;;  %v3470_v61 = vld [vmem:[%s3307_s15 + $0x70] sm:$0xff] }
  0x29   : > { %1567 = vmatprep.subr.mxu0 %v3128_v2  ;;  %1792 = vmatprep.subr.mxu1 %v3128_v2  ;;  %437 = vst [vmem:[#allocation2 + $0x99] sm:$0xff] %v3442_v54  ;;  %v1445_v60 = vld [vmem:[%s4532_s3 + $0x1c8] sm:$0xff]  ;;  %440 = vst [vmem:[#allocation2 + $0xc1] sm:$0xff] %v3470_v61  ;;  %v3474_v62 = vld [vmem:[%s3307_s15 + $0x78] sm:$0xff] }
  0x2a   : > { %1568 = vmatpush1.msra.mxu0 %v1389_v34  ;;  %1793 = vmatpush1.msra.mxu1 %v1421_v35  ;;  %v1412_v63 = vld [vmem:[%s4532_s3 + $0xc0] sm:$0xff]  ;;  %441 = vst [vmem:[#allocation2 + $0xc9] sm:$0xff] %v3474_v62  ;;  %v3490_v3 = vld [vmem:[%s3307_s15 + $0x88] sm:$0xff]  ;;  %v1411_v4 = vld [vmem:[%s4532_s3 + $0xb8] sm:$0xff] }
  0x2b   : > { %1569 = vmatprep.subr.mxu0 %v3128_v2  ;;  %1794 = vmatprep.subr.mxu1 %v3128_v2  ;;  %v1444_v0 = vld [vmem:[%s4532_s3 + $0x1c0] sm:$0xff]  ;;  %v1443_v5 = vld [vmem:[%s4532_s3 + $0x1b8] sm:$0xff]  ;;  %443 = vst [vmem:[#allocation2 + $0xe1] sm:$0xff] %v3490_v3  ;;  %v1410_v6 = vld [vmem:[%s4532_s3 + $0xb0] sm:$0xff] }
  0x2c   : > { %1570 = vmatpush1.msra.mxu0 %v1388_v38  ;;  %1795 = vmatpush1.msra.mxu1 %v1420_v39  ;;  %v3486_v1 = vld [vmem:[%s3307_s15 + $0x80] sm:$0xff]  ;;  %v1442_v7 = vld [vmem:[%s4532_s3 + $0x1b0] sm:$0xff]  ;;  %v1409_v9 = vld [vmem:[%s4532_s3 + $0xa8] sm:$0xff] }
  0x2d   : > { %1571 = vmatprep.subr.mxu0 %v3128_v2  ;;  %1796 = vmatprep.subr.mxu1 %v3128_v2  ;;  %442 = vst [vmem:[#allocation2 + $0xd9] sm:$0xff] %v3486_v1  ;;  %v3510_v8 = vld [vmem:[%s3307_s15 + $0x90] sm:$0xff]  ;;  %v1441_v10 = vld [vmem:[%s4532_s3 + $0x1a8] sm:$0xff]  ;;  %v3522_v11 = vld [vmem:[%s3307_s15 + $0x98] sm:$0xff] }
  0x2e   : > { %1572 = vmatpush2.msra.mxu0 %v1419_v41  ;;  %1797 = vmatpush2.msra.mxu1 %v1451_v42  ;;  %444 = vst [vmem:[#allocation2 + $0xf1] sm:$0xff] %v3510_v8  ;;  %445 = vst [vmem:[#allocation2 + $0xf9] sm:$0xff] %v3522_v11  ;;  %v1408_v12 = vld [vmem:[%s4532_s3 + $0xa0] sm:$0xff]  ;;  %v1407_v15 = vld [vmem:[%s4532_s3 + $0x98] sm:$0xff] }
  0x2f   : > { %1573 = vmatprep.subr.mxu0 %v3128_v2  ;;  %1798 = vmatprep.subr.mxu1 %v3128_v2  ;;  %v1440_v13 = vld [vmem:[%s4532_s3 + $0x1a0] sm:$0xff]  ;;  %v1439_v16 = vld [vmem:[%s4532_s3 + $0x198] sm:$0xff]  ;;  %v3546_v17 = vld [vmem:[%s3307_s15 + $0xa8] sm:$0xff] }
  0x30   : > { %1574 = vmatpush2.msra.mxu0 %v1418_v44  ;;  %1799 = vmatpush2.msra.mxu1 %v1450_v45  ;;  %v3534_v14 = vld [vmem:[%s3307_s15 + $0xa0] sm:$0xff]  ;;  %447 = vst [vmem:[#allocation2 + $0x111] sm:$0xff] %v3546_v17  ;;  %v3550_v18 = vld [vmem:[%s3307_s15 + $0xb0] sm:$0xff]  ;;  %v3562_v21 = vld [vmem:[%s3307_s15 + $0xb8] sm:$0xff] }
  0x31   : > { %1575 = vmatprep.subr.mxu0 %v3128_v2  ;;  %1800 = vmatprep.subr.mxu1 %v3128_v2  ;;  %446 = vst [vmem:[#allocation2 + $0x109] sm:$0xff] %v3534_v14  ;;  %v1406_v19 = vld [vmem:[%s4532_s3 + $0x90] sm:$0xff]  ;;  %448 = vst [vmem:[#allocation2 + $0x121] sm:$0xff] %v3550_v18  ;;  %v1405_v22 = vld [vmem:[%s4532_s3 + $0x88] sm:$0xff] }
  0x32   : > { %1576 = vmatpush2.msra.mxu0 %v1417_v47  ;;  %1801 = vmatpush2.msra.mxu1 %v1449_v48  ;;  %v1438_v20 = vld [vmem:[%s4532_s3 + $0x190] sm:$0xff]  ;;  %449 = vst [vmem:[#allocation2 + $0x129] sm:$0xff] %v3562_v21  ;;  %v1437_v23 = vld [vmem:[%s4532_s3 + $0x188] sm:$0xff]  ;;  %v3574_v24 = vld [vmem:[%s3307_s15 + $0xc0] sm:$0xff] }
  0x33   : > { %1577 = vmatprep.subr.mxu0 %v3128_v2  ;;  %1802 = vmatprep.subr.mxu1 %v3128_v2  ;;  %v1404_v26 = vld [vmem:[%s4532_s3 + $0x80] sm:$0xff]  ;;  %450 = vst [vmem:[#allocation2 + $0x139] sm:$0xff] %v3574_v24  ;;  %v3583_v27 = vld [vmem:[%s3307_s15 + $0xc8] sm:$0xff]  ;;  %v715_v31 = vld [vmem:[#allocation2 + $0x18] sm:$0xff] }
  0x34   : > { %1578 = vmatpush2.msra.mxu0 %v1416_v49  ;;  %1803 = vmatpush2.msra.mxu1 %v1448_v50  ;;  %v1436_v30 = vld [vmem:[%s4532_s3 + $0x180] sm:$0xff]  ;;  %451 = vst [vmem:[#allocation2 + $0x141] sm:$0xff] %v3583_v27  ;;  %v3590_v34 = vld [vmem:[%s3307_s15 + $0xd0] sm:$0xff]  ;;  %v3597_v39 = vld [vmem:[%s3307_s15 + $0xd8] sm:$0xff] }
  0x35   : > { %1579 = vmatprep.subr.mxu0 %v3128_v2  ;;  %1804 = vmatprep.subr.mxu1 %v3128_v2  ;;  %v523_v35 = vld [vmem:[#allocation2] sm:$0xff]  ;;  %452 = vst [vmem:[#allocation2 + $0x151] sm:$0xff] %v3590_v34  ;;  %v1467_v41 = vld [vmem:[%s4532_s3 + $0x278] sm:$0xff]  ;;  %453 = vst [vmem:[#allocation2 + $0x159] sm:$0xff] %v3597_v39 }
  0x36   : > { %1580 = vmatpush2.msra.mxu0 %v1415_v52  ;;  %1805 = vmatpush2.msra.mxu1 %v1447_v53  ;;  %v651_v38 = vld [vmem:[#allocation2 + $0x2] sm:$0xff]  ;;  %v1499_v42 = vld [vmem:[%s4532_s3 + $0x378] sm:$0xff]  ;;  %v652_v48 = vld [vmem:[#allocation2 + $0xa] sm:$0xff] }
  0x37   : > { %1581 = vmatprep.subr.mxu0 %v3128_v2  ;;  %1806 = vmatprep.subr.mxu1 %v3128_v2  ;;  %v716_v44 = vld [vmem:[#allocation2 + $0x20] sm:$0xff]  ;;  %v524_v47 = vld [vmem:[#allocation2 + $0x8] sm:$0xff]  ;;  %v1466_v50 = vld [vmem:[%s4532_s3 + $0x270] sm:$0xff] }
  0x38   : > { %1582 = vmatpush2.msra.mxu0 %v1414_v56  ;;  %1807 = vmatpush2.msra.mxu1 %v1446_v57  ;;  %v3607_v45 = vld [vmem:[%s3307_s15 + $0xe0] sm:$0xff]  ;;  %v3613_v49 = vld [vmem:[%s3307_s15 + $0xe8] sm:$0xff]  ;;  %v1498_v52 = vld [vmem:[%s4532_s3 + $0x370] sm:$0xff] }
  0x39   : > { %1583 = vmatprep.subr.mxu0 %v3128_v2  ;;  %1808 = vmatprep.subr.mxu1 %v3128_v2  ;;  %454 = vst [vmem:[#allocation2 + $0x169] sm:$0xff] %v3607_v45  ;;  %455 = vst [vmem:[#allocation2 + $0x171] sm:$0xff] %v3613_v49  ;;  %v3623_v53 = vld [vmem:[#allocation2 + $0x30] sm:$0xff]  ;;  %v3628_v57 = vld [vmem:[#allocation2 + $0x1a] sm:$0xff] }
  0x3a   : > { %1584 = vmatpush2.msra.mxu0 %v1413_v59  ;;  %1809 = vmatpush2.msra.mxu1 %v1445_v60  ;;  %v423_v56 = vld [vmem:[%s3307_s15 + $0xf0] sm:$0xff]  ;;  %v424_v59 = vld [vmem:[%s3307_s15 + $0xf8] sm:$0xff]  ;;  %v1465_v60 = vld [vmem:[%s4532_s3 + $0x268] sm:$0xff] }
  0x3b   : > { %1585 = vmatprep.subr.mxu0 %v3128_v2  ;;  %1810 = vmatprep.subr.mxu1 %v3128_v2  ;;  %456 = vst [vmem:[#allocation2 + $0x181] sm:$0xff] %v423_v56  ;;  %457 = vst [vmem:[#allocation2 + $0x189] sm:$0xff] %v424_v59  ;;  %v3783_v56 = vld [vmem:[#allocation2 + $0xa8] sm:$0xff]  ;;  %v1455_v59 = vld [vmem:[%s4532_s3 + $0x218] sm:$0xff] }
  0x3c   : > { %1586 = vmatpush2.msra.mxu0 %v1412_v63  ;;  %1811 = vmatpush2.msra.mxu1 %v1444_v0  ;;  %v1497_v63 = vld [vmem:[%s4532_s3 + $0x368] sm:$0xff]  ;;  %v3640_v0 = vld [vmem:[#allocation2 + $0x38] sm:$0xff] }
  0x3d   : > { %1587 = vmatprep.subr.mxu0 %v3128_v2  ;;  %1812 = vmatprep.subr.mxu1 %v3128_v2 }
  0x3e   : > { %1588 = vmatpush2.msra.mxu0 %v1411_v4  ;;  %1813 = vmatpush2.msra.mxu1 %v1443_v5  ;;  %v1464_v4 = vld [vmem:[%s4532_s3 + $0x260] sm:$0xff] }
  0x3f   : > { %1589 = vmatprep.subr.mxu0 %v3128_v2  ;;  %1814 = vmatprep.subr.mxu1 %v3128_v2  ;;  %v1496_v5 = vld [vmem:[%s4532_s3 + $0x360] sm:$0xff] }
  0x40   : > { %1590 = vmatpush2.msra.mxu0 %v1410_v6  ;;  %1815 = vmatpush2.msra.mxu1 %v1442_v7  ;;  %v3655_v6 = vld [vmem:[#allocation2 + $0x48] sm:$0xff]  ;;  %v1463_v7 = vld [vmem:[%s4532_s3 + $0x258] sm:$0xff] }
  0x41   : > { %1591 = vmatprep.subr.mxu0 %v3128_v2  ;;  %1816 = vmatprep.subr.mxu1 %v3128_v2 }
  0x42   : > { %1592 = vmatpush2.msra.mxu0 %v1409_v9  ;;  %1817 = vmatpush2.msra.mxu1 %v1441_v10  ;;  %v1495_v9 = vld [vmem:[%s4532_s3 + $0x358] sm:$0xff]  ;;  %v3671_v10 = vld [vmem:[#allocation2 + $0x50] sm:$0xff] }
  0x43   : > { %1593 = vmatprep.subr.mxu0 %v3128_v2  ;;  %1818 = vmatprep.subr.mxu1 %v3128_v2 }
  0x44   : > { %1594 = vmatpush2.msra.mxu0 %v1408_v12  ;;  %1819 = vmatpush2.msra.mxu1 %v1440_v13  ;;  %v1462_v12 = vld [vmem:[%s4532_s3 + $0x250] sm:$0xff] }
  0x45   : > { %1595 = vmatprep.subr.mxu0 %v3128_v2  ;;  %1820 = vmatprep.subr.mxu1 %v3128_v2  ;;  %v1494_v13 = vld [vmem:[%s4532_s3 + $0x350] sm:$0xff] }
  0x46   : > { %1596 = vmatpush2.msra.mxu0 %v1407_v15  ;;  %1821 = vmatpush2.msra.mxu1 %v1439_v16  ;;  %v3687_v15 = vld [vmem:[#allocation2 + $0x60] sm:$0xff]  ;;  %v1461_v16 = vld [vmem:[%s4532_s3 + $0x248] sm:$0xff] }
  0x47   : > { %1597 = vmatprep.subr.mxu0 %v3128_v2  ;;  %1822 = vmatprep.subr.mxu1 %v3128_v2 }
  0x48   : > { %1598 = vmatpush2.msra.mxu0 %v1406_v19  ;;  %1823 = vmatpush2.msra.mxu1 %v1438_v20  ;;  %v1493_v19 = vld [vmem:[%s4532_s3 + $0x348] sm:$0xff] }
  0x49   : > { %1599 = vmatprep.subr.mxu0 %v3128_v2  ;;  %1824 = vmatprep.subr.mxu1 %v3128_v2  ;;  %v3703_v20 = vld [vmem:[#allocation2 + $0x68] sm:$0xff] }
  0x4a   : > { %1600 = vmatpush2.msra.mxu0 %v1405_v22  ;;  %1825 = vmatpush2.msra.mxu1 %v1437_v23  ;;  %v1460_v22 = vld [vmem:[%s4532_s3 + $0x240] sm:$0xff] }
  0x4b   : > { %1601 = vmatprep.subr.mxu0 %v3128_v2  ;;  %1826 = vmatprep.subr.mxu1 %v3128_v2  ;;  %v1492_v23 = vld [vmem:[%s4532_s3 + $0x340] sm:$0xff] }
  0x4c   : > { %1602 = vmatpush2.msra.mxu0 %v1404_v26  ;;  %1603 = vmatprep.mubr.f32.mxu0 %v3128_v2  ;;  %v3719_v26 = vld [vmem:[#allocation2 + $0x78] sm:$0xff] }
  0x4d   : > { %1827 = vmatpush2.msra.mxu1 %v1436_v30  ;;  %1828 = vmatprep.mubr.f32.mxu1 %v715_v31  ;;  %v1459_v30 = vld [vmem:[%s4532_s3 + $0x238] sm:$0xff] }
  0x4e   : > { %1604 = vmatmul.mubr.f32.vlgmr.msra.gmra.mxu0 %v523_v35  ;;  %1829 = vmatmul.mubr.f32.vlgmr.msra.gmra.mxu1 %v651_v38  ;;  %v3735_v35 = vld [vmem:[#allocation2 + $0x80] sm:$0xff]  ;;  %v1458_v38 = vld [vmem:[%s4532_s3 + $0x230] sm:$0xff] }
  0x4f   : > { %1989 = vmatprep.subr.mxu0 %v3128_v2  ;;  %2214 = vmatprep.subr.mxu1 %v3128_v2 }
  0x50   : > { %1990 = vmatpush1.msra.mxu0 %v1467_v41  ;;  %2215 = vmatpush1.msra.mxu1 %v1499_v42  ;;  %v1490_v41 = vld [vmem:[%s4532_s3 + $0x330] sm:$0xff] }
  0x51   : > { %1608 = vmatprep.mubr.f32.mxu0 %v3128_v2  ;;  %1833 = vmatprep.mubr.f32.mxu1 %v716_v44  ;;  %v3751_v42 = vld [vmem:[#allocation2 + $0x90] sm:$0xff] }
  0x52   : > { %1609 = vmatmul.mubr.f32.gmra.mxu0 %v524_v47  ;;  %1834 = vmatmul.mubr.f32.gmra.mxu1 %v652_v48  ;;  %v1489_v47 = vld [vmem:[%s4532_s3 + $0x328] sm:$0xff]  ;;  %v3767_v48 = vld [vmem:[#allocation2 + $0x98] sm:$0xff] }
  0x53   : > { %1991 = vmatprep.subr.mxu0 %v3128_v2  ;;  %2216 = vmatprep.subr.mxu1 %v3128_v2 }
  0x54   : > { %1992 = vmatpush1.msra.mxu0 %v1466_v50  ;;  %2217 = vmatpush1.msra.mxu1 %v1498_v52  ;;  %v1456_v50 = vld [vmem:[%s4532_s3 + $0x220] sm:$0xff] }
  0x55   : > { %1613 = vmatprep.mubr.f32.mxu0 %v3326_v25  ;;  %1838 = vmatprep.mubr.f32.mxu1 %v3623_v53  ;;  %v3644_v25 = vld [vmem:[#allocation2 + $0x22] sm:$0xff] }
  0x56   : > { %1614 = vmatmul.mubr.f32.gmra.mxu0 %v715_v31  ;;  %1839 = vmatmul.mubr.f32.gmra.mxu1 %v3628_v57  ;;  %v1491_v31 = vld [vmem:[%s4532_s3 + $0x338] sm:$0xff]  ;;  %v1488_v52 = vld [vmem:[%s4532_s3 + $0x320] sm:$0xff] }
  0x57   : > { %1993 = vmatprep.subr.mxu0 %v3128_v2  ;;  %2218 = vmatprep.subr.mxu1 %v3128_v2 }
  0x58   : > { %1994 = vmatpush1.msra.mxu0 %v1465_v60  ;;  %2219 = vmatpush1.msra.mxu1 %v1497_v63  ;;  %v1487_v60 = vld [vmem:[%s4532_s3 + $0x318] sm:$0xff]  ;;  %v3799_v63 = vld [vmem:[#allocation2 + $0xb0] sm:$0xff] }
  0x59   : > { %1618 = vmatprep.mubr.f32.mxu0 %v3338_v28  ;;  %1843 = vmatprep.mubr.f32.mxu1 %v3640_v0  ;;  %v3659_v28 = vld [vmem:[#allocation2 + $0x32] sm:$0xff] }
  0x5a   : > { %1619 = vmatmul.mubr.f32.gmra.mxu0 %v716_v44  ;;  %1844 = vmatmul.mubr.f32.gmra.mxu1 %v3644_v25  ;;  %v1457_v44 = vld [vmem:[%s4532_s3 + $0x228] sm:$0xff] }
  0x5b   : > { %1995 = vmatprep.subr.mxu0 %v3128_v2  ;;  %2220 = vmatprep.subr.mxu1 %v3128_v2 }
  0x5c   : > { %1996 = vmatpush1.msra.mxu0 %v1464_v4  ;;  %2221 = vmatpush1.msra.mxu1 %v1496_v5  ;;  %v1454_v4 = vld [vmem:[%s4532_s3 + $0x210] sm:$0xff] }
  0x5d   : > { %1623 = vmatprep.mubr.f32.mxu0 %v3342_v29  ;;  %1848 = vmatprep.mubr.f32.mxu1 %v3655_v6  ;;  %v3675_v29 = vld [vmem:[#allocation2 + $0x3a] sm:$0xff]  ;;  %v1486_v5 = vld [vmem:[%s4532_s3 + $0x310] sm:$0xff] }
  0x5e   : > { %1624 = vmatmul.mubr.f32.gmra.mxu0 %v3623_v53  ;;  %1849 = vmatmul.mubr.f32.gmra.mxu1 %v3659_v28 }
  0x5f   : > { %1997 = vmatprep.subr.mxu0 %v3128_v2  ;;  %2222 = vmatprep.subr.mxu1 %v3128_v2 }
  0x60   : > { %1998 = vmatpush1.msra.mxu0 %v1463_v7  ;;  %2223 = vmatpush1.msra.mxu1 %v1495_v9  ;;  %v3815_v7 = vld [vmem:[#allocation2 + $0xc0] sm:$0xff]  ;;  %v1453_v9 = vld [vmem:[%s4532_s3 + $0x208] sm:$0xff] }
  0x61   : > { %1628 = vmatprep.mubr.f32.mxu0 %v3354_v32  ;;  %1853 = vmatprep.mubr.f32.mxu1 %v3671_v10  ;;  %v3691_v32 = vld [vmem:[#allocation2 + $0x4a] sm:$0xff] }
  0x62   : > { %1629 = vmatmul.mubr.f32.gmra.mxu0 %v3640_v0  ;;  %1854 = vmatmul.mubr.f32.gmra.mxu1 %v3675_v29 }
  0x63   : > { %1999 = vmatprep.subr.mxu0 %v3128_v2  ;;  %2224 = vmatprep.subr.mxu1 %v3128_v2 }
  0x64   : > { %2000 = vmatpush1.msra.mxu0 %v1462_v12  ;;  %2225 = vmatpush1.msra.mxu1 %v1494_v13  ;;  %v1485_v12 = vld [vmem:[%s4532_s3 + $0x308] sm:$0xff] }
  0x65   : > { %1633 = vmatprep.mubr.f32.mxu0 %v3358_v33  ;;  %1858 = vmatprep.mubr.f32.mxu1 %v3687_v15  ;;  %v3707_v33 = vld [vmem:[#allocation2 + $0x52] sm:$0xff]  ;;  %v3831_v13 = vld [vmem:[#allocation2 + $0xc8] sm:$0xff] }
  0x66   : > { %1634 = vmatmul.mubr.f32.gmra.mxu0 %v3655_v6  ;;  %1859 = vmatmul.mubr.f32.gmra.mxu1 %v3691_v32 }
  0x67   : > { %2001 = vmatprep.subr.mxu0 %v3128_v2  ;;  %2226 = vmatprep.subr.mxu1 %v3128_v2 }
  0x68   : > { %2002 = vmatpush1.msra.mxu0 %v1461_v16  ;;  %2227 = vmatpush1.msra.mxu1 %v1493_v19  ;;  %v1452_v16 = vld [vmem:[%s4532_s3 + $0x200] sm:$0xff] }
  0x69   : > { %1638 = vmatprep.mubr.f32.mxu0 %v3370_v36  ;;  %1863 = vmatprep.mubr.f32.mxu1 %v3703_v20  ;;  %v3723_v36 = vld [vmem:[#allocation2 + $0x62] sm:$0xff] }
  0x6a   : > { %1639 = vmatmul.mubr.f32.gmra.mxu0 %v3671_v10  ;;  %1864 = vmatmul.mubr.f32.gmra.mxu1 %v3707_v33  ;;  %v1484_v19 = vld [vmem:[%s4532_s3 + $0x300] sm:$0xff] }
  0x6b   : > { %2003 = vmatprep.subr.mxu0 %v3128_v2  ;;  %2228 = vmatprep.subr.mxu1 %v3128_v2 }
  0x6c   : > { %2004 = vmatpush1.msra.mxu0 %v1460_v22  ;;  %2229 = vmatpush1.msra.mxu1 %v1492_v23  ;;  %v3847_v22 = vld [vmem:[#allocation2 + $0xd8] sm:$0xff] }
  0x6d   : > { %1643 = vmatprep.mubr.f32.mxu0 %v3374_v37  ;;  %1868 = vmatprep.mubr.f32.mxu1 %v3719_v26  ;;  %v3739_v37 = vld [vmem:[#allocation2 + $0x6a] sm:$0xff]  ;;  %v1483_v23 = vld [vmem:[%s4532_s3 + $0x2f8] sm:$0xff] }
  0x6e   : > { %1644 = vmatmul.mubr.f32.gmra.mxu0 %v3687_v15  ;;  %1869 = vmatmul.mubr.f32.gmra.mxu1 %v3723_v36 }
  0x6f   : > { %2005 = vmatprep.subr.mxu0 %v3128_v2  ;;  %2230 = vmatprep.subr.mxu1 %v3128_v2 }
  0x70   : > { %2006 = vmatpush1.msra.mxu0 %v1459_v30  ;;  %2231 = vmatpush1.msra.mxu1 %v1491_v31  ;;  %v1515_v30 = vld [vmem:[%s4532_s3 + $0x3f8] sm:$0xff]  ;;  %v3863_v31 = vld [vmem:[#allocation2 + $0xe0] sm:$0xff] }
  0x71   : > { %1648 = vmatprep.mubr.f32.mxu0 %v3386_v40  ;;  %1873 = vmatprep.mubr.f32.mxu1 %v3735_v35  ;;  %v3755_v40 = vld [vmem:[#allocation2 + $0x7a] sm:$0xff] }
  0x72   : > { %1649 = vmatmul.mubr.f32.gmra.mxu0 %v3703_v20  ;;  %1874 = vmatmul.mubr.f32.gmra.mxu1 %v3739_v37 }
  0x73   : > { %2007 = vmatprep.subr.mxu0 %v3128_v2  ;;  %2232 = vmatprep.subr.mxu1 %v3128_v2 }
  0x74   : > { %2008 = vmatpush1.msra.mxu0 %v1458_v38  ;;  %2233 = vmatpush1.msra.mxu1 %v1490_v41  ;;  %v1482_v38 = vld [vmem:[%s4532_s3 + $0x2f0] sm:$0xff] }
  0x75   : > { %1653 = vmatprep.mubr.f32.mxu0 %v3398_v43  ;;  %1878 = vmatprep.mubr.f32.mxu1 %v3751_v42  ;;  %v3771_v43 = vld [vmem:[#allocation2 + $0x82] sm:$0xff]  ;;  %v1514_v41 = vld [vmem:[%s4532_s3 + $0x3f0] sm:$0xff] }
  0x76   : > { %1654 = vmatmul.mubr.f32.gmra.mxu0 %v3719_v26  ;;  %1879 = vmatmul.mubr.f32.gmra.mxu1 %v3755_v40 }
  0x77   : > { %2009 = vmatprep.subr.mxu0 %v3128_v2  ;;  %2234 = vmatprep.subr.mxu1 %v3128_v2 }
  0x78   : > { %2010 = vmatpush1.msra.mxu0 %v1457_v44  ;;  %2235 = vmatpush1.msra.mxu1 %v1489_v47  ;;  %v3879_v44 = vld [vmem:[#allocation2 + $0xf0] sm:$0xff]  ;;  %v1481_v47 = vld [vmem:[%s4532_s3 + $0x2e8] sm:$0xff] }
  0x79   : > { %1658 = vmatprep.mubr.f32.mxu0 %v3410_v46  ;;  %1883 = vmatprep.mubr.f32.mxu1 %v3767_v48  ;;  %v3787_v46 = vld [vmem:[#allocation2 + $0x92] sm:$0xff] }
  0x7a   : > { %1659 = vmatmul.mubr.f32.gmra.mxu0 %v3735_v35  ;;  %1884 = vmatmul.mubr.f32.gmra.mxu1 %v3771_v43 }
  0x7b   : > { %2011 = vmatprep.subr.mxu0 %v3128_v2  ;;  %2236 = vmatprep.subr.mxu1 %v3128_v2 }
  0x7c   : > { %2012 = vmatpush1.msra.mxu0 %v1456_v50  ;;  %2237 = vmatpush1.msra.mxu1 %v1488_v52  ;;  %v1513_v50 = vld [vmem:[%s4532_s3 + $0x3e8] sm:$0xff]  ;;  %v3895_v52 = vld [vmem:[#allocation2 + $0xf8] sm:$0xff] }
  0x7d   : > { %1663 = vmatprep.mubr.f32.mxu0 %v3430_v51  ;;  %1888 = vmatprep.mubr.f32.mxu1 %v3783_v56  ;;  %v3803_v51 = vld [vmem:[#allocation2 + $0x9a] sm:$0xff] }
  0x7e   : > { %1664 = vmatmul.mubr.f32.gmra.mxu0 %v3751_v42  ;;  %1889 = vmatmul.mubr.f32.gmra.mxu1 %v3787_v46 }
  0x7f   : > { %2013 = vmatprep.subr.mxu0 %v3128_v2  ;;  %2238 = vmatprep.subr.mxu1 %v3128_v2 }
  0x80   : > { %2014 = vmatpush1.msra.mxu0 %v1455_v59  ;;  %2239 = vmatpush1.msra.mxu1 %v1487_v60  ;;  %v1480_v59 = vld [vmem:[%s4532_s3 + $0x2e0] sm:$0xff] }
  0x81   : > { %1668 = vmatprep.mubr.f32.mxu0 %v3442_v54  ;;  %1893 = vmatprep.mubr.f32.mxu1 %v3799_v63  ;;  %v3819_v54 = vld [vmem:[#allocation2 + $0xaa] sm:$0xff]  ;;  %v1512_v60 = vld [vmem:[%s4532_s3 + $0x3e0] sm:$0xff] }
  0x82   : > { %1669 = vmatmul.mubr.f32.gmra.mxu0 %v3767_v48  ;;  %1894 = vmatmul.mubr.f32.gmra.mxu1 %v3803_v51 }
  0x83   : > { %2015 = vmatprep.subr.mxu0 %v3128_v2  ;;  %2240 = vmatprep.subr.mxu1 %v3128_v2 }
  0x84   : > { %2016 = vmatpush1.msra.mxu0 %v1454_v4  ;;  %2241 = vmatpush1.msra.mxu1 %v1486_v5  ;;  %v3911_v4 = vld [vmem:[#allocation2 + $0x108] sm:$0xff]  ;;  %v1479_v5 = vld [vmem:[%s4532_s3 + $0x2d8] sm:$0xff] }
  0x85   : > { %1673 = vmatprep.mubr.f32.mxu0 %v3446_v55  ;;  %1898 = vmatprep.mubr.f32.mxu1 %v3815_v7  ;;  %v3835_v55 = vld [vmem:[#allocation2 + $0xb2] sm:$0xff] }
  0x86   : > { %1674 = vmatmul.mubr.f32.gmra.mxu0 %v3783_v56  ;;  %1899 = vmatmul.mubr.f32.gmra.mxu1 %v3819_v54 }
  0x87   : > { %2017 = vmatprep.subr.mxu0 %v3128_v2  ;;  %2242 = vmatprep.subr.mxu1 %v3128_v2 }
  0x88   : > { %2018 = vmatpush1.msra.mxu0 %v1453_v9  ;;  %2243 = vmatpush1.msra.mxu1 %v1485_v12  ;;  %v1511_v9 = vld [vmem:[%s4532_s3 + $0x3d8] sm:$0xff]  ;;  %v3929_v12 = vld [vmem:[#allocation2 + $0x1] sm:$0xff] }
  0x89   : > { %1678 = vmatprep.mubr.f32.mxu0 %v3458_v58  ;;  %1903 = vmatprep.mubr.f32.mxu1 %v3831_v13  ;;  %v3851_v58 = vld [vmem:[#allocation2 + $0xc2] sm:$0xff]  ;;  %4539 = vst [vmem:[#allocation4_spill] sm:$0xff] %v3929_v12 }
  0x8a   : > { %1679 = vmatmul.mubr.f32.gmra.mxu0 %v3799_v63  ;;  %1904 = vmatmul.mubr.f32.gmra.mxu1 %v3835_v55 }
  0x8b   : > { %2019 = vmatprep.subr.mxu0 %v3128_v2  ;;  %2244 = vmatprep.subr.mxu1 %v3128_v2 }
  0x8c   : > { %2020 = vmatpush1.msra.mxu0 %v1452_v16  ;;  %2245 = vmatpush1.msra.mxu1 %v1484_v19  ;;  %v1478_v16 = vld [vmem:[%s4532_s3 + $0x2d0] sm:$0xff] }
  0x8d   : > { %1683 = vmatprep.mubr.f32.mxu0 %v3470_v61  ;;  %1908 = vmatprep.mubr.f32.mxu1 %v3847_v22  ;;  %v3867_v61 = vld [vmem:[#allocation2 + $0xca] sm:$0xff] }
  0x8e   : > { %1684 = vmatmul.mubr.f32.gmra.mxu0 %v3815_v7  ;;  %1909 = vmatmul.mubr.f32.gmra.mxu1 %v3851_v58  ;;  %v1510_v19 = vld [vmem:[%s4532_s3 + $0x3d0] sm:$0xff] }
  0x8f   : > { %2021 = vmatprep.subr.mxu0 %v3128_v2  ;;  %2246 = vmatprep.subr.mxu1 %v3128_v2 }
  0x90   : > { %2022 = vmatpush2.msra.mxu0 %v1483_v23  ;;  %2247 = vmatpush2.msra.mxu1 %v1515_v30  ;;  %v3945_v23 = vld [vmem:[#allocation2 + $0x120] sm:$0xff]  ;;  %v1477_v30 = vld [vmem:[%s4532_s3 + $0x2c8] sm:$0xff] }
  0x91   : > { %1688 = vmatprep.mubr.f32.mxu0 %v3474_v62  ;;  %1913 = vmatprep.mubr.f32.mxu1 %v3863_v31  ;;  %v3883_v62 = vld [vmem:[#allocation2 + $0xda] sm:$0xff] }
  0x92   : > { %1689 = vmatmul.mubr.f32.gmra.mxu0 %v3831_v13  ;;  %1914 = vmatmul.mubr.f32.gmra.mxu1 %v3867_v61 }
  0x93   : > { %2023 = vmatprep.subr.mxu0 %v3128_v2  ;;  %2248 = vmatprep.subr.mxu1 %v3128_v2 }
  0x94   : > { %2024 = vmatpush2.msra.mxu0 %v1482_v38  ;;  %2249 = vmatpush2.msra.mxu1 %v1514_v41  ;;  %v1509_v38 = vld [vmem:[%s4532_s3 + $0x3c8] sm:$0xff] }
  0x95   : > { %1693 = vmatprep.mubr.f32.mxu0 %v3486_v1  ;;  %1918 = vmatprep.mubr.f32.mxu1 %v3879_v44  ;;  %v3899_v1 = vld [vmem:[#allocation2 + $0xe2] sm:$0xff] }
  0x96   : > { %1694 = vmatmul.mubr.f32.gmra.mxu0 %v3847_v22  ;;  %1919 = vmatmul.mubr.f32.gmra.mxu1 %v3883_v62  ;;  %v3961_v41 = vld [vmem:[#allocation2 + $0x128] sm:$0xff] }
  0x97   : > { %2025 = vmatprep.subr.mxu0 %v3128_v2  ;;  %2250 = vmatprep.subr.mxu1 %v3128_v2 }
  0x98   : > { %2026 = vmatpush2.msra.mxu0 %v1481_v47  ;;  %2251 = vmatpush2.msra.mxu1 %v1513_v50  ;;  %v1476_v47 = vld [vmem:[%s4532_s3 + $0x2c0] sm:$0xff] }
  0x99   : > { %1698 = vmatprep.mubr.f32.mxu0 %v3490_v3  ;;  %1923 = vmatprep.mubr.f32.mxu1 %v3895_v52  ;;  %v3915_v3 = vld [vmem:[#allocation2 + $0xf2] sm:$0xff]  ;;  %v1508_v50 = vld [vmem:[%s4532_s3 + $0x3c0] sm:$0xff] }
  0x9a   : > { %1699 = vmatmul.mubr.f32.gmra.mxu0 %v3863_v31  ;;  %1924 = vmatmul.mubr.f32.gmra.mxu1 %v3899_v1 }
  0x9b   : > { %2027 = vmatprep.subr.mxu0 %v3128_v2  ;;  %2252 = vmatprep.subr.mxu1 %v3128_v2  ;;  %v3927_v2 = vld [vmem:[#allocation2 + $0x110] sm:$0xff] }
  0x9c   : > { %2028 = vmatpush2.msra.mxu0 %v1480_v59  ;;  %2253 = vmatpush2.msra.mxu1 %v1512_v60  ;;  %v3977_v59 = vld [vmem:[#allocation2 + $0x138] sm:$0xff] }
  0x9d   : > { %1703 = vmatprep.mubr.f32.mxu0 %v3510_v8  ;;  %1928 = vmatprep.mubr.f32.mxu1 %v3911_v4  ;;  %v3933_v8 = vld [vmem:[#allocation2 + $0xfa] sm:$0xff] }
  0x9e   : > { %1704 = vmatmul.mubr.f32.gmra.mxu0 %v3879_v44  ;;  %1929 = vmatmul.mubr.f32.gmra.mxu1 %v3915_v3  ;;  %v1475_v60 = vld [vmem:[%s4532_s3 + $0x2b8] sm:$0xff] }
  0x9f   : > { %2029 = vmatprep.subr.mxu0 %v3929_v12  ;;  %2254 = vmatprep.subr.mxu1 %v3929_v12 }
  0xa0   : > { %2030 = vmatpush2.msra.mxu0 %v1479_v5  ;;  %2255 = vmatpush2.msra.mxu1 %v1511_v9  ;;  %v1507_v5 = vld [vmem:[%s4532_s3 + $0x3b8] sm:$0xff]  ;;  %v3993_v9 = vld [vmem:[#allocation2 + $0x140] sm:$0xff] }
  0xa1   : > { %1708 = vmatprep.mubr.f32.mxu0 %v3522_v11  ;;  %1933 = vmatprep.mubr.f32.mxu1 %v3927_v2  ;;  %v3949_v11 = vld [vmem:[#allocation2 + $0x10a] sm:$0xff] }
  0xa2   : > { %1709 = vmatmul.mubr.f32.gmra.mxu0 %v3895_v52  ;;  %1934 = vmatmul.mubr.f32.gmra.mxu1 %v3933_v8 }
  0xa3   : > { %2031 = vmatprep.subr.mxu0 %v3929_v12  ;;  %2256 = vmatprep.subr.mxu1 %v3929_v12 }
  0xa4   : > { %2032 = vmatpush2.msra.mxu0 %v1478_v16  ;;  %2257 = vmatpush2.msra.mxu1 %v1510_v19  ;;  %v1474_v16 = vld [vmem:[%s4532_s3 + $0x2b0] sm:$0xff] }
  0xa5   : > { %1713 = vmatprep.mubr.f32.mxu0 %v3534_v14  ;;  %1938 = vmatprep.mubr.f32.mxu1 %v3945_v23  ;;  %v3965_v14 = vld [vmem:[#allocation2 + $0x112] sm:$0xff] }
  0xa6   : > { %1714 = vmatmul.mubr.f32.gmra.mxu0 %v3911_v4  ;;  %1939 = vmatmul.mubr.f32.gmra.mxu1 %v3949_v11  ;;  %v1506_v19 = vld [vmem:[%s4532_s3 + $0x3b0] sm:$0xff] }
  0xa7   : > { %2033 = vmatprep.subr.mxu0 %v3929_v12  ;;  %2258 = vmatprep.subr.mxu1 %v3929_v12 }
  0xa8   : > { %2034 = vmatpush2.msra.mxu0 %v1477_v30  ;;  %2259 = vmatpush2.msra.mxu1 %v1509_v38  ;;  %v4009_v30 = vld [vmem:[#allocation2 + $0x150] sm:$0xff]  ;;  %v1473_v38 = vld [vmem:[%s4532_s3 + $0x2a8] sm:$0xff] }
  0xa9   : > { %1718 = vmatprep.mubr.f32.mxu0 %v3546_v17  ;;  %1943 = vmatprep.mubr.f32.mxu1 %v3961_v41  ;;  %v3981_v17 = vld [vmem:[#allocation2 + $0x122] sm:$0xff] }
  0xaa   : > { %1719 = vmatmul.mubr.f32.gmra.mxu0 %v3927_v2  ;;  %1944 = vmatmul.mubr.f32.gmra.mxu1 %v3965_v14 }
  0xab   : > { %2035 = vmatprep.subr.mxu0 %v3929_v12  ;;  %2260 = vmatprep.subr.mxu1 %v3929_v12 }
  0xac   : > { %2036 = vmatpush2.msra.mxu0 %v1476_v47  ;;  %2261 = vmatpush2.msra.mxu1 %v1508_v50  ;;  %v1505_v47 = vld [vmem:[%s4532_s3 + $0x3a8] sm:$0xff]  ;;  %v4025_v50 = vld [vmem:[#allocation2 + $0x158] sm:$0xff] }
  0xad   : > { %1723 = vmatprep.mubr.f32.mxu0 %v3550_v18  ;;  %1948 = vmatprep.mubr.f32.mxu1 %v3977_v59  ;;  %v3997_v18 = vld [vmem:[#allocation2 + $0x12a] sm:$0xff] }
  0xae   : > { %1724 = vmatmul.mubr.f32.gmra.mxu0 %v3945_v23  ;;  %1949 = vmatmul.mubr.f32.gmra.mxu1 %v3981_v17 }
  0xaf   : > { %2037 = vmatprep.subr.mxu0 %v3929_v12  ;;  %2262 = vmatprep.subr.mxu1 %v3929_v12 }
  0xb0   : > { %2038 = vmatpush2.msra.mxu0 %v1475_v60  ;;  %2263 = vmatpush2.msra.mxu1 %v1507_v5  ;;  %v1472_v60 = vld [vmem:[%s4532_s3 + $0x2a0] sm:$0xff] }
  0xb1   : > { %1728 = vmatprep.mubr.f32.mxu0 %v3562_v21  ;;  %1953 = vmatprep.mubr.f32.mxu1 %v3993_v9  ;;  %v4013_v21 = vld [vmem:[#allocation2 + $0x13a] sm:$0xff] }
  0xb2   : > { %1729 = vmatmul.mubr.f32.gmra.mxu0 %v3961_v41  ;;  %1954 = vmatmul.mubr.f32.gmra.mxu1 %v3997_v18  ;;  %v1504_v5 = vld [vmem:[%s4532_s3 + $0x3a0] sm:$0xff] }
  0xb3   : > { %2039 = vmatprep.subr.mxu0 %v3929_v12  ;;  %2264 = vmatprep.subr.mxu1 %v3929_v12 }
  0xb4   : > { %2040 = vmatpush2.msra.mxu0 %v1474_v16  ;;  %2265 = vmatpush2.msra.mxu1 %v1506_v19  ;;  %v4041_v16 = vld [vmem:[#allocation2 + $0x168] sm:$0xff]  ;;  %v1471_v19 = vld [vmem:[%s4532_s3 + $0x298] sm:$0xff] }
  0xb5   : > { %1733 = vmatprep.mubr.f32.mxu0 %v3574_v24  ;;  %1958 = vmatprep.mubr.f32.mxu1 %v4009_v30  ;;  %v4029_v24 = vld [vmem:[#allocation2 + $0x142] sm:$0xff] }
  0xb6   : > { %1734 = vmatmul.mubr.f32.gmra.mxu0 %v3977_v59  ;;  %1959 = vmatmul.mubr.f32.gmra.mxu1 %v4013_v21 }
  0xb7   : > { %2041 = vmatprep.subr.mxu0 %v3929_v12  ;;  %2266 = vmatprep.subr.mxu1 %v3929_v12 }
  0xb8   : > { %2042 = vmatpush2.msra.mxu0 %v1473_v38  ;;  %2267 = vmatpush2.msra.mxu1 %v1505_v47  ;;  %v1503_v38 = vld [vmem:[%s4532_s3 + $0x398] sm:$0xff]  ;;  %v4057_v47 = vld [vmem:[#allocation2 + $0x170] sm:$0xff] }
  0xb9   : > { %1738 = vmatprep.mubr.f32.mxu0 %v3583_v27  ;;  %1963 = vmatprep.mubr.f32.mxu1 %v4025_v50  ;;  %v4045_v27 = vld [vmem:[#allocation2 + $0x152] sm:$0xff] }
  0xba   : > { %1739 = vmatmul.mubr.f32.gmra.mxu0 %v3993_v9  ;;  %1964 = vmatmul.mubr.f32.gmra.mxu1 %v4029_v24  ;;  %4540 = vst [vmem:[#allocation5_spill] sm:$0xff] %v4045_v27 }
  0xbb   : > { %2043 = vmatprep.subr.mxu0 %v3929_v12  ;;  %2268 = vmatprep.subr.mxu1 %v3929_v12 }
  0xbc   : > { %2044 = vmatpush2.msra.mxu0 %v1472_v60  ;;  %2269 = vmatpush2.msra.mxu1 %v1504_v5  ;;  %v1470_v60 = vld [vmem:[%s4532_s3 + $0x290] sm:$0xff] }
  0xbd   : > { %1743 = vmatprep.mubr.f32.mxu0 %v3590_v34  ;;  %1968 = vmatprep.mubr.f32.mxu1 %v4041_v16  ;;  %v4061_v34 = vld [vmem:[#allocation2 + $0x15a] sm:$0xff]  ;;  %v1502_v5 = vld [vmem:[%s4532_s3 + $0x390] sm:$0xff] }
  0xbe   : > { %1744 = vmatmul.mubr.f32.gmra.mxu0 %v4009_v30  ;;  %1969 = vmatmul.mubr.f32.gmra.mxu1 %v4045_v27  ;;  %4541 = vst [vmem:[#allocation6_spill] sm:$0xff] %v4061_v34  ;;  %v4073_v27 = vld [vmem:[#allocation2 + $0x180] sm:$0xff] }
  0xbf   : > { %2045 = vmatprep.subr.mxu0 %v3929_v12  ;;  %2270 = vmatprep.subr.mxu1 %v3929_v12 }
  0xc0   : > { %2046 = vmatpush2.msra.mxu0 %v1471_v19  ;;  %2271 = vmatpush2.msra.mxu1 %v1503_v38  ;;  %v1469_v19 = vld [vmem:[%s4532_s3 + $0x288] sm:$0xff] }
  0xc1   : > { %1748 = vmatprep.mubr.f32.mxu0 %v3597_v39  ;;  %1973 = vmatprep.mubr.f32.mxu1 %v4057_v47  ;;  %v4077_v39 = vld [vmem:[#allocation2 + $0x16a] sm:$0xff] }
  0xc2   : > { %1749 = vmatmul.mubr.f32.gmra.mxu0 %v4025_v50  ;;  %1974 = vmatmul.mubr.f32.gmra.mxu1 %v4061_v34  ;;  %v1501_v38 = vld [vmem:[%s4532_s3 + $0x388] sm:$0xff] }
  0xc3   : > { %2047 = vmatprep.subr.mxu0 %v3929_v12  ;;  %2272 = vmatprep.subr.mxu1 %v3929_v12  ;;  %v4089_v34 = vld [vmem:[#allocation2 + $0x188] sm:$0xff] }
  0xc4   : > { %2048 = vmatpush2.msra.mxu0 %v1470_v60  ;;  %2273 = vmatpush2.msra.mxu1 %v1502_v5  ;;  %v1468_v60 = vld [vmem:[%s4532_s3 + $0x280] sm:$0xff] }
  0xc5   : > { %1753 = vmatprep.mubr.f32.mxu0 %v3607_v45  ;;  %1978 = vmatprep.mubr.f32.mxu1 %v4073_v27  ;;  %v4093_v45 = vld [vmem:[#allocation2 + $0x172] sm:$0xff]  ;;  %v1500_v5 = vld [vmem:[%s4532_s3 + $0x380] sm:$0xff] }
  0xc6   : > { %1754 = vmatmul.mubr.f32.gmra.mxu0 %v4041_v16  ;;  %1979 = vmatmul.mubr.f32.gmra.mxu1 %v4077_v39 }
  0xc7   : > { %2049 = vmatprep.subr.mxu0 %v3929_v12  ;;  %2274 = vmatprep.subr.mxu1 %v3929_v12 }
  0xc8   : > { %2050 = vmatpush2.msra.mxu0 %v1469_v19  ;;  %2275 = vmatpush2.msra.mxu1 %v1501_v38  ;;  %v779_v19 = vld [vmem:[#allocation2 + $0x19] sm:$0xff]  ;;  %v3073_v38 = vld [vmem:[#allocation2 + $0x31] sm:$0xff] }
  0xc9   : > { %1758 = vmatprep.mubr.f32.mxu0 %v3613_v49  ;;  %1983 = vmatprep.mubr.f32.mxu1 %v4089_v34  ;;  %v1531_v49 = vld [vmem:[%s4532_s3 + $0x478] sm:$0xff] }
  0xca   : > { %1759 = vmatmul.mubr.f32.gmra.mxu0 %v4057_v47  ;;  %1984 = vmatmul.mubr.f32.gmra.mxu1 %v4093_v45 }
  0xcb   : > { %2051 = vmatprep.subr.mxu0 %v3929_v12  ;;  %2276 = vmatprep.subr.mxu1 %v3929_v12  ;;  %v3074_v12 = vld [vmem:[#allocation2 + $0x39] sm:$0xff] }
  0xcc   : > { %2052 = vmatpush2.msra.mxu0 %v1468_v60  ;;  %2277 = vmatpush2.msra.mxu1 %v1500_v5  ;;  %v1530_v60 = vld [vmem:[%s4532_s3 + $0x470] sm:$0xff]  ;;  %v3075_v5 = vld [vmem:[#allocation2 + $0x21] sm:$0xff] }
  0xcd   : > { %2053 = vmatprep.mubr.f32.mxu0 %v3628_v57  ;;  %2278 = vmatprep.mubr.f32.mxu1 %v3073_v38  ;;  %v3076_v57 = vld [vmem:[#allocation2 + $0x49] sm:$0xff] }
  0xce   : > { %2054 = vmatmul.mubr.f32.vlgmr.msra.gmra.mxu0 %v779_v19  ;;  %2279 = vmatmul.mubr.f32.vlgmr.msra.gmra.mxu1 %v3623_v53  ;;  %v1529_v53 = vld [vmem:[%s4532_s3 + $0x468] sm:$0xff] }
  0xcf   : > { %2935 = vmatprep.subr.mxu0 %v1531_v49  ;;  %3015 = vmatprep.subr.mxu1 %v1531_v49 }
  0xd0   : > { %2936 = vmatpush3.msra.mxu0 %v1531_v49  ;;  %3031 = vmatpush3.msra.mxu1 %v1531_v49 }
  0xd1   : > { %2058 = vmatprep.mubr.f32.mxu0 %v3644_v25  ;;  %2283 = vmatprep.mubr.f32.mxu1 %v3074_v12  ;;  %v3077_v25 = vld [vmem:[#allocation2 + $0x51] sm:$0xff] }
  0xd2   : > { %2059 = vmatmul.mubr.f32.gmra.mxu0 %v3075_v5  ;;  %2284 = vmatmul.mubr.f32.gmra.mxu1 %v3640_v0  ;;  %v1528_v0 = vld [vmem:[%s4532_s3 + $0x460] sm:$0xff] }
  0xd3   : > { %2063 = vmatprep.mubr.f32.mxu0 %v3659_v28  ;;  %2288 = vmatprep.mubr.f32.mxu1 %v3076_v57  ;;  %v3078_v28 = vld [vmem:[#allocation2 + $0x61] sm:$0xff] }
  0xd4   : > { %2937 = vmatprep.subr.mxu0 %v1530_v60  ;;  %3016 = vmatprep.subr.mxu1 %v1530_v60 }
  0xd5   : > { %2938 = vmatpush3.msra.mxu0 %v1530_v60  ;;  %3032 = vmatpush3.msra.mxu1 %v1530_v60 }
  0xd6   : > { %2064 = vmatmul.mubr.f32.gmra.mxu0 %v3073_v38  ;;  %2289 = vmatmul.mubr.f32.gmra.mxu1 %v3655_v6  ;;  %v1527_v6 = vld [vmem:[%s4532_s3 + $0x458] sm:$0xff] }
  0xd7   : > { %2068 = vmatprep.mubr.f32.mxu0 %v3675_v29  ;;  %2293 = vmatprep.mubr.f32.mxu1 %v3077_v25  ;;  %v3079_v29 = vld [vmem:[#allocation2 + $0x69] sm:$0xff] }
  0xd8   : > { %2939 = vmatprep.subr.mxu0 %v1529_v53  ;;  %3017 = vmatprep.subr.mxu1 %v1529_v53 }
  0xd9   : > { %2940 = vmatpush3.msra.mxu0 %v1529_v53  ;;  %3033 = vmatpush3.msra.mxu1 %v1529_v53 }
  0xda   : > { %2069 = vmatmul.mubr.f32.gmra.mxu0 %v3074_v12  ;;  %2294 = vmatmul.mubr.f32.gmra.mxu1 %v3671_v10  ;;  %v1526_v10 = vld [vmem:[%s4532_s3 + $0x450] sm:$0xff] }
  0xdb   : > { %2073 = vmatprep.mubr.f32.mxu0 %v3691_v32  ;;  %2298 = vmatprep.mubr.f32.mxu1 %v3078_v28  ;;  %v3080_v32 = vld [vmem:[#allocation2 + $0x79] sm:$0xff] }
  0xdc   : > { %2941 = vmatprep.subr.mxu0 %v1528_v0  ;;  %3018 = vmatprep.subr.mxu1 %v1528_v0 }
  0xdd   : > { %2942 = vmatpush3.msra.mxu0 %v1528_v0  ;;  %3034 = vmatpush3.msra.mxu1 %v1528_v0 }
  0xde   : > { %2074 = vmatmul.mubr.f32.gmra.mxu0 %v3076_v57  ;;  %2299 = vmatmul.mubr.f32.gmra.mxu1 %v3687_v15  ;;  %v1525_v15 = vld [vmem:[%s4532_s3 + $0x448] sm:$0xff] }
  0xdf   : > { %2078 = vmatprep.mubr.f32.mxu0 %v3707_v33  ;;  %2303 = vmatprep.mubr.f32.mxu1 %v3079_v29  ;;  %v3081_v33 = vld [vmem:[#allocation2 + $0x81] sm:$0xff] }
  0xe0   : > { %2943 = vmatprep.subr.mxu0 %v1527_v6  ;;  %3019 = vmatprep.subr.mxu1 %v1527_v6 }
  0xe1   : > { %2944 = vmatpush3.msra.mxu0 %v1527_v6  ;;  %3035 = vmatpush3.msra.mxu1 %v1527_v6 }
  0xe2   : > { %2079 = vmatmul.mubr.f32.gmra.mxu0 %v3077_v25  ;;  %2304 = vmatmul.mubr.f32.gmra.mxu1 %v3703_v20  ;;  %v1524_v20 = vld [vmem:[%s4532_s3 + $0x440] sm:$0xff] }
  0xe3   : > { %2083 = vmatprep.mubr.f32.mxu0 %v3723_v36  ;;  %2308 = vmatprep.mubr.f32.mxu1 %v3080_v32  ;;  %v3082_v36 = vld [vmem:[#allocation2 + $0x91] sm:$0xff] }
  0xe4   : > { %2945 = vmatprep.subr.mxu0 %v1526_v10  ;;  %3020 = vmatprep.subr.mxu1 %v1526_v10 }
  0xe5   : > { %2946 = vmatpush3.msra.mxu0 %v1526_v10  ;;  %3036 = vmatpush3.msra.mxu1 %v1526_v10 }
  0xe6   : > { %2084 = vmatmul.mubr.f32.gmra.mxu0 %v3078_v28  ;;  %2309 = vmatmul.mubr.f32.gmra.mxu1 %v3719_v26  ;;  %v1523_v26 = vld [vmem:[%s4532_s3 + $0x438] sm:$0xff] }
  0xe7   : > { %2088 = vmatprep.mubr.f32.mxu0 %v3739_v37  ;;  %2313 = vmatprep.mubr.f32.mxu1 %v3081_v33  ;;  %v3083_v37 = vld [vmem:[#allocation2 + $0x99] sm:$0xff] }
  0xe8   : > { %2947 = vmatprep.subr.mxu0 %v1525_v15  ;;  %3021 = vmatprep.subr.mxu1 %v1525_v15 }
  0xe9   : > { %2948 = vmatpush3.msra.mxu0 %v1525_v15  ;;  %3037 = vmatpush3.msra.mxu1 %v1525_v15 }
  0xea   : > { %2089 = vmatmul.mubr.f32.gmra.mxu0 %v3079_v29  ;;  %2314 = vmatmul.mubr.f32.gmra.mxu1 %v3735_v35  ;;  %v1522_v35 = vld [vmem:[%s4532_s3 + $0x430] sm:$0xff] }
  0xeb   : > { %2093 = vmatprep.mubr.f32.mxu0 %v3755_v40  ;;  %2318 = vmatprep.mubr.f32.mxu1 %v3082_v36  ;;  %v3084_v40 = vld [vmem:[#allocation2 + $0xa9] sm:$0xff] }
  0xec   : > { %2949 = vmatprep.subr.mxu0 %v1524_v20  ;;  %3022 = vmatprep.subr.mxu1 %v1524_v20 }
  0xed   : > { %2950 = vmatpush3.msra.mxu0 %v1524_v20  ;;  %3038 = vmatpush3.msra.mxu1 %v1524_v20 }
  0xee   : > { %2094 = vmatmul.mubr.f32.gmra.mxu0 %v3080_v32  ;;  %2319 = vmatmul.mubr.f32.gmra.mxu1 %v3751_v42  ;;  %v1521_v42 = vld [vmem:[%s4532_s3 + $0x428] sm:$0xff] }
  0xef   : > { %2098 = vmatprep.mubr.f32.mxu0 %v3771_v43  ;;  %2323 = vmatprep.mubr.f32.mxu1 %v3083_v37  ;;  %v3085_v43 = vld [vmem:[#allocation2 + $0xb1] sm:$0xff] }
  0xf0   : > { %2951 = vmatprep.subr.mxu0 %v1523_v26  ;;  %3023 = vmatprep.subr.mxu1 %v1523_v26 }
  0xf1   : > { %2952 = vmatpush3.msra.mxu0 %v1523_v26  ;;  %3039 = vmatpush3.msra.mxu1 %v1523_v26 }
  0xf2   : > { %2099 = vmatmul.mubr.f32.gmra.mxu0 %v3081_v33  ;;  %2324 = vmatmul.mubr.f32.gmra.mxu1 %v3767_v48  ;;  %v1520_v48 = vld [vmem:[%s4532_s3 + $0x420] sm:$0xff] }
  0xf3   : > { %2103 = vmatprep.mubr.f32.mxu0 %v3787_v46  ;;  %2328 = vmatprep.mubr.f32.mxu1 %v3084_v40  ;;  %v3086_v46 = vld [vmem:[#allocation2 + $0xc1] sm:$0xff] }
  0xf4   : > { %2953 = vmatprep.subr.mxu0 %v1522_v35  ;;  %3024 = vmatprep.subr.mxu1 %v1522_v35 }
  0xf5   : > { %2954 = vmatpush3.msra.mxu0 %v1522_v35  ;;  %3040 = vmatpush3.msra.mxu1 %v1522_v35 }
  0xf6   : > { %2104 = vmatmul.mubr.f32.gmra.mxu0 %v3082_v36  ;;  %2329 = vmatmul.mubr.f32.gmra.mxu1 %v3783_v56  ;;  %v1519_v56 = vld [vmem:[%s4532_s3 + $0x418] sm:$0xff] }
  0xf7   : > { %2108 = vmatprep.mubr.f32.mxu0 %v3803_v51  ;;  %2333 = vmatprep.mubr.f32.mxu1 %v3085_v43  ;;  %v3087_v51 = vld [vmem:[#allocation2 + $0xc9] sm:$0xff] }
  0xf8   : > { %2955 = vmatprep.subr.mxu0 %v1521_v42  ;;  %3025 = vmatprep.subr.mxu1 %v1521_v42 }
  0xf9   : > { %2956 = vmatpush3.msra.mxu0 %v1521_v42  ;;  %3041 = vmatpush3.msra.mxu1 %v1521_v42 }
  0xfa   : > { %2109 = vmatmul.mubr.f32.gmra.mxu0 %v3083_v37  ;;  %2334 = vmatmul.mubr.f32.gmra.mxu1 %v3799_v63  ;;  %v1518_v63 = vld [vmem:[%s4532_s3 + $0x410] sm:$0xff] }
  0xfb   : > { %2113 = vmatprep.mubr.f32.mxu0 %v3819_v54  ;;  %2338 = vmatprep.mubr.f32.mxu1 %v3086_v46  ;;  %v3088_v54 = vld [vmem:[#allocation2 + $0xd9] sm:$0xff] }
  0xfc   : > { %2957 = vmatprep.subr.mxu0 %v1520_v48  ;;  %3026 = vmatprep.subr.mxu1 %v1520_v48 }
  0xfd   : > { %2958 = vmatpush3.msra.mxu0 %v1520_v48  ;;  %3042 = vmatpush3.msra.mxu1 %v1520_v48 }
  0xfe   : > { %2114 = vmatmul.mubr.f32.gmra.mxu0 %v3084_v40  ;;  %2339 = vmatmul.mubr.f32.gmra.mxu1 %v3815_v7  ;;  %v1517_v7 = vld [vmem:[%s4532_s3 + $0x408] sm:$0xff] }
  0xff   : > { %2118 = vmatprep.mubr.f32.mxu0 %v3835_v55  ;;  %2343 = vmatprep.mubr.f32.mxu1 %v3087_v51  ;;  %v3089_v55 = vld [vmem:[#allocation2 + $0xe1] sm:$0xff] }
 0x100   : > { %2959 = vmatprep.subr.mxu0 %v1519_v56  ;;  %3027 = vmatprep.subr.mxu1 %v1519_v56 }
 0x101   : > { %2960 = vmatpush3.msra.mxu0 %v1519_v56  ;;  %3043 = vmatpush3.msra.mxu1 %v1519_v56 }
 0x102   : > { %2119 = vmatmul.mubr.f32.gmra.mxu0 %v3085_v43  ;;  %2344 = vmatmul.mubr.f32.gmra.mxu1 %v3831_v13  ;;  %v1516_v13 = vld [vmem:[%s4532_s3 + $0x400] sm:$0xff] }
 0x103   : > { %2123 = vmatprep.mubr.f32.mxu0 %v3851_v58  ;;  %2348 = vmatprep.mubr.f32.mxu1 %v3088_v54  ;;  %v3090_v58 = vld [vmem:[#allocation2 + $0xf1] sm:$0xff] }
 0x104   : > { %2961 = vmatprep.subr.mxu0 %v1518_v63  ;;  %3028 = vmatprep.subr.mxu1 %v1518_v63 }
 0x105   : > { %2962 = vmatpush3.msra.mxu0 %v1518_v63  ;;  %3044 = vmatpush3.msra.mxu1 %v1518_v63 }
 0x106   : > { %2124 = vmatmul.mubr.f32.gmra.mxu0 %v3086_v46  ;;  %2349 = vmatmul.mubr.f32.gmra.mxu1 %v3847_v22  ;;  %v4191_v22 = vld [vmem:[%s4533_s4] ss:$0 sm:$0xff] }
 0x107   : > { %2128 = vmatprep.mubr.f32.mxu0 %v3867_v61  ;;  %2353 = vmatprep.mubr.f32.mxu1 %v3089_v55 }
 0x108   : > { %2963 = vmatprep.subr.mxu0 %v1517_v7  ;;  %3029 = vmatprep.subr.mxu1 %v1517_v7 }
 0x109   : > { %2964 = vmatpush3.msra.mxu0 %v1517_v7  ;;  %3045 = vmatpush3.msra.mxu1 %v1517_v7 }
 0x10a   : > { %2129 = vmatmul.mubr.f32.gmra.mxu0 %v3087_v51  ;;  %2354 = vmatmul.mubr.f32.gmra.mxu1 %v3863_v31 }
 0x10b   : > { %2133 = vmatprep.mubr.f32.mxu0 %v3883_v62  ;;  %2358 = vmatprep.mubr.f32.mxu1 %v3090_v58  ;;  %v3091_v62 = vld [vmem:[#allocation2 + $0xf9] sm:$0xff] }
 0x10c   : > { %2965 = vmatprep.subr.mxu0 %v1516_v13  ;;  %3030 = vmatprep.subr.mxu1 %v1516_v13 }
 0x10d   : > { %2966 = vmatpush3.msra.mxu0 %v1516_v13  ;;  %3046 = vmatpush3.msra.mxu1 %v1516_v13 }
 0x10e   : > { %v1605_v61 = vpop.f32.mrf.mxu0  ;;  %v1830_v12 = vpop.f32.mrf.mxu1  ;;  %2134 = vmatmul.mubr.f32.gmra.mxu0 %v3088_v54  ;;  %2359 = vmatmul.mubr.f32.gmra.mxu1 %v3879_v44  ;;  %v3092_v44 = vld [vmem:[#allocation2 + $0x109] sm:$0xff] }
 0x10f   : > { %v1606_v31 = vadd.f32 %v4191_v22, %v1605_v61  ;;  %2138 = vmatprep.mubr.f32.mxu0 %v3899_v1  ;;  %2363 = vmatprep.mubr.f32.mxu1 %v3091_v62 }
 0x110   : > { %v1607_v19 = vpop.f32.mrf.mxu0  ;;  %v1832_v49 = vpop.f32.mrf.mxu1 }
 0x111   : > { %v4196_v38 = vadd.f32 %v1830_v12, %v1606_v31 }
 0x112   : > { %v1610_v60 = vpop.f32.mrf.mxu0  ;;  %v1835_v5 = vpop.f32.mrf.mxu1  ;;  %2139 = vmatmul.mubr.f32.gmra.mxu0 %v3089_v55  ;;  %2364 = vmatmul.mubr.f32.gmra.mxu1 %v3895_v52  ;;  %v3093_v52 = vld [vmem:[#allocation2 + $0x111] sm:$0xff] }
 0x113   : > { %v1611_v57 = vadd.f32 %v4191_v22, %v1610_v60  ;;  %2143 = vmatprep.mubr.f32.mxu0 %v3915_v3  ;;  %2368 = vmatprep.mubr.f32.mxu1 %v3092_v44 }
 0x114   : > { %v1612_v53 = vpop.f32.mrf.mxu0  ;;  %v1837_v25 = vpop.f32.mrf.mxu1 }
 0x115   : > { %v4201_v1 = vadd.f32 %v1835_v5, %v1611_v57 }
 0x116   : > { %v1615_v0 = vpop.f32.mrf.mxu0  ;;  %v1840_v28 = vpop.f32.mrf.mxu1  ;;  %2144 = vmatmul.mubr.f32.gmra.mxu0 %v3090_v58  ;;  %2369 = vmatmul.mubr.f32.gmra.mxu1 %v3911_v4  ;;  %v3094_v4 = vld [vmem:[#allocation2 + $0x121] sm:$0xff] }
 0x117   : > { %v1616_v6 = vadd.f32 %v4191_v22, %v1615_v0  ;;  %2148 = vmatprep.mubr.f32.mxu0 %v3933_v8  ;;  %2373 = vmatprep.mubr.f32.mxu1 %v3093_v52  ;;  %v4542_v0 = vld [vmem:[#allocation5_spill] sm:$0xff] }
 0x118   : > { %v1617_v29 = vpop.f32.mrf.mxu0  ;;  %v1842_v10 = vpop.f32.mrf.mxu1 }
 0x119   : > { %v4206_v3 = vadd.f32 %v1840_v28, %v1616_v6 }
 0x11a   : > { %v1620_v32 = vpop.f32.mrf.mxu0  ;;  %v1845_v15 = vpop.f32.mrf.mxu1  ;;  %2149 = vmatmul.mubr.f32.gmra.mxu0 %v3091_v62  ;;  %2374 = vmatmul.mubr.f32.gmra.mxu1 %v3927_v2  ;;  %v3095_v2 = vld [vmem:[#allocation2 + $0x129] sm:$0xff] }
 0x11b   : > { %v1621_v33 = vadd.f32 %v4191_v22, %v1620_v32  ;;  %2153 = vmatprep.mubr.f32.mxu0 %v3949_v11  ;;  %2378 = vmatprep.mubr.f32.mxu1 %v3094_v4  ;;  %v4543_v32 = vld [vmem:[#allocation6_spill] sm:$0xff] }
 0x11c   : > { %v1622_v20 = vpop.f32.mrf.mxu0  ;;  %v1847_v36 = vpop.f32.mrf.mxu1 }
 0x11d   : > { %v4211_v8 = vadd.f32 %v1845_v15, %v1621_v33 }
 0x11e   : > { %v1625_v26 = vpop.f32.mrf.mxu0  ;;  %v1850_v37 = vpop.f32.mrf.mxu1  ;;  %2154 = vmatmul.mubr.f32.gmra.mxu0 %v3092_v44  ;;  %2379 = vmatmul.mubr.f32.gmra.mxu1 %v3945_v23  ;;  %v3096_v23 = vld [vmem:[#allocation2 + $0x139] sm:$0xff] }
 0x11f   : > { %v1626_v35 = vadd.f32 %v4191_v22, %v1625_v26  ;;  %2158 = vmatprep.mubr.f32.mxu0 %v3965_v14  ;;  %2383 = vmatprep.mubr.f32.mxu1 %v3095_v2 }
 0x120   : > { %v1627_v40 = vpop.f32.mrf.mxu0  ;;  %v1852_v42 = vpop.f32.mrf.mxu1 }
 0x121   : > { %v4216_v11 = vadd.f32 %v1850_v37, %v1626_v35 }
 0x122   : > { %v1630_v43 = vpop.f32.mrf.mxu0  ;;  %v1855_v48 = vpop.f32.mrf.mxu1  ;;  %2159 = vmatmul.mubr.f32.gmra.mxu0 %v3093_v52  ;;  %2384 = vmatmul.mubr.f32.gmra.mxu1 %v3961_v41  ;;  %v3097_v41 = vld [vmem:[#allocation2 + $0x141] sm:$0xff] }
 0x123   : > { %v1631_v46 = vadd.f32 %v4191_v22, %v1630_v43  ;;  %2163 = vmatprep.mubr.f32.mxu0 %v3981_v17  ;;  %2388 = vmatprep.mubr.f32.mxu1 %v3096_v23 }
 0x124   : > { %v1632_v56 = vpop.f32.mrf.mxu0  ;;  %v1857_v51 = vpop.f32.mrf.mxu1 }
 0x125   : > { %v4221_v14 = vadd.f32 %v1855_v48, %v1631_v46 }
 0x126   : > { %v1635_v63 = vpop.f32.mrf.mxu0  ;;  %v1860_v54 = vpop.f32.mrf.mxu1  ;;  %2164 = vmatmul.mubr.f32.gmra.mxu0 %v3094_v4  ;;  %2389 = vmatmul.mubr.f32.gmra.mxu1 %v3977_v59  ;;  %v3098_v59 = vld [vmem:[#allocation2 + $0x151] sm:$0xff] }
 0x127   : > { %v1636_v7 = vadd.f32 %v4191_v22, %v1635_v63  ;;  %2168 = vmatprep.mubr.f32.mxu0 %v3997_v18  ;;  %2393 = vmatprep.mubr.f32.mxu1 %v3097_v41 }
 0x128   : > { %v1637_v55 = vpop.f32.mrf.mxu0  ;;  %v1862_v13 = vpop.f32.mrf.mxu1 }
 0x129   : > { %v4226_v17 = vadd.f32 %v1860_v54, %v1636_v7 }
 0x12a   : > { %v1640_v58 = vpop.f32.mrf.mxu0  ;;  %v1865_v61 = vpop.f32.mrf.mxu1  ;;  %2169 = vmatmul.mubr.f32.gmra.mxu0 %v3095_v2  ;;  %2394 = vmatmul.mubr.f32.gmra.mxu1 %v3993_v9  ;;  %v3099_v9 = vld [vmem:[#allocation2 + $0x159] sm:$0xff] }
 0x12b   : > { %v1641_v12 = vadd.f32 %v4191_v22, %v1640_v58  ;;  %2173 = vmatprep.mubr.f32.mxu0 %v4013_v21  ;;  %2398 = vmatprep.mubr.f32.mxu1 %v3098_v59 }
 0x12c   : > { %v1642_v31 = vpop.f32.mrf.mxu0  ;;  %v1867_v62 = vpop.f32.mrf.mxu1 }
 0x12d   : > { %v4231_v18 = vadd.f32 %v1865_v61, %v1641_v12  ;;  %v1036_v31 = vld [vmem:[#allocation2 + $0x32] sm:$0xff] }
 0x12e   : > { %v1645_v19 = vpop.f32.mrf.mxu0  ;;  %v1870_v49 = vpop.f32.mrf.mxu1  ;;  %2174 = vmatmul.mubr.f32.gmra.mxu0 %v3096_v23  ;;  %2399 = vmatmul.mubr.f32.gmra.mxu1 %v4009_v30  ;;  %v3100_v30 = vld [vmem:[#allocation2 + $0x169] sm:$0xff]  ;;  %v1052_v62 = vld [vmem:[#allocation2 + $0xf2] sm:$0xff] }
 0x12f   : > { %v1646_v60 = vadd.f32 %v4191_v22, %v1645_v19  ;;  %2178 = vmatprep.mubr.f32.mxu0 %v4029_v24  ;;  %2403 = vmatprep.mubr.f32.mxu1 %v3099_v9 }
 0x130   : > { %v1647_v5 = vpop.f32.mrf.mxu0  ;;  %v1872_v57 = vpop.f32.mrf.mxu1 }
 0x131   : > { %v4236_v21 = vadd.f32 %v1870_v49, %v1646_v60  ;;  %v1037_v5 = vld [vmem:[#allocation2 + $0x3a] sm:$0xff] }
 0x132   : > { %v1650_v44 = vpop.f32.mrf.mxu0  ;;  %v1875_v53 = vpop.f32.mrf.mxu1  ;;  %2179 = vmatmul.mubr.f32.gmra.mxu0 %v3097_v41  ;;  %2404 = vmatmul.mubr.f32.gmra.mxu1 %v4025_v50  ;;  %v3101_v50 = vld [vmem:[#allocation2 + $0x171] sm:$0xff]  ;;  %v1053_v57 = vld [vmem:[#allocation2 + $0xfa] sm:$0xff] }
 0x133   : > { %v1651_v25 = vadd.f32 %v4191_v22, %v1650_v44  ;;  %2183 = vmatprep.mubr.f32.mxu0 %v4542_v0  ;;  %2408 = vmatprep.mubr.f32.mxu1 %v3100_v30  ;;  %v4264_v41 = vld [vmem:[#allocation2 + $0x18a] sm:$0xff] }
 0x134   : > { %v1652_v28 = vpop.f32.mrf.mxu0  ;;  %v1877_v6 = vpop.f32.mrf.mxu1  ;;  %v1054_v0 = vld [vmem:[#allocation2 + $0x10a] sm:$0xff] }
 0x135   : > { %v4241_v24 = vadd.f32 %v1875_v53, %v1651_v25  ;;  %v1038_v25 = vld [vmem:[#allocation2 + $0x4a] sm:$0xff] }
 0x136   : > { %v1655_v52 = vpop.f32.mrf.mxu0  ;;  %v1880_v29 = vpop.f32.mrf.mxu1  ;;  %2184 = vmatmul.mubr.f32.gmra.mxu0 %v3098_v59  ;;  %2409 = vmatmul.mubr.f32.gmra.mxu1 %v4041_v16  ;;  %v3102_v16 = vld [vmem:[#allocation2 + $0x181] sm:$0xff] }
 0x137   : > { %v1656_v10 = vadd.f32 %v4191_v22, %v1655_v52  ;;  %2188 = vmatprep.mubr.f32.mxu0 %v4543_v32  ;;  %2413 = vmatprep.mubr.f32.mxu1 %v3101_v50 }
 0x138   : > { %v1657_v15 = vpop.f32.mrf.mxu0  ;;  %v1882_v33 = vpop.f32.mrf.mxu1 }
 0x139   : > { %v4246_v4 = vadd.f32 %v1880_v29, %v1656_v10  ;;  %v1039_v29 = vld [vmem:[#allocation2 + $0x52] sm:$0xff]  ;;  %v1040_v15 = vld [vmem:[#allocation2 + $0x62] sm:$0xff] }
 0x13a   : > { %v1660_v20 = vpop.f32.mrf.mxu0  ;;  %v1885_v36 = vpop.f32.mrf.mxu1  ;;  %2189 = vmatmul.mubr.f32.gmra.mxu0 %v3099_v9  ;;  %2414 = vmatmul.mubr.f32.gmra.mxu1 %v4057_v47  ;;  %v3103_v47 = vld [vmem:[#allocation2 + $0x189] sm:$0xff]  ;;  %v1055_v10 = vld [vmem:[#allocation2 + $0x112] sm:$0xff] }
 0x13b   : > { %v1661_v26 = vadd.f32 %v4191_v22, %v1660_v20  ;;  %2193 = vmatprep.mubr.f32.mxu0 %v4077_v39  ;;  %2418 = vmatprep.mubr.f32.mxu1 %v3102_v16  ;;  %v4256_v39 = vld [vmem:[#allocation2 + $0x182] sm:$0xff] }
 0x13c   : > { %v1662_v37 = vpop.f32.mrf.mxu0  ;;  %v1887_v35 = vpop.f32.mrf.mxu1  ;;  %v1056_v33 = vld [vmem:[#allocation2 + $0x122] sm:$0xff] }
 0x13d   : > { %v4251_v2 = vadd.f32 %v1885_v36, %v1661_v26  ;;  %v1041_v37 = vld [vmem:[#allocation2 + $0x6a] sm:$0xff] }
 0x13e   : > { %v1665_v40 = vpop.f32.mrf.mxu0  ;;  %v1890_v42 = vpop.f32.mrf.mxu1  ;;  %2194 = vmatmul.mubr.f32.gmra.mxu0 %v3100_v30  ;;  %2419 = vmatmul.mubr.f32.gmra.mxu1 %v4073_v27  ;;  %v4544_v27 = vld [vmem:[#allocation4_spill] sm:$0xff] }
 0x13f   : > { %v1666_v43 = vadd.f32 %v4191_v22, %v1665_v40  ;;  %2198 = vmatprep.mubr.f32.mxu0 %v4093_v45  ;;  %2423 = vmatprep.mubr.f32.mxu1 %v3103_v47  ;;  %v938_v45 = vld [vmem:[#allocation2 + $0x198] sm:$0xff]  ;;  %v1057_v35 = vld [vmem:[#allocation2 + $0x12a] sm:$0xff] }
 0x140   : > { %v1667_v48 = vpop.f32.mrf.mxu0  ;;  %v1892_v46 = vpop.f32.mrf.mxu1 }
 0x141   : > { %v4258_v23 = vadd.f32 %v1890_v42, %v1666_v43  ;;  %v1042_v43 = vld [vmem:[#allocation2 + $0x7a] sm:$0xff] }
 0x142   : > { %v1670_v56 = vpop.f32.mrf.mxu0  ;;  %v1895_v51 = vpop.f32.mrf.mxu1  ;;  %2199 = vmatmul.mubr.f32.gmra.mxu0 %v3101_v50  ;;  %2424 = vmatmul.mubr.f32.gmra.mxu1 %v4089_v34  ;;  %v939_v34 = vld [vmem:[#allocation2 + $0x1a0] sm:$0xff] }
 0x143   : > { %v1671_v63 = vadd.f32 %v4191_v22, %v1670_v56  ;;  %2203 = vmatprep.mubr.f32.mxu0 %v4256_v39  ;;  %2428 = vmatprep.mubr.f32.mxu1 %v4544_v27 }
 0x144   : > { %v1672_v54 = vpop.f32.mrf.mxu0  ;;  %v1897_v7 = vpop.f32.mrf.mxu1 }
 0x145   : > { %v4266_v55 = vadd.f32 %v1895_v51, %v1671_v63  ;;  %v1043_v63 = vld [vmem:[#allocation2 + $0x82] sm:$0xff]  ;;  %v1044_v7 = vld [vmem:[#allocation2 + $0x92] sm:$0xff] }
 0x146   : > { %v1675_v13 = vpop.f32.mrf.mxu0  ;;  %v1900_v58 = vpop.f32.mrf.mxu1  ;;  %2204 = vmatmul.mubr.f32.gmra.mxu0 %v3102_v16  ;;  %2429 = vmatmul.mubr.f32.gmra.mxu1 %v938_v45 }
 0x147   : > { %v1676_v61 = vadd.f32 %v4191_v22, %v1675_v13  ;;  %2208 = vmatprep.mubr.f32.mxu0 %v4264_v41  ;;  %2433 = vmatprep.mubr.f32.mxu1 %v4544_v27  ;;  %v1059_v27 = vld [vmem:[#allocation2 + $0x142] sm:$0xff]  ;;  %v1060_v13 = vld [vmem:[#allocation2 + $0x152] sm:$0xff] }
 0x148   : > { %v1677_v12 = vpop.f32.mrf.mxu0  ;;  %v1902_v59 = vpop.f32.mrf.mxu1 }
 0x149   : > { %v4271_v19 = vadd.f32 %v1900_v58, %v1676_v61  ;;  %v1045_v59 = vld [vmem:[#allocation2 + $0x9a] sm:$0xff] }
 0x14a   : > { %v1680_v49 = vpop.f32.mrf.mxu0  ;;  %v1905_v60 = vpop.f32.mrf.mxu1  ;;  %2209 = vmatmul.mubr.f32.gmra.mxu0 %v3103_v47  ;;  %2434 = vmatmul.mubr.f32.gmra.mxu1 %v939_v34  ;;  %v1058_v47 = vld [vmem:[#allocation2 + $0x13a] sm:$0xff] }
 0x14b   : > { %v1681_v9 = vadd.f32 %v4191_v22, %v1680_v49  ;;  %2967 = vmatprep.mubr.f32.mxu0 %v1036_v31  ;;  %2991 = vmatprep.mubr.f32.mxu1 %v1052_v62  ;;  %v1061_v31 = vld [vmem:[#allocation2 + $0x15a] sm:$0xff] }
 0x14c   : > { %v1682_v44 = vpop.f32.mrf.mxu0  ;;  %v1907_v53 = vpop.f32.mrf.mxu1 }
 0x14d   : > { %v4274_v30 = vadd.f32 %v1905_v60, %v1681_v9  ;;  %v1046_v60 = vld [vmem:[#allocation2 + $0xaa] sm:$0xff] }
 0x14e   : > { %v1685_v28 = vpop.f32.mrf.mxu0  ;;  %v1910_v6 = vpop.f32.mrf.mxu1  ;;  %2968 = vmatmul.mubr.f32.vlgmr.msra.gmra.mxu0 %v1037_v5  ;;  %2992 = vmatmul.mubr.f32.vlgmr.msra.gmra.mxu1 %v1053_v57  ;;  %v1062_v9 = vld [vmem:[#allocation2 + $0x16a] sm:$0xff] }
 0x14f   : > { %v1686_v52 = vadd.f32 %v4191_v22, %v1685_v28  ;;  %2970 = vmatprep.mubr.f32.mxu0 %v1038_v25  ;;  %2994 = vmatprep.mubr.f32.mxu1 %v1054_v0  ;;  %v1047_v25 = vld [vmem:[#allocation2 + $0xb2] sm:$0xff] }
 0x150   : > { %v1687_v32 = vpop.f32.mrf.mxu0  ;;  %v1912_v50 = vpop.f32.mrf.mxu1  ;;  %v1063_v0 = vld [vmem:[#allocation2 + $0x172] sm:$0xff] }
 0x151   : > { %v4277_v20 = vadd.f32 %v1910_v6, %v1686_v52  ;;  %v1048_v52 = vld [vmem:[#allocation2 + $0xc2] sm:$0xff] }
 0x152   : > { %v1690_v36 = vpop.f32.mrf.mxu0  ;;  %v1915_v26 = vpop.f32.mrf.mxu1  ;;  %2971 = vmatmul.mubr.f32.gmra.mxu0 %v1039_v29  ;;  %2995 = vmatmul.mubr.f32.gmra.mxu1 %v1055_v10 }
 0x153   : > { %v1691_v16 = vadd.f32 %v4191_v22, %v1690_v36  ;;  %2973 = vmatprep.mubr.f32.mxu0 %v1040_v15  ;;  %2997 = vmatprep.mubr.f32.mxu1 %v1056_v33  ;;  %v1049_v15 = vld [vmem:[#allocation2 + $0xca] sm:$0xff] }
 0x154   : > { %v1692_v40 = vpop.f32.mrf.mxu0  ;;  %v1917_v42 = vpop.f32.mrf.mxu1 }
 0x155   : > { %v4280_v48 = vadd.f32 %v1915_v26, %v1691_v16  ;;  %v1050_v26 = vld [vmem:[#allocation2 + $0xda] sm:$0xff] }
 0x156   : > { %v1695_v46 = vpop.f32.mrf.mxu0  ;;  %v1920_v56 = vpop.f32.mrf.mxu1  ;;  %2974 = vmatmul.mubr.f32.gmra.mxu0 %v1041_v37  ;;  %2998 = vmatmul.mubr.f32.gmra.mxu1 %v1057_v35  ;;  %v1066_v16 = vld [vmem:[#allocation2 + $0x19a] sm:$0xff] }
 0x157   : > { %v1696_v51 = vadd.f32 %v4191_v22, %v1695_v46  ;;  %2976 = vmatprep.mubr.f32.mxu0 %v1042_v43  ;;  %3000 = vmatprep.mubr.f32.mxu1 %v1058_v47  ;;  %v1051_v43 = vld [vmem:[#allocation2 + $0xe2] sm:$0xff] }
 0x158   : > { %v1697_v45 = vpop.f32.mrf.mxu0  ;;  %v1922_v54 = vpop.f32.mrf.mxu1  ;;  %v1067_v47 = vld [vmem:[#allocation2 + $0x1a2] sm:$0xff] }
 0x159   : > { %v4283_v58 = vadd.f32 %v1920_v56, %v1696_v51 }
 0x15a   : > { %v1700_v61 = vpop.f32.mrf.mxu0  ;;  %v1925_v34 = vpop.f32.mrf.mxu1  ;;  %2977 = vmatmul.mubr.f32.gmra.mxu0 %v1043_v63  ;;  %3001 = vmatmul.mubr.f32.gmra.mxu1 %v1059_v27 }
 0x15b   : > { %v1701_v12 = vadd.f32 %v4191_v22, %v1700_v61  ;;  %2979 = vmatprep.mubr.f32.mxu0 %v1044_v7  ;;  %3003 = vmatprep.mubr.f32.mxu1 %v1060_v13 }
 0x15c   : > { %v1702_v62 = vpop.f32.mrf.mxu0  ;;  %v1927_v49 = vpop.f32.mrf.mxu1 }
 0x15d   : > { %v4286_v5 = vadd.f32 %v1925_v34, %v1701_v12 }
 0x15e   : > { %v1705_v57 = vpop.f32.mrf.mxu0  ;;  %v1930_v44 = vpop.f32.mrf.mxu1  ;;  %2980 = vmatmul.mubr.f32.gmra.mxu0 %v1045_v59  ;;  %3004 = vmatmul.mubr.f32.gmra.mxu1 %v1061_v31 }
 0x15f   : > { %v1706_v53 = vadd.f32 %v4191_v22, %v1705_v57  ;;  %2982 = vmatprep.mubr.f32.mxu0 %v1046_v60  ;;  %3006 = vmatprep.mubr.f32.mxu1 %v1062_v9 }
 0x160   : > { %v1707_v28 = vpop.f32.mrf.mxu0  ;;  %v1932_v6 = vpop.f32.mrf.mxu1 }
 0x161   : > { %v4289_v29 = vadd.f32 %v1930_v44, %v1706_v53 }
 0x162   : > { %v1710_v10 = vpop.f32.mrf.mxu0  ;;  %v1935_v32 = vpop.f32.mrf.mxu1  ;;  %2983 = vmatmul.mubr.f32.gmra.mxu0 %v1047_v25  ;;  %3007 = vmatmul.mubr.f32.gmra.mxu1 %v1063_v0 }
 0x163   : > { %v1711_v50 = vadd.f32 %v4191_v22, %v1710_v10  ;;  %2985 = vmatprep.mubr.f32.mxu0 %v1048_v52  ;;  %3009 = vmatprep.mubr.f32.mxu1 %v4256_v39 }
 0x164   : > { %v1712_v33 = vpop.f32.mrf.mxu0  ;;  %v1937_v36 = vpop.f32.mrf.mxu1 }
 0x165   : > { %v4293_v37 = vadd.f32 %v1935_v32, %v1711_v50 }
 0x166   : > { %v1715_v35 = vpop.f32.mrf.mxu0  ;;  %v1940_v40 = vpop.f32.mrf.mxu1  ;;  %2986 = vmatmul.mubr.f32.gmra.mxu0 %v1049_v15  ;;  %3010 = vmatmul.mubr.f32.gmra.mxu1 %v4264_v41 }
 0x167   : > { %v1716_v42 = vadd.f32 %v4191_v22, %v1715_v35  ;;  %2988 = vmatprep.mubr.f32.mxu0 %v1050_v26  ;;  %3012 = vmatprep.mubr.f32.mxu1 %v1066_v16 }
 0x168   : > { %v1717_v46 = vpop.f32.mrf.mxu0  ;;  %v1942_v39 = vpop.f32.mrf.mxu1 }
 0x169   : > { %v4297_v56 = vadd.f32 %v1940_v40, %v1716_v42 }
 0x16a   : > { %v1720_v51 = vpop.f32.mrf.mxu0  ;;  %v1945_v63 = vpop.f32.mrf.mxu1  ;;  %2989 = vmatmul.mubr.f32.gmra.mxu0 %v1051_v43  ;;  %3013 = vmatmul.mubr.f32.gmra.mxu1 %v1067_v47 }
 0x16b   : > { %v1721_v27 = vadd.f32 %v4191_v22, %v1720_v51 }
 0x16c   : > { %v1722_v45 = vpop.f32.mrf.mxu0  ;;  %v1947_v54 = vpop.f32.mrf.mxu1 }
 0x16d   : > { %v4300_v7 = vadd.f32 %v1945_v63, %v1721_v27 }
 0x16e   : > { %v1725_v41 = vpop.f32.mrf.mxu0  ;;  %v1950_v13 = vpop.f32.mrf.mxu1 }
 0x16f   : > { %v1726_v61 = vadd.f32 %v4191_v22, %v1725_v41 }
 0x170   : > { %v1727_v34 = vpop.f32.mrf.mxu0  ;;  %v1952_v12 = vpop.f32.mrf.mxu1 }
 0x171   : > { %v4303_v59 = vadd.f32 %v1950_v13, %v1726_v61 }
 0x172   : > { %v1730_v31 = vpop.f32.mrf.mxu0  ;;  %v1955_v62 = vpop.f32.mrf.mxu1 }
 0x173   : > { %v1731_v49 = vadd.f32 %v4191_v22, %v1730_v31 }
 0x174   : > { %v1732_v60 = vpop.f32.mrf.mxu0  ;;  %v1957_v9 = vpop.f32.mrf.mxu1 }
 0x175   : > { %v4306_v57 = vadd.f32 %v1955_v62, %v1731_v49 }
 0x176   : > { %v1735_v44 = vpop.f32.mrf.mxu0  ;;  %v1960_v53 = vpop.f32.mrf.mxu1 }
 0x177   : > { %v1736_v25 = vadd.f32 %v4191_v22, %v1735_v44 }
 0x178   : > { %v1737_v0 = vpop.f32.mrf.mxu0  ;;  %v1962_v28 = vpop.f32.mrf.mxu1 }
 0x179   : > { %v4309_v6 = vadd.f32 %v1960_v53, %v1736_v25 }
 0x17a   : > { %v1740_v52 = vpop.f32.mrf.mxu0  ;;  %v1965_v10 = vpop.f32.mrf.mxu1 }
 0x17b   : > { %v1741_v32 = vadd.f32 %v4191_v22, %v1740_v52 }
 0x17c   : > { %v1742_v50 = vpop.f32.mrf.mxu0  ;;  %v1967_v15 = vpop.f32.mrf.mxu1 }
 0x17d   : > { %v4312_v33 = vadd.f32 %v1965_v10, %v1741_v32 }
 0x17e   : > { %v1745_v36 = vpop.f32.mrf.mxu0  ;;  %v1970_v26 = vpop.f32.mrf.mxu1 }
 0x17f   : > { %v1746_v16 = vadd.f32 %v4191_v22, %v1745_v36 }
 0x180   : > { %v1747_v35 = vpop.f32.mrf.mxu0  ;;  %v1972_v40 = vpop.f32.mrf.mxu1 }
 0x181   : > { %v4315_v42 = vadd.f32 %v1970_v26, %v1746_v16 }
 0x182   : > { %v1750_v43 = vpop.f32.mrf.mxu0  ;;  %v1975_v47 = vpop.f32.mrf.mxu1 }
 0x183   : > { %v1751_v46 = vadd.f32 %v4191_v22, %v1750_v43 }
 0x184   : > { %v1752_v39 = vpop.f32.mrf.mxu0  ;;  %v1977_v51 = vpop.f32.mrf.mxu1 }
 0x185   : > { %v4318_v63 = vadd.f32 %v1975_v47, %v1751_v46 }
 0x186   : > { %v1755_v27 = vpop.f32.mrf.mxu0  ;;  %v1980_v45 = vpop.f32.mrf.mxu1 }
 0x187   : > { %v1756_v54 = vadd.f32 %v4191_v22, %v1755_v27 }
 0x188   : > { %v1757_v41 = vpop.f32.mrf.mxu0  ;;  %v1982_v13 = vpop.f32.mrf.mxu1 }
 0x189   : > { %v4321_v61 = vadd.f32 %v1980_v45, %v1756_v54 }
 0x18a   : > { %v1760_v34 = vpop.f32.mrf.mxu0  ;;  %v1985_v12 = vpop.f32.mrf.mxu1 }
 0x18b   : > { %4545 = vst [vmem:[#allocation5_spill] sm:$0xff] %v4321_v61  ;;  %v1761_v31 = vadd.f32 %v4191_v22, %v1760_v34 }
 0x18c   : > { %v1762_v62 = vpop.f32.mrf.mxu0  ;;  %v1987_v49 = vpop.f32.mrf.mxu1 }
 0x18d   : > { %v4324_v60 = vadd.f32 %v1985_v12, %v1761_v31 }
 0x18e   : > { %v2055_v9 = vpop.f32.mrf.mxu0  ;;  %v2280_v44 = vpop.f32.mrf.mxu1 }
 0x18f   : > { %4546 = vst [vmem:[#allocation6_spill] sm:$0xff] %v4324_v60  ;;  %v2056_v53 = vadd.f32 %v2055_v9, %v4196_v38 }
 0x190   : > { %v2057_v25 = vpop.f32.mrf.mxu0  ;;  %v2282_v0 = vpop.f32.mrf.mxu1 }
 0x191   : > { %v4327_v28 = vadd.f32 %v2280_v44, %v2056_v53 }
 0x192   : > { %v2060_v52 = vpop.f32.mrf.mxu0  ;;  %v2285_v10 = vpop.f32.mrf.mxu1 }
 0x193   : > { %v2061_v32 = vadd.f32 %v2060_v52, %v4201_v1 }
 0x194   : > { %v2062_v50 = vpop.f32.mrf.mxu0  ;;  %v2287_v15 = vpop.f32.mrf.mxu1 }
 0x195   : > { %v4330_v36 = vadd.f32 %v2285_v10, %v2061_v32 }
 0x196   : > { %v2065_v22 = vpop.f32.mrf.mxu0  ;;  %v2290_v26 = vpop.f32.mrf.mxu1 }
 0x197   : > { %v2066_v16 = vadd.f32 %v2065_v22, %v4206_v3 }
 0x198   : > { %v2067_v35 = vpop.f32.mrf.mxu0  ;;  %v2292_v40 = vpop.f32.mrf.mxu1 }
 0x199   : > { %v4333_v43 = vadd.f32 %v2290_v26, %v2066_v16 }
 0x19a   : > { %v2070_v38 = vpop.f32.mrf.mxu0  ;;  %v2295_v47 = vpop.f32.mrf.mxu1 }
 0x19b   : > { %v2071_v46 = vadd.f32 %v2070_v38, %v4211_v8 }
 0x19c   : > { %v2072_v39 = vpop.f32.mrf.mxu0  ;;  %v2297_v51 = vpop.f32.mrf.mxu1 }
 0x19d   : > { %v4336_v27 = vadd.f32 %v2295_v47, %v2071_v46 }
 0x19e   : > { %v2075_v1 = vpop.f32.mrf.mxu0  ;;  %v2300_v45 = vpop.f32.mrf.mxu1 }
 0x19f   : > { %v2076_v54 = vadd.f32 %v2075_v1, %v4216_v11 }
 0x1a0   : > { %v2077_v41 = vpop.f32.mrf.mxu0  ;;  %v2302_v13 = vpop.f32.mrf.mxu1 }
 0x1a1   : > { %v4339_v34 = vadd.f32 %v2300_v45, %v2076_v54 }
 0x1a2   : > { %v2080_v3 = vpop.f32.mrf.mxu0  ;;  %v2305_v12 = vpop.f32.mrf.mxu1 }
 0x1a3   : > { %v2081_v31 = vadd.f32 %v2080_v3, %v4221_v14 }
 0x1a4   : > { %v2082_v62 = vpop.f32.mrf.mxu0  ;;  %v2307_v49 = vpop.f32.mrf.mxu1 }
 0x1a5   : > { %v4342_v9 = vadd.f32 %v2305_v12, %v2081_v31 }
 0x1a6   : > { %v2085_v8 = vpop.f32.mrf.mxu0  ;;  %v2310_v44 = vpop.f32.mrf.mxu1 }
 0x1a7   : > { %v2086_v53 = vadd.f32 %v2085_v8, %v4226_v17 }
 0x1a8   : > { %v2087_v25 = vpop.f32.mrf.mxu0  ;;  %v2312_v0 = vpop.f32.mrf.mxu1 }
 0x1a9   : > { %v4345_v52 = vadd.f32 %v2310_v44, %v2086_v53 }
 0x1aa   : > { %v2090_v11 = vpop.f32.mrf.mxu0  ;;  %v2315_v10 = vpop.f32.mrf.mxu1 }
 0x1ab   : > { %v2091_v32 = vadd.f32 %v2090_v11, %v4231_v18 }
 0x1ac   : > { %v2092_v50 = vpop.f32.mrf.mxu0  ;;  %v2317_v15 = vpop.f32.mrf.mxu1 }
 0x1ad   : > { %v4348_v22 = vadd.f32 %v2315_v10, %v2091_v32 }
 0x1ae   : > { %v2095_v14 = vpop.f32.mrf.mxu0  ;;  %v2320_v26 = vpop.f32.mrf.mxu1 }
 0x1af   : > { %v2096_v16 = vadd.f32 %v2095_v14, %v4236_v21 }
 0x1b0   : > { %v2097_v35 = vpop.f32.mrf.mxu0  ;;  %v2322_v40 = vpop.f32.mrf.mxu1 }
 0x1b1   : > { %v4351_v38 = vadd.f32 %v2320_v26, %v2096_v16 }
 0x1b2   : > { %v2100_v17 = vpop.f32.mrf.mxu0  ;;  %v2325_v47 = vpop.f32.mrf.mxu1 }
 0x1b3   : > { %v2101_v46 = vadd.f32 %v2100_v17, %v4241_v24 }
 0x1b4   : > { %v2102_v39 = vpop.f32.mrf.mxu0  ;;  %v2327_v51 = vpop.f32.mrf.mxu1 }
 0x1b5   : > { %v4354_v1 = vadd.f32 %v2325_v47, %v2101_v46 }
 0x1b6   : > { %v2105_v18 = vpop.f32.mrf.mxu0  ;;  %v2330_v45 = vpop.f32.mrf.mxu1 }
 0x1b7   : > { %v2106_v54 = vadd.f32 %v2105_v18, %v4246_v4 }
 0x1b8   : > { %v2107_v41 = vpop.f32.mrf.mxu0  ;;  %v2332_v13 = vpop.f32.mrf.mxu1 }
 0x1b9   : > { %v4357_v3 = vadd.f32 %v2330_v45, %v2106_v54 }
 0x1ba   : > { %v2110_v21 = vpop.f32.mrf.mxu0  ;;  %v2335_v12 = vpop.f32.mrf.mxu1 }
 0x1bb   : > { %4547 = vst [vmem:[#allocation4_spill] sm:$0xff] %v4357_v3  ;;  %v2111_v31 = vadd.f32 %v2110_v21, %v4251_v2 }
 0x1bc   : > { %v2112_v62 = vpop.f32.mrf.mxu0  ;;  %v2337_v49 = vpop.f32.mrf.mxu1 }
 0x1bd   : > { %v4360_v8 = vadd.f32 %v2335_v12, %v2111_v31 }
 0x1be   : > { %v2115_v24 = vpop.f32.mrf.mxu0  ;;  %v2340_v44 = vpop.f32.mrf.mxu1 }
 0x1bf   : > { %v2116_v53 = vadd.f32 %v2115_v24, %v4258_v23 }
 0x1c0   : > { %v2117_v25 = vpop.f32.mrf.mxu0  ;;  %v2342_v0 = vpop.f32.mrf.mxu1 }
 0x1c1   : > { %v4363_v11 = vadd.f32 %v2340_v44, %v2116_v53 }
 0x1c2   : > { %v2120_v4 = vpop.f32.mrf.mxu0  ;;  %v2345_v10 = vpop.f32.mrf.mxu1 }
 0x1c3   : > { %4548 = vst [vmem:[#allocation7_spill] sm:$0xff] %v4363_v11  ;;  %v2121_v32 = vadd.f32 %v2120_v4, %v4266_v55 }
 0x1c4   : > { %v2122_v50 = vpop.f32.mrf.mxu0  ;;  %v2347_v15 = vpop.f32.mrf.mxu1 }
 0x1c5   : > { %v4366_v14 = vadd.f32 %v2345_v10, %v2121_v32 }
 0x1c6   : > { %v2125_v2 = vpop.f32.mrf.mxu0  ;;  %v2350_v26 = vpop.f32.mrf.mxu1 }
 0x1c7   : > { %4549 = vst [vmem:[#allocation8_spill] sm:$0xff] %v4366_v14  ;;  %v2126_v16 = vadd.f32 %v2125_v2, %v4271_v19 }
 0x1c8   : > { %v2127_v35 = vpop.f32.mrf.mxu0  ;;  %v2352_v40 = vpop.f32.mrf.mxu1 }
 0x1c9   : > { %v4369_v17 = vadd.f32 %v2350_v26, %v2126_v16 }
 0x1ca   : > { %v2130_v23 = vpop.f32.mrf.mxu0  ;;  %v2355_v47 = vpop.f32.mrf.mxu1 }
 0x1cb   : > { %4550 = vst [vmem:[#allocation9_spill] sm:$0xff] %v4369_v17  ;;  %v2131_v46 = vadd.f32 %v2130_v23, %v4274_v30 }
 0x1cc   : > { %v2132_v39 = vpop.f32.mrf.mxu0  ;;  %v2357_v51 = vpop.f32.mrf.mxu1 }
 0x1cd   : > { %v4372_v18 = vadd.f32 %v2355_v47, %v2131_v46 }
 0x1ce   : > { %v2135_v55 = vpop.f32.mrf.mxu0  ;;  %v2360_v45 = vpop.f32.mrf.mxu1 }
 0x1cf   : > { %4551 = vst [vmem:[#allocation10_spill] sm:$0xff] %v4372_v18  ;;  %v2136_v54 = vadd.f32 %v2135_v55, %v4277_v20 }
 0x1d0   : > { %v2137_v41 = vpop.f32.mrf.mxu0  ;;  %v2362_v13 = vpop.f32.mrf.mxu1 }
 0x1d1   : > { %v4375_v21 = vadd.f32 %v2360_v45, %v2136_v54 }
 0x1d2   : > { %v2140_v19 = vpop.f32.mrf.mxu0  ;;  %v2365_v12 = vpop.f32.mrf.mxu1 }
 0x1d4   : > { %v2142_v31 = vpop.f32.mrf.mxu0  ;;  %v2367_v62 = vpop.f32.mrf.mxu1 }
 0x1d6   : > { %v2145_v49 = vpop.f32.mrf.mxu0  ;;  %v4377_v24 = vpop.f32.mrf.mxu1 }
 0x1d8   : > { %v2147_v30 = vpop.f32.mrf.mxu0  ;;  %v2372_v44 = vpop.f32.mrf.mxu1 }
 0x1da   : > { %v2150_v53 = vpop.f32.mrf.mxu0  ;;  %v2375_v25 = vpop.f32.mrf.mxu1 }
 0x1dc   : > { %v2152_v0 = vpop.f32.mrf.mxu0  ;;  %v2377_v4 = vpop.f32.mrf.mxu1 }
 0x1de   : > { %v4379_v10 = vpop.f32.mrf.mxu0  ;;  %v4381_v20 = vpop.f32.mrf.mxu1 }
 0x1e0   : > { %v2157_v32 = vpop.f32.mrf.mxu0  ;;  %v2382_v50 = vpop.f32.mrf.mxu1 }
 0x1e2   : > { %v2160_v15 = vpop.f32.mrf.mxu0  ;;  %v4383_v2 = vpop.f32.mrf.mxu1 }
 0x1e4   : > { %v2162_v26 = vpop.f32.mrf.mxu0  ;;  %v2387_v16 = vpop.f32.mrf.mxu1 }
 0x1e6   : > { %v4385_v35 = vpop.f32.mrf.mxu0  ;;  %v4387_v40 = vpop.f32.mrf.mxu1 }
 0x1e8   : > { %v2167_v23 = vpop.f32.mrf.mxu0  ;;  %v2392_v47 = vpop.f32.mrf.mxu1 }
 0x1ea   : > { %v4389_v46 = vpop.f32.mrf.mxu0  ;;  %v4391_v39 = vpop.f32.mrf.mxu1 }
 0x1ec   : > { %v2172_v51 = vpop.f32.mrf.mxu0  ;;  %v2397_v55 = vpop.f32.mrf.mxu1 }
 0x1ee   : > { %v4393_v45 = vpop.f32.mrf.mxu0  ;;  %v4395_v54 = vpop.f32.mrf.mxu1 }
 0x1f0   : > { %v2177_v41 = vpop.f32.mrf.mxu0  ;;  %v2402_v13 = vpop.f32.mrf.mxu1 }
 0x1f2   : > { %v4397_v31 = vpop.f32.mrf.mxu0  ;;  %v4399_v62 = vpop.f32.mrf.mxu1 }
 0x1f4   : > { %v2182_v30 = vpop.f32.mrf.mxu0  ;;  %v2407_v44 = vpop.f32.mrf.mxu1 }
 0x1f6   : > { %v4401_v0 = vpop.f32.mrf.mxu0  ;;  %v4403_v4 = vpop.f32.mrf.mxu1 }
 0x1f8   : > { %v2187_v32 = vpop.f32.mrf.mxu0  ;;  %v2412_v50 = vpop.f32.mrf.mxu1 }
 0x1fa   : > { %v4405_v26 = vpop.f32.mrf.mxu0  ;;  %v4407_v16 = vpop.f32.mrf.mxu1 }
 0x1fc   : > { %v2192_v23 = vpop.f32.mrf.mxu0  ;;  %v2417_v47 = vpop.f32.mrf.mxu1 }
 0x1fd   : > { %v2141_v47 = vadd.f32 %v2140_v19, %v4280_v48 }
 0x1fe   : > { %v4409_v51 = vpop.f32.mrf.mxu0  ;;  %v4411_v55 = vpop.f32.mrf.mxu1 }
 0x1ff   : > { %4552 = vst [vmem:[#allocation11_spill] sm:$0xff] %v4411_v55  ;;  %v2366_v3 = vadd.f32 %v2365_v12, %v2141_v47 }
 0x200   : > { %v2197_v41 = vpop.f32.mrf.mxu0  ;;  %v2422_v13 = vpop.f32.mrf.mxu1 }
 0x201   : > { %v2151_v41 = vadd.f32 %v2150_v53, %v4286_v5 }
 0x202   : > { %v4413_v30 = vpop.f32.mrf.mxu0  ;;  %v4415_v44 = vpop.f32.mrf.mxu1 }
 0x203   : > { %v2376_v60 = vadd.f32 %v2375_v25, %v2151_v41 }
 0x204   : > { %v2202_v17 = vpop.f32.mrf.mxu0  ;;  %v2427_v18 = vpop.f32.mrf.mxu1 }
 0x205   : > { %v2146_v17 = vadd.f32 %v2145_v49, %v4283_v58 }
 0x206   : > { %v4417_v32 = vpop.f32.mrf.mxu0  ;;  %v4419_v50 = vpop.f32.mrf.mxu1 }
 0x207   : > { %4553 = vst [vmem:[#allocation12_spill] sm:$0xff] %v4417_v32  ;;  %4554 = vst [vmem:[#allocation13_spill] sm:$0xff] %v4419_v50 }
 0x208   : > { %v2207_v11 = vpop.f32.mrf.mxu0  ;;  %v2432_v23 = vpop.f32.mrf.mxu1 }
 0x209   : > { %v2161_v23 = vadd.f32 %v2160_v15, %v4293_v37  ;;  %v2371_v37 = vadd.f32 %v4377_v24, %v2146_v17 }
 0x20a   : > { %v4422_v14 = vpop.f32.mrf.mxu0  ;;  %v4424_v61 = vpop.f32.mrf.mxu1 }
 0x20c   : > { %v2212_v13 = vpop.f32.mrf.mxu0  ;;  %v2437_v55 = vpop.f32.mrf.mxu1 }
 0x20e   : > { %v2969_v18 = vpop.f32.mrf.mxu0  ;;  %v2993_v32 = vpop.f32.mrf.mxu1 }
 0x20f   : > { %v2511_v50 = vadd.f32 %v2969_v18, %v4330_v36  ;;  %v2591_v11 = vadd.f32 %v2993_v32, %v2366_v3  ;;  %v2156_v3 = vadd.f32 %v4379_v10, %v4289_v29 }
 0x210   : > { %v2505_v48 = vpop.f32.mrf.mxu0  ;;  %v2585_v5 = vpop.f32.mrf.mxu1 }
 0x211   : > { %v2665_v19 = vmax.f32 %v2511_v50, 0.0  ;;  %v2681_v58 = vmax.f32 %v2591_v11, 0.0  ;;  %v2506_v12 = vadd.f32 %v2505_v48, %v4327_v28  ;;  %v2586_v36 = vadd.f32 %v2585_v5, %v4375_v21 }
 0x212   : > { %v2972_v49 = vpop.f32.mrf.mxu0  ;;  %v2996_v53 = vpop.f32.mrf.mxu1  ;;  %v2386_v28 = vadd.f32 %v4383_v2, %v2161_v23  ;;  %v2171_v21 = vadd.f32 %v4389_v46, %v4300_v7  ;;  %v2181_v11 = vadd.f32 %v4397_v31, %v4306_v57 }
 0x213   : > { %2697 = vst [vmem:[%s4435_s7 + $0x8] sm:$0xff] %v2665_v19  ;;  %2713 = vst [vmem:[%s4435_s7 + $0x88] sm:$0xff] %v2681_v58  ;;  %v2664_v25 = vmax.f32 %v2506_v12, 0.0  ;;  %v2680_v15 = vmax.f32 %v2586_v36, 0.0  ;;  %v2521_v55 = vadd.f32 %v2972_v49, %v4336_v27  ;;  %v2601_v32 = vadd.f32 %v2996_v53, %v2376_v60 }
 0x214   : > { %v2515_v24 = vpop.f32.mrf.mxu0  ;;  %v2595_v50 = vpop.f32.mrf.mxu1  ;;  %v2381_v27 = vadd.f32 %v4381_v20, %v2156_v3  ;;  %v2166_v60 = vadd.f32 %v4385_v35, %v4297_v56  ;;  %v2176_v19 = vadd.f32 %v4393_v45, %v4303_v59 }
 0x215   : > { %2696 = vst [vmem:[%s4435_s7] sm:$0xff] %v2664_v25  ;;  %2712 = vst [vmem:[%s4435_s7 + $0x80] sm:$0xff] %v2680_v15  ;;  %v2667_v29 = vmax.f32 %v2521_v55, 0.0  ;;  %v2683_v10 = vmax.f32 %v2601_v32, 0.0  ;;  %v2516_v47 = vadd.f32 %v2515_v24, %v4333_v43  ;;  %v2596_v41 = vadd.f32 %v2595_v50, %v2371_v37 }
 0x216   : > { %v2975_v2 = vpop.f32.mrf.mxu0  ;;  %v2999_v13 = vpop.f32.mrf.mxu1  ;;  %v2396_v43 = vadd.f32 %v4391_v39, %v2171_v21  ;;  %v2191_v37 = vadd.f32 %v4405_v26, %v4312_v33  ;;  %v2186_v25 = vadd.f32 %v4401_v0, %v4309_v6 }
 0x217   : > { %2699 = vst [vmem:[%s4435_s7 + $0x18] sm:$0xff] %v2667_v29  ;;  %2715 = vst [vmem:[%s4435_s7 + $0x98] sm:$0xff] %v2683_v10  ;;  %v2666_v7 = vmax.f32 %v2516_v47, 0.0  ;;  %v2682_v46 = vmax.f32 %v2596_v41, 0.0  ;;  %v2531_v17 = vadd.f32 %v2975_v2, %v4342_v9  ;;  %v2611_v18 = vadd.f32 %v2999_v13, %v2386_v28  ;;  %v4556_v13 = vld [vmem:[#allocation4_spill] sm:$0xff] }
 0x218   : > { %v2525_v20 = vpop.f32.mrf.mxu0  ;;  %v2605_v23 = vpop.f32.mrf.mxu1  ;;  %v2391_v9 = vadd.f32 %v4387_v40, %v2166_v60  ;;  %v2201_v28 = vadd.f32 %v4413_v30, %v4318_v63  ;;  %v2196_v29 = vadd.f32 %v4409_v51, %v4315_v42 }
 0x219   : > { %2698 = vst [vmem:[%s4435_s7 + $0x10] sm:$0xff] %v2666_v7  ;;  %2714 = vst [vmem:[%s4435_s7 + $0x90] sm:$0xff] %v2682_v46  ;;  %v2669_v56 = vmax.f32 %v2531_v17, 0.0  ;;  %v2685_v35 = vmax.f32 %v2611_v18, 0.0  ;;  %v2526_v48 = vadd.f32 %v2525_v20, %v4339_v34  ;;  %v2606_v5 = vadd.f32 %v2605_v23, %v2381_v27  ;;  %v4555_v27 = vld [vmem:[#allocation6_spill] sm:$0xff]  ;;  %v4558_v18 = vld [vmem:[#allocation5_spill] sm:$0xff] }
 0x21a   : > { %v2978_v39 = vpop.f32.mrf.mxu0  ;;  %v3002_v58 = vpop.f32.mrf.mxu1  ;;  %v2406_v34 = vadd.f32 %v4399_v62, %v2181_v11  ;;  %v2211_v60 = vadd.f32 %v4422_v14, %v4555_v27 }
 0x21b   : > { %2701 = vst [vmem:[%s4435_s7 + $0x28] sm:$0xff] %v2669_v56  ;;  %2717 = vst [vmem:[%s4435_s7 + $0xa8] sm:$0xff] %v2685_v35  ;;  %v2668_v57 = vmax.f32 %v2526_v48, 0.0  ;;  %v2684_v31 = vmax.f32 %v2606_v5, 0.0  ;;  %v2541_v12 = vadd.f32 %v2978_v39, %v4348_v22  ;;  %v2621_v36 = vadd.f32 %v3002_v58, %v2396_v43  ;;  %v4559_v43 = vld [vmem:[#allocation12_spill] sm:$0xff] }
 0x21c   : > { %v2535_v40 = vpop.f32.mrf.mxu0  ;;  %v2615_v3 = vpop.f32.mrf.mxu1  ;;  %v2401_v22 = vadd.f32 %v4395_v54, %v2176_v19  ;;  %v2206_v11 = vadd.f32 %v4559_v43, %v4558_v18  ;;  %v4560_v56 = vld [vmem:[#allocation8_spill] sm:$0xff]  ;;  %v2436_v5 = vadd.f32 %v4424_v61, %v2211_v60 }
 0x21d   : > { %2700 = vst [vmem:[%s4435_s7 + $0x20] sm:$0xff] %v2668_v57  ;;  %2716 = vst [vmem:[%s4435_s7 + $0xa0] sm:$0xff] %v2684_v31  ;;  %v2671_v59 = vmax.f32 %v2541_v12, 0.0  ;;  %v2687_v45 = vmax.f32 %v2621_v36, 0.0  ;;  %v2536_v49 = vadd.f32 %v2535_v40, %v4345_v52  ;;  %v2616_v53 = vadd.f32 %v2615_v3, %v2391_v9  ;;  %v4561_v57 = vld [vmem:[#allocation7_spill] sm:$0xff]  ;;  %v4562_v36 = vld [vmem:[#allocation13_spill] sm:$0xff] }
 0x21e   : > { %v2981_v62 = vpop.f32.mrf.mxu0  ;;  %v3005_v15 = vpop.f32.mrf.mxu1  ;;  %v2416_v52 = vadd.f32 %v4407_v16, %v2191_v37 }
 0x21f   : > { %2703 = vst [vmem:[%s4435_s7 + $0x38] sm:$0xff] %v2671_v59  ;;  %2719 = vst [vmem:[%s4435_s7 + $0xb8] sm:$0xff] %v2687_v45  ;;  %v2670_v33 = vmax.f32 %v2536_v49, 0.0  ;;  %v2686_v26 = vmax.f32 %v2616_v53, 0.0  ;;  %v2551_v55 = vadd.f32 %v2981_v62, %v4354_v1  ;;  %v2631_v32 = vadd.f32 %v3005_v15, %v2406_v34  ;;  %v4563_v59 = vld [vmem:[#allocation10_spill] sm:$0xff]  ;;  %v4564_v15 = vld [vmem:[#allocation9_spill] sm:$0xff] }
 0x220   : > { %v2545_v54 = vpop.f32.mrf.mxu0  ;;  %v2625_v21 = vpop.f32.mrf.mxu1  ;;  %v2411_v1 = vadd.f32 %v4403_v4, %v2186_v25  ;;  %v2431_v34 = vadd.f32 %v4562_v36, %v2206_v11 }
 0x221   : > { %2702 = vst [vmem:[%s4435_s7 + $0x30] sm:$0xff] %v2670_v33  ;;  %2718 = vst [vmem:[%s4435_s7 + $0xb0] sm:$0xff] %v2686_v26  ;;  %v2673_v6 = vmax.f32 %v2551_v55, 0.0  ;;  %v2689_v0 = vmax.f32 %v2631_v32, 0.0  ;;  %v2546_v24 = vadd.f32 %v2545_v54, %v4351_v38  ;;  %v2626_v50 = vadd.f32 %v2625_v21, %v2401_v22 }
 0x222   : > { %v2984_v16 = vpop.f32.mrf.mxu0  ;;  %v3008_v10 = vpop.f32.mrf.mxu1  ;;  %v2426_v38 = vadd.f32 %v4415_v44, %v2201_v28 }
 0x223   : > { %2705 = vst [vmem:[%s4435_s7 + $0x48] sm:$0xff] %v2673_v6  ;;  %2721 = vst [vmem:[%s4435_s7 + $0xc8] sm:$0xff] %v2689_v0  ;;  %v2672_v63 = vmax.f32 %v2546_v24, 0.0  ;;  %v2688_v30 = vmax.f32 %v2626_v50, 0.0  ;;  %v2561_v47 = vadd.f32 %v2984_v16, %v4360_v8  ;;  %v2641_v41 = vadd.f32 %v3008_v10, %v2416_v52  ;;  %v4557_v8 = vld [vmem:[#allocation11_spill] sm:$0xff] }
 0x224   : > { %v2555_v4 = vpop.f32.mrf.mxu0  ;;  %v2635_v2 = vpop.f32.mrf.mxu1  ;;  %v2421_v17 = vadd.f32 %v4557_v8, %v2196_v29 }
 0x225   : > { %2704 = vst [vmem:[%s4435_s7 + $0x40] sm:$0xff] %v2672_v63  ;;  %2720 = vst [vmem:[%s4435_s7 + $0xc0] sm:$0xff] %v2688_v30  ;;  %v2675_v42 = vmax.f32 %v2561_v47, 0.0  ;;  %v2691_v51 = vmax.f32 %v2641_v41, 0.0  ;;  %v2556_v7 = vadd.f32 %v2555_v4, %v4556_v13  ;;  %v2636_v46 = vadd.f32 %v2635_v2, %v2411_v1 }
 0x226   : > { %v2987_v44 = vpop.f32.mrf.mxu0  ;;  %v3011_v20 = vpop.f32.mrf.mxu1 }
 0x227   : > { %2707 = vst [vmem:[%s4435_s7 + $0x58] sm:$0xff] %v2675_v42  ;;  %2723 = vst [vmem:[%s4435_s7 + $0xd8] sm:$0xff] %v2691_v51  ;;  %v2674_v14 = vmax.f32 %v2556_v7, 0.0  ;;  %v2690_v23 = vmax.f32 %v2636_v46, 0.0  ;;  %v2571_v35 = vadd.f32 %v2987_v44, %v4560_v56  ;;  %v2651_v48 = vadd.f32 %v3011_v20, %v2426_v38 }
 0x228   : > { %v2565_v9 = vpop.f32.mrf.mxu0  ;;  %v2645_v19 = vpop.f32.mrf.mxu1 }
 0x229   : > { %2706 = vst [vmem:[%s4435_s7 + $0x50] sm:$0xff] %v2674_v14  ;;  %2722 = vst [vmem:[%s4435_s7 + $0xd0] sm:$0xff] %v2690_v23  ;;  %v2677_v39 = vmax.f32 %v2571_v35, 0.0  ;;  %v2693_v58 = vmax.f32 %v2651_v48, 0.0  ;;  %v2566_v31 = vadd.f32 %v2565_v9, %v4561_v57  ;;  %v2646_v12 = vadd.f32 %v2645_v19, %v2421_v17 }
 0x22a   : > { %v2990_v37 = vpop.f32.mrf.mxu0  ;;  %v3014_v40 = vpop.f32.mrf.mxu1 }
 0x22b   : > { %2709 = vst [vmem:[%s4435_s7 + $0x68] sm:$0xff] %v2677_v39  ;;  %2725 = vst [vmem:[%s4435_s7 + $0xe8] sm:$0xff] %v2693_v58  ;;  %v2676_v61 = vmax.f32 %v2566_v31, 0.0  ;;  %v2692_v3 = vmax.f32 %v2646_v12, 0.0  ;;  %v2581_v45 = vadd.f32 %v2990_v37, %v4563_v59  ;;  %v2661_v49 = vadd.f32 %v3014_v40, %v2436_v5 }
 0x22c   : > { %v2575_v53 = vpop.f32.mrf.mxu0  ;;  %v2655_v22 = vpop.f32.mrf.mxu1 }
 0x22d   : > { %2708 = vst [vmem:[%s4435_s7 + $0x60] sm:$0xff] %v2676_v61  ;;  %2724 = vst [vmem:[%s4435_s7 + $0xe0] sm:$0xff] %v2692_v3  ;;  %v2679_v25 = vmax.f32 %v2581_v45, 0.0  ;;  %v2695_v62 = vmax.f32 %v2661_v49, 0.0  ;;  %v2576_v33 = vadd.f32 %v2575_v53, %v4564_v15  ;;  %v2656_v26 = vadd.f32 %v2655_v22, %v2431_v34 }
 0x22f   : > { %2711 = vst [vmem:[%s4435_s7 + $0x78] sm:$0xff] %v2679_v25  ;;  %2727 = vst [vmem:[%s4435_s7 + $0xf8] sm:$0xff] %v2695_v62  ;;  %v2678_v55 = vmax.f32 %v2576_v33, 0.0  ;;  %v2694_v32 = vmax.f32 %v2656_v26, 0.0 }
 0x231   : > { %2710 = vst [vmem:[%s4435_s7 + $0x70] sm:$0xff] %v2678_v55  ;;  %2726 = vst [vmem:[%s4435_s7 + $0xf0] sm:$0xff] %v2694_v32 }
 0x232 PF: > { %s15_s20 = sadd.s32 1, %s3126_s20   ;;  %s4565_s18 = smov %s3122_s19 }
 0x233   : > { %p12_p5 = scmp.ge.s32.totalorder %s15_s20, 4   ;;  %s4566_s19 = smov %s4568_s1 }
 0x235   :  { %14 = sbr.rel (!%p12_p5) target bundleno = 2 (0x2), region = 96 }

</bundles_post_ra>
